<compile_context>
chip_gen: v6e
topology: v6e:2x2x1
jax: 0.10.0
libtpu: 0.0.40
codegen_flags: <defaults>
</compile_context>

<pallas_src>
import jax
import jax.numpy as jnp
from jax import lax
from jax.experimental import pallas as pl
from jax.experimental.pallas import tpu as pltpu

EPS = 1e-5


def _pad_to_128(c: int) -> int:
    return ((c + 127) // 128) * 128


# ----------------------------- fused Pallas kernel ----------------------------

def down_fused_kernel(x00_ref, x01_ref, x10_ref, x11_ref,
                      w1_ref, b1_ref, w2_ref, b2_ref, wi_ref, bi_ref,
                      o_ref, pad1, pad2):
    """One batch element: maxpool -> conv1 -> conv2 -> 1x1 identity + add + ReLU.

    x??_ref : (1, Ho, Wo, Cpi)   four taps of each 2x2 pooling window
    w1_ref  : (3, 3, Cpi, Cpo)   conv1 weights, BN1 scale folded in
    w2_ref  : (3, 3, Cpo, Cpo)   conv2 weights, BN2 scale folded in
    wi_ref  : (Cpi, Cpo)         1x1 identity weights, BNi scale folded in
    b*_ref  : (1, Cpo) f32       folded BN biases
    o_ref   : (1, Ho, Wo, Cpo)
    pad1    : VMEM (Ho+2, Wo+2, Cpi) f32   zero-padded pooled tile (conv1 halo)
    pad2    : VMEM (Ho+2, Wo+2, Cpo) f32   zero-padded h1 tile     (conv2 halo)
    """
    _, Ho, Wo, Cpi = x00_ref.shape
    Cpo = o_ref.shape[-1]
    M = Ho * Wo

    # ---- fused 2x2 maxpool (VPU) ------------------------------------------
    pooled = jnp.maximum(jnp.maximum(x00_ref[0], x01_ref[0]),
                         jnp.maximum(x10_ref[0], x11_ref[0]))   # (Ho, Wo, Cpi)

    # ---- conv1 3x3 (SAME) + BN + ReLU, as 9 shifted MXU dots ---------------
    pad1[...] = jnp.zeros(pad1.shape, pad1.dtype)
    pad1[1:Ho + 1, 1:Wo + 1, :] = pooled.astype(pad1.dtype)
    acc = jnp.zeros((M, Cpo), jnp.float32)
    for ky in range(3):
        for kx in range(3):
            win = pad1[ky:ky + Ho, kx:kx + Wo, :].reshape(M, Cpi)
            acc = acc + jnp.dot(win.astype(w1_ref.dtype), w1_ref[ky, kx],
                                preferred_element_type=jnp.float32)
    h1 = jnp.maximum(acc + b1_ref[...], 0.0)                    # (M, Cpo) f32

    # ---- conv2 3x3 (SAME) + BN + ReLU --------------------------------------
    pad2[...] = jnp.zeros(pad2.shape, pad2.dtype)
    pad2[1:Ho + 1, 1:Wo + 1, :] = h1.reshape(Ho, Wo, Cpo).astype(pad2.dtype)
    acc2 = jnp.zeros((M, Cpo), jnp.float32)
    for ky in range(3):
        for kx in range(3):
            win = pad2[ky:ky + Ho, kx:kx + Wo, :].reshape(M, Cpo)
            acc2 = acc2 + jnp.dot(win.astype(w2_ref.dtype), w2_ref[ky, kx],
                                  preferred_element_type=jnp.float32)
    h2 = jnp.maximum(acc2 + b2_ref[...], 0.0)                   # (M, Cpo) f32

    # ---- identity 1x1 conv + BN, residual add, final ReLU -------------------
    idn = jnp.dot(pooled.reshape(M, Cpi).astype(wi_ref.dtype), wi_ref[...],
                  preferred_element_type=jnp.float32) + bi_ref[...]
    out = jnp.maximum(h2 + idn, 0.0)
    o_ref[0] = out.reshape(Ho, Wo, Cpo).astype(o_ref.dtype)


# ----------------------------- parameter folding -----------------------------

def _fold_scale_bias(conv_bias, gamma, beta, mean, var):
    scale = gamma / jnp.sqrt(var + EPS)
    bias = beta + (conv_bias - mean) * scale
    return scale, bias


def _prep_conv3x3(w_oihw, conv_b, g, be, m, v, cpi, cpo, dtype):
    cout, cin = w_oihw.shape[0], w_oihw.shape[1]
    s, bias = _fold_scale_bias(conv_b, g, be, m, v)
    w = jnp.transpose(w_oihw, (2, 3, 1, 0)) * s                # (3,3,Cin,Cout)
    w = jnp.pad(w, ((0, 0), (0, 0), (0, cpi - cin), (0, cpo - cout))).astype(dtype)
    bias = jnp.pad(bias, (0, cpo - cout)).reshape(1, cpo).astype(jnp.float32)
    return w, bias


def _prep_conv1x1(w_oi11, g, be, m, v, cpi, cpo, dtype):
    cout, cin = w_oi11.shape[0], w_oi11.shape[1]
    s, bias = _fold_scale_bias(jnp.zeros((cout,), jnp.float32), g, be, m, v)
    w = jnp.transpose(w_oi11[:, :, 0, 0], (1, 0)) * s          # (Cin, Cout)
    w = jnp.pad(w, ((0, cpi - cin), (0, cpo - cout))).astype(dtype)
    bias = jnp.pad(bias, (0, cpo - cout)).reshape(1, cpo).astype(jnp.float32)
    return w, bias


# -------------------------------- forward pass --------------------------------

def down_forward(x_nchw, p, compute_dtype=jnp.bfloat16):
    """Down block forward. compute_dtype = MXU input dtype (bf16 fast path)."""
    N, Cin, H, W = x_nchw.shape
    assert H % 2 == 0 and W % 2 == 0
    Cout = p["w1"].shape[0]
    Ho, Wo = H // 2, W // 2
    Cpi, Cpo = _pad_to_128(Cin), _pad_to_128(Cout)

    # NCHW -> NHWC, lane-pad channels, cast to MXU dtype (halves HBM traffic
    # on the bf16 path).
    x = jnp.transpose(x_nchw, (0, 2, 3, 1))
    x = jnp.pad(x, ((0, 0), (0, 0), (0, 0), (0, Cpi - Cin))).astype(compute_dtype)

    # Four lane-dense strided views = the four taps of each 2x2 pooling window
    # (max is taken inside the kernel, fused with conv1).
    x00 = x[:, 0::2, 0::2, :]
    x01 = x[:, 0::2, 1::2, :]
    x10 = x[:, 1::2, 0::2, :]
    x11 = x[:, 1::2, 1::2, :]

    # Fold BN scale into weights (host side); kernels only add a bias.
    w1, b1 = _prep_conv3x3(p["w1"], p["b1"], p["g1"], p["be1"], p["m1"], p["v1"],
                           Cpi, Cpo, compute_dtype)
    w2, b2 = _prep_conv3x3(p["w2"], p["b2"], p["g2"], p["be2"], p["m2"], p["v2"],
                           Cpo, Cpo, compute_dtype)
    wi, bi = _prep_conv1x1(p["wi"], p["gi"], p["bei"], p["mi"], p["vi"],
                           Cpi, Cpo, compute_dtype)

    x_spec = pl.BlockSpec((1, Ho, Wo, Cpi), lambda n: (n, 0, 0, 0))
    vec_spec = pl.BlockSpec((1, Cpo), lambda n: (0, 0))

    out = pl.pallas_call(
        down_fused_kernel,
        out_shape=jax.ShapeDtypeStruct((N, Ho, Wo, Cpo), x_nchw.dtype),
        grid_spec=pltpu.PrefetchScalarGridSpec(
            num_scalar_prefetch=0,
            grid=(N,),
            in_specs=[
                x_spec, x_spec, x_spec, x_spec,
                pl.BlockSpec((3, 3, Cpi, Cpo), lambda n: (0, 0, 0, 0)),
                vec_spec,
                pl.BlockSpec((3, 3, Cpo, Cpo), lambda n: (0, 0, 0, 0)),
                vec_spec,
                pl.BlockSpec((Cpi, Cpo), lambda n: (0, 0)),
                vec_spec,
            ],
            out_specs=pl.BlockSpec((1, Ho, Wo, Cpo), lambda n: (n, 0, 0, 0)),
            scratch_shapes=[
                pltpu.VMEM((Ho + 2, Wo + 2, Cpi), jnp.float32),   # padded pooled
                pltpu.VMEM((Ho + 2, Wo + 2, Cpo), jnp.float32),   # padded h1
            ],
        ),
        compiler_params=pltpu.CompilerParams(
            dimension_semantics=("parallel",),            # shard batch over TCs
            vmem_limit_bytes=32 * 1024 * 1024,            # safe on v5e/v6e/v7x
        ),
    )(x00, x01, x10, x11, w1, b1, w2, b2, wi, bi)

    out = out[..., :Cout]                                  # drop channel padding
    return jnp.transpose(out, (0, 3, 1, 2))                # NHWC -> NCHW


# --------------------------------- parameters ---------------------------------

def init_params(key, cin, cout):
    ks = jax.random.split(key, 20)
    n = lambda k, s: 0.1 * jax.random.normal(k, s, dtype=jnp.float32)
    u = lambda k, s: jax.random.uniform(k, s, jnp.float32, 0.5, 1.5)
    return {
        # conv1 3x3 (+ BN1)
        "w1": n(ks[0], (cout, cin, 3, 3)), "b1": n(ks[1], (cout,)),
        "g1": 1.0 + n(ks[2], (cout,)), "be1": n(ks[3], (cout,)),
        "m1": n(ks[4], (cout,)), "v1": u(ks[5], (cout,)),
        # conv2 3x3 (+ BN2)
        "w2": n(ks[6], (cout, cout, 3, 3)), "b2": n(ks[7], (cout,)),
        "g2": 1.0 + n(ks[8], (cout,)), "be2": n(ks[9], (cout,)),
        "m2": n(ks[10], (cout,)), "v2": u(ks[11], (cout,)),
        # identity conv 1x1 (no bias) (+ BNi)
        "wi": n(ks[12], (cout, cin, 1, 1)),
        "gi": 1.0 + n(ks[13], (cout,)), "bei": n(ks[14], (cout,)),
        "mi": n(ks[15], (cout,)), "vi": u(ks[16], (cout,)),
    }


# ------------------------------- pure-JAX reference ---------------------------

def reference(x_nchw, p):
    pooled = lax.reduce_window(x_nchw, -jnp.inf, lax.max,
                               (1, 1, 2, 2), (1, 1, 2, 2), "VALID")

    def conv(x, w, b=None):
        y = lax.conv_general_dilated(x, w, (1, 1), "SAME",
                                     dimension_numbers=("NCHW", "OIHW", "NCHW"),
                                     precision=lax.Precision.HIGHEST)
        if b is not None:
            y = y + b[None, :, None, None]
        return y

    def bn(x, g, be, m, v):
        return ((x - m[None, :, None, None]) /
                jnp.sqrt(v[None, :, None, None] + EPS)) * g[None, :, None, None] \
               + be[None, :, None, None]

    h = jax.nn.relu(bn(conv(pooled, p["w1"], p["b1"]), p["g1"], p["be1"], p["m1"], p["v1"]))
    h = jax.nn.relu(bn(conv(h, p["w2"], p["b2"]), p["g2"], p["be2"], p["m2"], p["v2"]))
    idn = bn(conv(pooled, p["wi"]), p["gi"], p["bei"], p["mi"], p["vi"])
    return jax.nn.relu(h + idn)


# ------------------------------------ main ------------------------------------

if __name__ == "__main__":
    key = jax.random.PRNGKey(0)
    k_x, k_p = jax.random.split(key)

    N, Cin, H, W = 2, 4, 16, 16
    Cout = 8
    x = jax.random.normal(k_x, (N, Cin, H, W), dtype=jnp.float32)
    params = init_params(k_p, Cin, Cout)

    ref = jax.block_until_ready(reference(x, params))

    # f32 path: tight-tolerance fidelity check of the fused-kernel logic.
    out_f32 = jax.block_until_ready(down_forward(x, params, compute_dtype=jnp.float32))
    assert out_f32.shape == (N, Cout, H // 2, W // 2), out_f32.shape
    assert jnp.allclose(out_f32, ref, atol=2e-3, rtol=2e-3), \
        float(jnp.max(jnp.abs(out_f32 - ref)))

    # bf16 fast path (MXU inputs bf16, f32 accumulate/epilogue): loose tolerance.
    out_bf16 = jax.block_until_ready(down_forward(x, params, compute_dtype=jnp.bfloat16))
    assert out_bf16.shape == (N, Cout, H // 2, W // 2), out_bf16.shape
    assert jnp.allclose(out_bf16, ref, atol=5e-2, rtol=5e-2), \
        float(jnp.max(jnp.abs(out_bf16 - ref)))

    print("KERNEL_OK")
</pallas_src>

<mosaic_0001>
module attributes {stable_mosaic.version = 11 : i64} {
  func.func @down_fused_kernel(%arg0: i32, %arg1: memref<1x8x8x128xf32, #tpu.memory_space<vmem>>, %arg2: memref<1x8x8x128xf32, #tpu.memory_space<vmem>>, %arg3: memref<1x8x8x128xf32, #tpu.memory_space<vmem>>, %arg4: memref<1x8x8x128xf32, #tpu.memory_space<vmem>>, %arg5: memref<3x3x128x128xf32, #tpu.memory_space<vmem>>, %arg6: memref<1x128xf32, #tpu.memory_space<vmem>>, %arg7: memref<3x3x128x128xf32, #tpu.memory_space<vmem>>, %arg8: memref<1x128xf32, #tpu.memory_space<vmem>>, %arg9: memref<128x128xf32, #tpu.memory_space<vmem>>, %arg10: memref<1x128xf32, #tpu.memory_space<vmem>>, %arg11: memref<1x8x8x128xf32, #tpu.memory_space<vmem>>, %arg12: memref<10x10x128xf32, #tpu.memory_space<vmem>>, %arg13: memref<10x10x128xf32, #tpu.memory_space<vmem>>) attributes {dimension_semantics = [#tpu.dimension_semantics<parallel>], iteration_bounds = array<i64: 2>, scalar_prefetch = 0 : i64, scratch_operands = 2 : i64, tpu.core_type = #tpu.core_type<tc>, window_params = [{transform_indices = @transform_0, window_bounds = array<i64: 1, 8, 8, 128>}, {transform_indices = @transform_1, window_bounds = array<i64: 1, 8, 8, 128>}, {transform_indices = @transform_2, window_bounds = array<i64: 1, 8, 8, 128>}, {transform_indices = @transform_3, window_bounds = array<i64: 1, 8, 8, 128>}, {pipeline_mode = #tpu.pipeline_mode<synchronous>, transform_indices = @transform_4, window_bounds = array<i64: 3, 3, 128, 128>}, {pipeline_mode = #tpu.pipeline_mode<synchronous>, transform_indices = @transform_5, window_bounds = array<i64: 1, 128>}, {pipeline_mode = #tpu.pipeline_mode<synchronous>, transform_indices = @transform_6, window_bounds = array<i64: 3, 3, 128, 128>}, {pipeline_mode = #tpu.pipeline_mode<synchronous>, transform_indices = @transform_7, window_bounds = array<i64: 1, 128>}, {pipeline_mode = #tpu.pipeline_mode<synchronous>, transform_indices = @transform_8, window_bounds = array<i64: 128, 128>}, {pipeline_mode = #tpu.pipeline_mode<synchronous>, transform_indices = @transform_9, window_bounds = array<i64: 1, 128>}, {transform_indices = @transform_10, window_bounds = array<i64: 1, 8, 8, 128>}]} {
    %c0 = arith.constant 0 : index
    %c0_0 = arith.constant 0 : index
    %c0_1 = arith.constant 0 : index
    %c0_2 = arith.constant 0 : index
    %0 = vector.load %arg1[%c0, %c0_0, %c0_1, %c0_2] : memref<1x8x8x128xf32, #tpu.memory_space<vmem>>, vector<1x8x8x128xf32>
    %1 = vector.shape_cast %0 : vector<1x8x8x128xf32> to vector<8x8x128xf32>
    %c0_3 = arith.constant 0 : index
    %c0_4 = arith.constant 0 : index
    %c0_5 = arith.constant 0 : index
    %c0_6 = arith.constant 0 : index
    %2 = vector.load %arg2[%c0_3, %c0_4, %c0_5, %c0_6] : memref<1x8x8x128xf32, #tpu.memory_space<vmem>>, vector<1x8x8x128xf32>
    %3 = vector.shape_cast %2 : vector<1x8x8x128xf32> to vector<8x8x128xf32>
    %4 = arith.maximumf %1, %3 : vector<8x8x128xf32>
    %c0_7 = arith.constant 0 : index
    %c0_8 = arith.constant 0 : index
    %c0_9 = arith.constant 0 : index
    %c0_10 = arith.constant 0 : index
    %5 = vector.load %arg3[%c0_7, %c0_8, %c0_9, %c0_10] : memref<1x8x8x128xf32, #tpu.memory_space<vmem>>, vector<1x8x8x128xf32>
    %6 = vector.shape_cast %5 : vector<1x8x8x128xf32> to vector<8x8x128xf32>
    %c0_11 = arith.constant 0 : index
    %c0_12 = arith.constant 0 : index
    %c0_13 = arith.constant 0 : index
    %c0_14 = arith.constant 0 : index
    %7 = vector.load %arg4[%c0_11, %c0_12, %c0_13, %c0_14] : memref<1x8x8x128xf32, #tpu.memory_space<vmem>>, vector<1x8x8x128xf32>
    %8 = vector.shape_cast %7 : vector<1x8x8x128xf32> to vector<8x8x128xf32>
    %9 = arith.maximumf %6, %8 : vector<8x8x128xf32>
    %10 = arith.maximumf %4, %9 : vector<8x8x128xf32>
    %cst = arith.constant 0.000000e+00 : f32
    %11 = vector.broadcast %cst : f32 to vector<10x10x128xf32>
    %c0_15 = arith.constant 0 : index
    %c0_16 = arith.constant 0 : index
    %c0_17 = arith.constant 0 : index
    %12 = vector.load %arg12[%c0_15, %c0_16, %c0_17] : memref<10x10x128xf32, #tpu.memory_space<vmem>>, vector<10x10x128xf32>
    tpu.vector_store %arg12[%c0_15, %c0_16, %c0_17], %11 {strides = array<i32>} : memref<10x10x128xf32, #tpu.memory_space<vmem>>, vector<10x10x128xf32>,
    %c1 = arith.constant 1 : index
    %c1_18 = arith.constant 1 : index
    %c0_19 = arith.constant 0 : index
    %13 = vector.load %arg12[%c1, %c1_18, %c0_19] : memref<10x10x128xf32, #tpu.memory_space<vmem>>, vector<8x8x128xf32>
    tpu.vector_store %arg12[%c1, %c1_18, %c0_19], %10 {strides = array<i32>} : memref<10x10x128xf32, #tpu.memory_space<vmem>>, vector<8x8x128xf32>,
    %cst_20 = arith.constant 0.000000e+00 : f32
    %14 = vector.broadcast %cst_20 : f32 to vector<64x128xf32>
    %c0_21 = arith.constant 0 : index
    %c0_22 = arith.constant 0 : index
    %c0_23 = arith.constant 0 : index
    %15 = vector.load %arg12[%c0_21, %c0_22, %c0_23] : memref<10x10x128xf32, #tpu.memory_space<vmem>>, vector<8x8x128xf32>
    %16 = vector.shape_cast %15 : vector<8x8x128xf32> to vector<64x128xf32>
    %c0_24 = arith.constant 0 : index
    %c0_25 = arith.constant 0 : index
    %c0_26 = arith.constant 0 : index
    %c0_27 = arith.constant 0 : index
    %17 = vector.load %arg5[%c0_24, %c0_25, %c0_26, %c0_27] : memref<3x3x128x128xf32, #tpu.memory_space<vmem>>, vector<1x1x128x128xf32>
    %18 = vector.shape_cast %17 : vector<1x1x128x128xf32> to vector<128x128xf32>
    %cst_28 = arith.constant dense<0.000000e+00> : vector<64x128xf32>
    %19 = tpu.matmul %16, %18, %cst_28 {dimension_numbers = #tpu.dot_dimension_numbers<[1], [0], [0], [1], [0, 0, 1, 1], [], []>} : vector<64x128xf32>, vector<128x128xf32>, vector<64x128xf32> -> vector<64x128xf32>
    %20 = arith.addf %14, %19 : vector<64x128xf32>
    %c0_29 = arith.constant 0 : index
    %c1_30 = arith.constant 1 : index
    %c0_31 = arith.constant 0 : index
    %21 = vector.load %arg12[%c0_29, %c1_30, %c0_31] : memref<10x10x128xf32, #tpu.memory_space<vmem>>, vector<8x8x128xf32>
    %22 = vector.shape_cast %21 : vector<8x8x128xf32> to vector<64x128xf32>
    %c0_32 = arith.constant 0 : index
    %c1_33 = arith.constant 1 : index
    %c0_34 = arith.constant 0 : index
    %c0_35 = arith.constant 0 : index
    %23 = vector.load %arg5[%c0_32, %c1_33, %c0_34, %c0_35] : memref<3x3x128x128xf32, #tpu.memory_space<vmem>>, vector<1x1x128x128xf32>
    %24 = vector.shape_cast %23 : vector<1x1x128x128xf32> to vector<128x128xf32>
    %cst_36 = arith.constant dense<0.000000e+00> : vector<64x128xf32>
    %25 = tpu.matmul %22, %24, %cst_36 {dimension_numbers = #tpu.dot_dimension_numbers<[1], [0], [0], [1], [0, 0, 1, 1], [], []>} : vector<64x128xf32>, vector<128x128xf32>, vector<64x128xf32> -> vector<64x128xf32>
    %26 = arith.addf %20, %25 : vector<64x128xf32>
    %c0_37 = arith.constant 0 : index
    %c2 = arith.constant 2 : index
    %c0_38 = arith.constant 0 : index
    %27 = vector.load %arg12[%c0_37, %c2, %c0_38] : memref<10x10x128xf32, #tpu.memory_space<vmem>>, vector<8x8x128xf32>
    %28 = vector.shape_cast %27 : vector<8x8x128xf32> to vector<64x128xf32>
    %c0_39 = arith.constant 0 : index
    %c2_40 = arith.constant 2 : index
    %c0_41 = arith.constant 0 : index
    %c0_42 = arith.constant 0 : index
    %29 = vector.load %arg5[%c0_39, %c2_40, %c0_41, %c0_42] : memref<3x3x128x128xf32, #tpu.memory_space<vmem>>, vector<1x1x128x128xf32>
    %30 = vector.shape_cast %29 : vector<1x1x128x128xf32> to vector<128x128xf32>
    %cst_43 = arith.constant dense<0.000000e+00> : vector<64x128xf32>
    %31 = tpu.matmul %28, %30, %cst_43 {dimension_numbers = #tpu.dot_dimension_numbers<[1], [0], [0], [1], [0, 0, 1, 1], [], []>} : vector<64x128xf32>, vector<128x128xf32>, vector<64x128xf32> -> vector<64x128xf32>
    %32 = arith.addf %26, %31 : vector<64x128xf32>
    %c1_44 = arith.constant 1 : index
    %c0_45 = arith.constant 0 : index
    %c0_46 = arith.constant 0 : index
    %33 = vector.load %arg12[%c1_44, %c0_45, %c0_46] : memref<10x10x128xf32, #tpu.memory_space<vmem>>, vector<8x8x128xf32>
    %34 = vector.shape_cast %33 : vector<8x8x128xf32> to vector<64x128xf32>
    %c1_47 = arith.constant 1 : index
    %c0_48 = arith.constant 0 : index
    %c0_49 = arith.constant 0 : index
    %c0_50 = arith.constant 0 : index
    %35 = vector.load %arg5[%c1_47, %c0_48, %c0_49, %c0_50] : memref<3x3x128x128xf32, #tpu.memory_space<vmem>>, vector<1x1x128x128xf32>
    %36 = vector.shape_cast %35 : vector<1x1x128x128xf32> to vector<128x128xf32>
    %cst_51 = arith.constant dense<0.000000e+00> : vector<64x128xf32>
    %37 = tpu.matmul %34, %36, %cst_51 {dimension_numbers = #tpu.dot_dimension_numbers<[1], [0], [0], [1], [0, 0, 1, 1], [], []>} : vector<64x128xf32>, vector<128x128xf32>, vector<64x128xf32> -> vector<64x128xf32>
    %38 = arith.addf %32, %37 : vector<64x128xf32>
    %c1_52 = arith.constant 1 : index
    %c1_53 = arith.constant 1 : index
    %c0_54 = arith.constant 0 : index
    %39 = vector.load %arg12[%c1_52, %c1_53, %c0_54] : memref<10x10x128xf32, #tpu.memory_space<vmem>>, vector<8x8x128xf32>
    %40 = vector.shape_cast %39 : vector<8x8x128xf32> to vector<64x128xf32>
    %c1_55 = arith.constant 1 : index
    %c1_56 = arith.constant 1 : index
    %c0_57 = arith.constant 0 : index
    %c0_58 = arith.constant 0 : index
    %41 = vector.load %arg5[%c1_55, %c1_56, %c0_57, %c0_58] : memref<3x3x128x128xf32, #tpu.memory_space<vmem>>, vector<1x1x128x128xf32>
    %42 = vector.shape_cast %41 : vector<1x1x128x128xf32> to vector<128x128xf32>
    %cst_59 = arith.constant dense<0.000000e+00> : vector<64x128xf32>
    %43 = tpu.matmul %40, %42, %cst_59 {dimension_numbers = #tpu.dot_dimension_numbers<[1], [0], [0], [1], [0, 0, 1, 1], [], []>} : vector<64x128xf32>, vector<128x128xf32>, vector<64x128xf32> -> vector<64x128xf32>
    %44 = arith.addf %38, %43 : vector<64x128xf32>
    %c1_60 = arith.constant 1 : index
    %c2_61 = arith.constant 2 : index
    %c0_62 = arith.constant 0 : index
    %45 = vector.load %arg12[%c1_60, %c2_61, %c0_62] : memref<10x10x128xf32, #tpu.memory_space<vmem>>, vector<8x8x128xf32>
    %46 = vector.shape_cast %45 : vector<8x8x128xf32> to vector<64x128xf32>
    %c1_63 = arith.constant 1 : index
    %c2_64 = arith.constant 2 : index
    %c0_65 = arith.constant 0 : index
    %c0_66 = arith.constant 0 : index
    %47 = vector.load %arg5[%c1_63, %c2_64, %c0_65, %c0_66] : memref<3x3x128x128xf32, #tpu.memory_space<vmem>>, vector<1x1x128x128xf32>
    %48 = vector.shape_cast %47 : vector<1x1x128x128xf32> to vector<128x128xf32>
    %cst_67 = arith.constant dense<0.000000e+00> : vector<64x128xf32>
    %49 = tpu.matmul %46, %48, %cst_67 {dimension_numbers = #tpu.dot_dimension_numbers<[1], [0], [0], [1], [0, 0, 1, 1], [], []>} : vector<64x128xf32>, vector<128x128xf32>, vector<64x128xf32> -> vector<64x128xf32>
    %50 = arith.addf %44, %49 : vector<64x128xf32>
    %c2_68 = arith.constant 2 : index
    %c0_69 = arith.constant 0 : index
    %c0_70 = arith.constant 0 : index
    %51 = vector.load %arg12[%c2_68, %c0_69, %c0_70] : memref<10x10x128xf32, #tpu.memory_space<vmem>>, vector<8x8x128xf32>
    %52 = vector.shape_cast %51 : vector<8x8x128xf32> to vector<64x128xf32>
    %c2_71 = arith.constant 2 : index
    %c0_72 = arith.constant 0 : index
    %c0_73 = arith.constant 0 : index
    %c0_74 = arith.constant 0 : index
    %53 = vector.load %arg5[%c2_71, %c0_72, %c0_73, %c0_74] : memref<3x3x128x128xf32, #tpu.memory_space<vmem>>, vector<1x1x128x128xf32>
    %54 = vector.shape_cast %53 : vector<1x1x128x128xf32> to vector<128x128xf32>
    %cst_75 = arith.constant dense<0.000000e+00> : vector<64x128xf32>
    %55 = tpu.matmul %52, %54, %cst_75 {dimension_numbers = #tpu.dot_dimension_numbers<[1], [0], [0], [1], [0, 0, 1, 1], [], []>} : vector<64x128xf32>, vector<128x128xf32>, vector<64x128xf32> -> vector<64x128xf32>
    %56 = arith.addf %50, %55 : vector<64x128xf32>
    %c2_76 = arith.constant 2 : index
    %c1_77 = arith.constant 1 : index
    %c0_78 = arith.constant 0 : index
    %57 = vector.load %arg12[%c2_76, %c1_77, %c0_78] : memref<10x10x128xf32, #tpu.memory_space<vmem>>, vector<8x8x128xf32>
    %58 = vector.shape_cast %57 : vector<8x8x128xf32> to vector<64x128xf32>
    %c2_79 = arith.constant 2 : index
    %c1_80 = arith.constant 1 : index
    %c0_81 = arith.constant 0 : index
    %c0_82 = arith.constant 0 : index
    %59 = vector.load %arg5[%c2_79, %c1_80, %c0_81, %c0_82] : memref<3x3x128x128xf32, #tpu.memory_space<vmem>>, vector<1x1x128x128xf32>
    %60 = vector.shape_cast %59 : vector<1x1x128x128xf32> to vector<128x128xf32>
    %cst_83 = arith.constant dense<0.000000e+00> : vector<64x128xf32>
    %61 = tpu.matmul %58, %60, %cst_83 {dimension_numbers = #tpu.dot_dimension_numbers<[1], [0], [0], [1], [0, 0, 1, 1], [], []>} : vector<64x128xf32>, vector<128x128xf32>, vector<64x128xf32> -> vector<64x128xf32>
    %62 = arith.addf %56, %61 : vector<64x128xf32>
    %c2_84 = arith.constant 2 : index
    %c2_85 = arith.constant 2 : index
    %c0_86 = arith.constant 0 : index
    %63 = vector.load %arg12[%c2_84, %c2_85, %c0_86] : memref<10x10x128xf32, #tpu.memory_space<vmem>>, vector<8x8x128xf32>
    %64 = vector.shape_cast %63 : vector<8x8x128xf32> to vector<64x128xf32>
    %c2_87 = arith.constant 2 : index
    %c2_88 = arith.constant 2 : index
    %c0_89 = arith.constant 0 : index
    %c0_90 = arith.constant 0 : index
    %65 = vector.load %arg5[%c2_87, %c2_88, %c0_89, %c0_90] : memref<3x3x128x128xf32, #tpu.memory_space<vmem>>, vector<1x1x128x128xf32>
    %66 = vector.shape_cast %65 : vector<1x1x128x128xf32> to vector<128x128xf32>
    %cst_91 = arith.constant dense<0.000000e+00> : vector<64x128xf32>
    %67 = tpu.matmul %64, %66, %cst_91 {dimension_numbers = #tpu.dot_dimension_numbers<[1], [0], [0], [1], [0, 0, 1, 1], [], []>} : vector<64x128xf32>, vector<128x128xf32>, vector<64x128xf32> -> vector<64x128xf32>
    %68 = arith.addf %62, %67 : vector<64x128xf32>
    %c0_92 = arith.constant 0 : index
    %c0_93 = arith.constant 0 : index
    %69 = vector.load %arg6[%c0_92, %c0_93] : memref<1x128xf32, #tpu.memory_space<vmem>>, vector<1x128xf32>
    %70 = vector.broadcast %69 : vector<1x128xf32> to vector<64x128xf32>
    %71 = arith.addf %68, %70 : vector<64x128xf32>
    %cst_94 = arith.constant 0.000000e+00 : f32
    %72 = vector.broadcast %cst_94 : f32 to vector<64x128xf32>
    %73 = arith.maximumf %71, %72 : vector<64x128xf32>
    %cst_95 = arith.constant 0.000000e+00 : f32
    %74 = vector.broadcast %cst_95 : f32 to vector<10x10x128xf32>
    %c0_96 = arith.constant 0 : index
    %c0_97 = arith.constant 0 : index
    %c0_98 = arith.constant 0 : index
    %75 = vector.load %arg13[%c0_96, %c0_97, %c0_98] : memref<10x10x128xf32, #tpu.memory_space<vmem>>, vector<10x10x128xf32>
    tpu.vector_store %arg13[%c0_96, %c0_97, %c0_98], %74 {strides = array<i32>} : memref<10x10x128xf32, #tpu.memory_space<vmem>>, vector<10x10x128xf32>,
    %76 = vector.shape_cast %73 : vector<64x128xf32> to vector<8x8x128xf32>
    %c1_99 = arith.constant 1 : index
    %c1_100 = arith.constant 1 : index
    %c0_101 = arith.constant 0 : index
    %77 = vector.load %arg13[%c1_99, %c1_100, %c0_101] : memref<10x10x128xf32, #tpu.memory_space<vmem>>, vector<8x8x128xf32>
    tpu.vector_store %arg13[%c1_99, %c1_100, %c0_101], %76 {strides = array<i32>} : memref<10x10x128xf32, #tpu.memory_space<vmem>>, vector<8x8x128xf32>,
    %cst_102 = arith.constant 0.000000e+00 : f32
    %78 = vector.broadcast %cst_102 : f32 to vector<64x128xf32>
    %c0_103 = arith.constant 0 : index
    %c0_104 = arith.constant 0 : index
    %c0_105 = arith.constant 0 : index
    %79 = vector.load %arg13[%c0_103, %c0_104, %c0_105] : memref<10x10x128xf32, #tpu.memory_space<vmem>>, vector<8x8x128xf32>
    %80 = vector.shape_cast %79 : vector<8x8x128xf32> to vector<64x128xf32>
    %c0_106 = arith.constant 0 : index
    %c0_107 = arith.constant 0 : index
    %c0_108 = arith.constant 0 : index
    %c0_109 = arith.constant 0 : index
    %81 = vector.load %arg7[%c0_106, %c0_107, %c0_108, %c0_109] : memref<3x3x128x128xf32, #tpu.memory_space<vmem>>, vector<1x1x128x128xf32>
    %82 = vector.shape_cast %81 : vector<1x1x128x128xf32> to vector<128x128xf32>
    %cst_110 = arith.constant dense<0.000000e+00> : vector<64x128xf32>
    %83 = tpu.matmul %80, %82, %cst_110 {dimension_numbers = #tpu.dot_dimension_numbers<[1], [0], [0], [1], [0, 0, 1, 1], [], []>} : vector<64x128xf32>, vector<128x128xf32>, vector<64x128xf32> -> vector<64x128xf32>
    %84 = arith.addf %78, %83 : vector<64x128xf32>
    %c0_111 = arith.constant 0 : index
    %c1_112 = arith.constant 1 : index
    %c0_113 = arith.constant 0 : index
    %85 = vector.load %arg13[%c0_111, %c1_112, %c0_113] : memref<10x10x128xf32, #tpu.memory_space<vmem>>, vector<8x8x128xf32>
    %86 = vector.shape_cast %85 : vector<8x8x128xf32> to vector<64x128xf32>
    %c0_114 = arith.constant 0 : index
    %c1_115 = arith.constant 1 : index
    %c0_116 = arith.constant 0 : index
    %c0_117 = arith.constant 0 : index
    %87 = vector.load %arg7[%c0_114, %c1_115, %c0_116, %c0_117] : memref<3x3x128x128xf32, #tpu.memory_space<vmem>>, vector<1x1x128x128xf32>
    %88 = vector.shape_cast %87 : vector<1x1x128x128xf32> to vector<128x128xf32>
    %cst_118 = arith.constant dense<0.000000e+00> : vector<64x128xf32>
    %89 = tpu.matmul %86, %88, %cst_118 {dimension_numbers = #tpu.dot_dimension_numbers<[1], [0], [0], [1], [0, 0, 1, 1], [], []>} : vector<64x128xf32>, vector<128x128xf32>, vector<64x128xf32> -> vector<64x128xf32>
    %90 = arith.addf %84, %89 : vector<64x128xf32>
    %c0_119 = arith.constant 0 : index
    %c2_120 = arith.constant 2 : index
    %c0_121 = arith.constant 0 : index
    %91 = vector.load %arg13[%c0_119, %c2_120, %c0_121] : memref<10x10x128xf32, #tpu.memory_space<vmem>>, vector<8x8x128xf32>
    %92 = vector.shape_cast %91 : vector<8x8x128xf32> to vector<64x128xf32>
    %c0_122 = arith.constant 0 : index
    %c2_123 = arith.constant 2 : index
    %c0_124 = arith.constant 0 : index
    %c0_125 = arith.constant 0 : index
    %93 = vector.load %arg7[%c0_122, %c2_123, %c0_124, %c0_125] : memref<3x3x128x128xf32, #tpu.memory_space<vmem>>, vector<1x1x128x128xf32>
    %94 = vector.shape_cast %93 : vector<1x1x128x128xf32> to vector<128x128xf32>
    %cst_126 = arith.constant dense<0.000000e+00> : vector<64x128xf32>
    %95 = tpu.matmul %92, %94, %cst_126 {dimension_numbers = #tpu.dot_dimension_numbers<[1], [0], [0], [1], [0, 0, 1, 1], [], []>} : vector<64x128xf32>, vector<128x128xf32>, vector<64x128xf32> -> vector<64x128xf32>
    %96 = arith.addf %90, %95 : vector<64x128xf32>
    %c1_127 = arith.constant 1 : index
    %c0_128 = arith.constant 0 : index
    %c0_129 = arith.constant 0 : index
    %97 = vector.load %arg13[%c1_127, %c0_128, %c0_129] : memref<10x10x128xf32, #tpu.memory_space<vmem>>, vector<8x8x128xf32>
    %98 = vector.shape_cast %97 : vector<8x8x128xf32> to vector<64x128xf32>
    %c1_130 = arith.constant 1 : index
    %c0_131 = arith.constant 0 : index
    %c0_132 = arith.constant 0 : index
    %c0_133 = arith.constant 0 : index
    %99 = vector.load %arg7[%c1_130, %c0_131, %c0_132, %c0_133] : memref<3x3x128x128xf32, #tpu.memory_space<vmem>>, vector<1x1x128x128xf32>
    %100 = vector.shape_cast %99 : vector<1x1x128x128xf32> to vector<128x128xf32>
    %cst_134 = arith.constant dense<0.000000e+00> : vector<64x128xf32>
    %101 = tpu.matmul %98, %100, %cst_134 {dimension_numbers = #tpu.dot_dimension_numbers<[1], [0], [0], [1], [0, 0, 1, 1], [], []>} : vector<64x128xf32>, vector<128x128xf32>, vector<64x128xf32> -> vector<64x128xf32>
    %102 = arith.addf %96, %101 : vector<64x128xf32>
    %c1_135 = arith.constant 1 : index
    %c1_136 = arith.constant 1 : index
    %c0_137 = arith.constant 0 : index
    %103 = vector.load %arg13[%c1_135, %c1_136, %c0_137] : memref<10x10x128xf32, #tpu.memory_space<vmem>>, vector<8x8x128xf32>
    %104 = vector.shape_cast %103 : vector<8x8x128xf32> to vector<64x128xf32>
    %c1_138 = arith.constant 1 : index
    %c1_139 = arith.constant 1 : index
    %c0_140 = arith.constant 0 : index
    %c0_141 = arith.constant 0 : index
    %105 = vector.load %arg7[%c1_138, %c1_139, %c0_140, %c0_141] : memref<3x3x128x128xf32, #tpu.memory_space<vmem>>, vector<1x1x128x128xf32>
    %106 = vector.shape_cast %105 : vector<1x1x128x128xf32> to vector<128x128xf32>
    %cst_142 = arith.constant dense<0.000000e+00> : vector<64x128xf32>
    %107 = tpu.matmul %104, %106, %cst_142 {dimension_numbers = #tpu.dot_dimension_numbers<[1], [0], [0], [1], [0, 0, 1, 1], [], []>} : vector<64x128xf32>, vector<128x128xf32>, vector<64x128xf32> -> vector<64x128xf32>
    %108 = arith.addf %102, %107 : vector<64x128xf32>
    %c1_143 = arith.constant 1 : index
    %c2_144 = arith.constant 2 : index
    %c0_145 = arith.constant 0 : index
    %109 = vector.load %arg13[%c1_143, %c2_144, %c0_145] : memref<10x10x128xf32, #tpu.memory_space<vmem>>, vector<8x8x128xf32>
    %110 = vector.shape_cast %109 : vector<8x8x128xf32> to vector<64x128xf32>
    %c1_146 = arith.constant 1 : index
    %c2_147 = arith.constant 2 : index
    %c0_148 = arith.constant 0 : index
    %c0_149 = arith.constant 0 : index
    %111 = vector.load %arg7[%c1_146, %c2_147, %c0_148, %c0_149] : memref<3x3x128x128xf32, #tpu.memory_space<vmem>>, vector<1x1x128x128xf32>
    %112 = vector.shape_cast %111 : vector<1x1x128x128xf32> to vector<128x128xf32>
    %cst_150 = arith.constant dense<0.000000e+00> : vector<64x128xf32>
    %113 = tpu.matmul %110, %112, %cst_150 {dimension_numbers = #tpu.dot_dimension_numbers<[1], [0], [0], [1], [0, 0, 1, 1], [], []>} : vector<64x128xf32>, vector<128x128xf32>, vector<64x128xf32> -> vector<64x128xf32>
    %114 = arith.addf %108, %113 : vector<64x128xf32>
    %c2_151 = arith.constant 2 : index
    %c0_152 = arith.constant 0 : index
    %c0_153 = arith.constant 0 : index
    %115 = vector.load %arg13[%c2_151, %c0_152, %c0_153] : memref<10x10x128xf32, #tpu.memory_space<vmem>>, vector<8x8x128xf32>
    %116 = vector.shape_cast %115 : vector<8x8x128xf32> to vector<64x128xf32>
    %c2_154 = arith.constant 2 : index
    %c0_155 = arith.constant 0 : index
    %c0_156 = arith.constant 0 : index
    %c0_157 = arith.constant 0 : index
    %117 = vector.load %arg7[%c2_154, %c0_155, %c0_156, %c0_157] : memref<3x3x128x128xf32, #tpu.memory_space<vmem>>, vector<1x1x128x128xf32>
    %118 = vector.shape_cast %117 : vector<1x1x128x128xf32> to vector<128x128xf32>
    %cst_158 = arith.constant dense<0.000000e+00> : vector<64x128xf32>
    %119 = tpu.matmul %116, %118, %cst_158 {dimension_numbers = #tpu.dot_dimension_numbers<[1], [0], [0], [1], [0, 0, 1, 1], [], []>} : vector<64x128xf32>, vector<128x128xf32>, vector<64x128xf32> -> vector<64x128xf32>
    %120 = arith.addf %114, %119 : vector<64x128xf32>
    %c2_159 = arith.constant 2 : index
    %c1_160 = arith.constant 1 : index
    %c0_161 = arith.constant 0 : index
    %121 = vector.load %arg13[%c2_159, %c1_160, %c0_161] : memref<10x10x128xf32, #tpu.memory_space<vmem>>, vector<8x8x128xf32>
    %122 = vector.shape_cast %121 : vector<8x8x128xf32> to vector<64x128xf32>
    %c2_162 = arith.constant 2 : index
    %c1_163 = arith.constant 1 : index
    %c0_164 = arith.constant 0 : index
    %c0_165 = arith.constant 0 : index
    %123 = vector.load %arg7[%c2_162, %c1_163, %c0_164, %c0_165] : memref<3x3x128x128xf32, #tpu.memory_space<vmem>>, vector<1x1x128x128xf32>
    %124 = vector.shape_cast %123 : vector<1x1x128x128xf32> to vector<128x128xf32>
    %cst_166 = arith.constant dense<0.000000e+00> : vector<64x128xf32>
    %125 = tpu.matmul %122, %124, %cst_166 {dimension_numbers = #tpu.dot_dimension_numbers<[1], [0], [0], [1], [0, 0, 1, 1], [], []>} : vector<64x128xf32>, vector<128x128xf32>, vector<64x128xf32> -> vector<64x128xf32>
    %126 = arith.addf %120, %125 : vector<64x128xf32>
    %c2_167 = arith.constant 2 : index
    %c2_168 = arith.constant 2 : index
    %c0_169 = arith.constant 0 : index
    %127 = vector.load %arg13[%c2_167, %c2_168, %c0_169] : memref<10x10x128xf32, #tpu.memory_space<vmem>>, vector<8x8x128xf32>
    %128 = vector.shape_cast %127 : vector<8x8x128xf32> to vector<64x128xf32>
    %c2_170 = arith.constant 2 : index
    %c2_171 = arith.constant 2 : index
    %c0_172 = arith.constant 0 : index
    %c0_173 = arith.constant 0 : index
    %129 = vector.load %arg7[%c2_170, %c2_171, %c0_172, %c0_173] : memref<3x3x128x128xf32, #tpu.memory_space<vmem>>, vector<1x1x128x128xf32>
    %130 = vector.shape_cast %129 : vector<1x1x128x128xf32> to vector<128x128xf32>
    %cst_174 = arith.constant dense<0.000000e+00> : vector<64x128xf32>
    %131 = tpu.matmul %128, %130, %cst_174 {dimension_numbers = #tpu.dot_dimension_numbers<[1], [0], [0], [1], [0, 0, 1, 1], [], []>} : vector<64x128xf32>, vector<128x128xf32>, vector<64x128xf32> -> vector<64x128xf32>
    %132 = arith.addf %126, %131 : vector<64x128xf32>
    %c0_175 = arith.constant 0 : index
    %c0_176 = arith.constant 0 : index
    %133 = vector.load %arg8[%c0_175, %c0_176] : memref<1x128xf32, #tpu.memory_space<vmem>>, vector<1x128xf32>
    %134 = vector.broadcast %133 : vector<1x128xf32> to vector<64x128xf32>
    %135 = arith.addf %132, %134 : vector<64x128xf32>
    %cst_177 = arith.constant 0.000000e+00 : f32
    %136 = vector.broadcast %cst_177 : f32 to vector<64x128xf32>
    %137 = arith.maximumf %135, %136 : vector<64x128xf32>
    %138 = vector.shape_cast %10 : vector<8x8x128xf32> to vector<64x128xf32>
    %c0_178 = arith.constant 0 : index
    %c0_179 = arith.constant 0 : index
    %139 = vector.load %arg9[%c0_178, %c0_179] : memref<128x128xf32, #tpu.memory_space<vmem>>, vector<128x128xf32>
    %cst_180 = arith.constant dense<0.000000e+00> : vector<64x128xf32>
    %140 = tpu.matmul %138, %139, %cst_180 {dimension_numbers = #tpu.dot_dimension_numbers<[1], [0], [0], [1], [0, 0, 1, 1], [], []>} : vector<64x128xf32>, vector<128x128xf32>, vector<64x128xf32> -> vector<64x128xf32>
    %c0_181 = arith.constant 0 : index
    %c0_182 = arith.constant 0 : index
    %141 = vector.load %arg10[%c0_181, %c0_182] : memref<1x128xf32, #tpu.memory_space<vmem>>, vector<1x128xf32>
    %142 = vector.broadcast %141 : vector<1x128xf32> to vector<64x128xf32>
    %143 = arith.addf %140, %142 : vector<64x128xf32>
    %144 = arith.addf %137, %143 : vector<64x128xf32>
    %cst_183 = arith.constant 0.000000e+00 : f32
    %145 = vector.broadcast %cst_183 : f32 to vector<64x128xf32>
    %146 = arith.maximumf %144, %145 : vector<64x128xf32>
    %147 = vector.shape_cast %146 : vector<64x128xf32> to vector<8x8x128xf32>
    %c0_184 = arith.constant 0 : index
    %c0_185 = arith.constant 0 : index
    %c0_186 = arith.constant 0 : index
    %c0_187 = arith.constant 0 : index
    %148 = vector.load %arg11[%c0_184, %c0_185, %c0_186, %c0_187] : memref<1x8x8x128xf32, #tpu.memory_space<vmem>>, vector<1x8x8x128xf32>
    %149 = vector.shape_cast %148 : vector<1x8x8x128xf32> to vector<8x8x128xf32>
    %150 = vector.shape_cast %147 : vector<8x8x128xf32> to vector<1x8x8x128xf32>
    tpu.vector_store %arg11[%c0_184, %c0_185, %c0_186, %c0_187], %150 {strides = array<i32>} : memref<1x8x8x128xf32, #tpu.memory_space<vmem>>, vector<1x8x8x128xf32>,
    return
  }
  func.func @transform_0(%arg0: i32) -> (i32, i32, i32, i32) {
    %c0_i32 = arith.constant 0 : i32
    %c0_i32_0 = arith.constant 0 : i32
    %c0_i32_1 = arith.constant 0 : i32
    %c0_i32_2 = arith.constant 0 : i32
    return %arg0, %c0_i32, %c0_i32_0, %c0_i32_1 : i32, i32, i32, i32
  }
  func.func @transform_1(%arg0: i32) -> (i32, i32, i32, i32) {
    %c0_i32 = arith.constant 0 : i32
    %c0_i32_0 = arith.constant 0 : i32
    %c0_i32_1 = arith.constant 0 : i32
    %c0_i32_2 = arith.constant 0 : i32
    return %arg0, %c0_i32, %c0_i32_0, %c0_i32_1 : i32, i32, i32, i32
  }
  func.func @transform_2(%arg0: i32) -> (i32, i32, i32, i32) {
    %c0_i32 = arith.constant 0 : i32
    %c0_i32_0 = arith.constant 0 : i32
    %c0_i32_1 = arith.constant 0 : i32
    %c0_i32_2 = arith.constant 0 : i32
    return %arg0, %c0_i32, %c0_i32_0, %c0_i32_1 : i32, i32, i32, i32
  }
  func.func @transform_3(%arg0: i32) -> (i32, i32, i32, i32) {
    %c0_i32 = arith.constant 0 : i32
    %c0_i32_0 = arith.constant 0 : i32
    %c0_i32_1 = arith.constant 0 : i32
    %c0_i32_2 = arith.constant 0 : i32
    return %arg0, %c0_i32, %c0_i32_0, %c0_i32_1 : i32, i32, i32, i32
  }
  func.func @transform_4(%arg0: i32) -> (i32, i32, i32, i32) {
    %c0_i32 = arith.constant 0 : i32
    %c0_i32_0 = arith.constant 0 : i32
    %c0_i32_1 = arith.constant 0 : i32
    %c0_i32_2 = arith.constant 0 : i32
    %c0_i32_3 = arith.constant 0 : i32
    return %c0_i32, %c0_i32_0, %c0_i32_1, %c0_i32_2 : i32, i32, i32, i32
  }
  func.func @transform_5(%arg0: i32) -> (i32, i32) {
    %c0_i32 = arith.constant 0 : i32
    %c0_i32_0 = arith.constant 0 : i32
    %c0_i32_1 = arith.constant 0 : i32
    return %c0_i32, %c0_i32_0 : i32, i32
  }
  func.func @transform_6(%arg0: i32) -> (i32, i32, i32, i32) {
    %c0_i32 = arith.constant 0 : i32
    %c0_i32_0 = arith.constant 0 : i32
    %c0_i32_1 = arith.constant 0 : i32
    %c0_i32_2 = arith.constant 0 : i32
    %c0_i32_3 = arith.constant 0 : i32
    return %c0_i32, %c0_i32_0, %c0_i32_1, %c0_i32_2 : i32, i32, i32, i32
  }
  func.func @transform_7(%arg0: i32) -> (i32, i32) {
    %c0_i32 = arith.constant 0 : i32
    %c0_i32_0 = arith.constant 0 : i32
    %c0_i32_1 = arith.constant 0 : i32
    return %c0_i32, %c0_i32_0 : i32, i32
  }
  func.func @transform_8(%arg0: i32) -> (i32, i32) {
    %c0_i32 = arith.constant 0 : i32
    %c0_i32_0 = arith.constant 0 : i32
    %c0_i32_1 = arith.constant 0 : i32
    return %c0_i32, %c0_i32_0 : i32, i32
  }
  func.func @transform_9(%arg0: i32) -> (i32, i32) {
    %c0_i32 = arith.constant 0 : i32
    %c0_i32_0 = arith.constant 0 : i32
    %c0_i32_1 = arith.constant 0 : i32
    return %c0_i32, %c0_i32_0 : i32, i32
  }
  func.func @transform_10(%arg0: i32) -> (i32, i32, i32, i32) {
    %c0_i32 = arith.constant 0 : i32
    %c0_i32_0 = arith.constant 0 : i32
    %c0_i32_1 = arith.constant 0 : i32
    %c0_i32_2 = arith.constant 0 : i32
    return %arg0, %c0_i32, %c0_i32_0, %c0_i32_1 : i32, i32, i32, i32
  }
}

</mosaic_0001>

<bundles_post_ra>
// kernel: tpu_custom_call.1
= control target key start
LH: loop header
LB: loop body
LE: loop exit
PB: predicated region body
PF: predicated region fallthrough
CT: control target
= control target key end

     0   :  { %s6178_s0 = inlined_call_operand.hbm [shape: f32[2,8,8,128], index: 0, kind: input, shape index: {}]   ;;  %s6179_s1 = inlined_call_operand.hbm [shape: f32[2,8,8,128], index: 1, kind: input, shape index: {}]   ;;  %s6180_s2 = inlined_call_operand.hbm [shape: f32[2,8,8,128], index: 2, kind: input, shape index: {}]   ;;  %s6181_s3 = inlined_call_operand.hbm [shape: f32[2,8,8,128], index: 3, kind: input, shape index: {}]   ;;  %s6182_s4 = inlined_call_operand.hbm [shape: f32[3,3,128,128], index: 4, kind: input, shape index: {}]   ;;  %s6183_s5 = inlined_call_operand.vmem [shape: f32[1,128], index: 5, kind: input, shape index: {}]   ;;  %s6184_s6 = inlined_call_operand.hbm [shape: f32[3,3,128,128], index: 6, kind: input, shape index: {}]   ;;  %s6185_s7 = inlined_call_operand.vmem [shape: f32[1,128], index: 7, kind: input, shape index: {}]   ;;  %s6186_s8 = inlined_call_operand.hbm [shape: f32[128,128], index: 8, kind: input, shape index: {}]   ;;  %s6187_s9 = inlined_call_operand.vmem [shape: f32[1,128], index: 9, kind: input, shape index: {}]   ;;  %s6188_s10 = inlined_call_operand.hbm [shape: f32[2,8,8,128], index: 10, kind: output, shape index: {}]  }
   0x1   :  { %6209 = sst [smem:[#allocation35_spill]] %s6178_s0 }
   0x2   :  { %6210 = sst [smem:[#allocation36_spill]] %s6179_s1 }
   0x3   :  { %6211 = sst [smem:[#allocation37_spill]] %s6182_s4 }
   0x4   :  { %6212 = sst [smem:[#allocation38_spill]] %s6184_s6 }
   0x5   :  { %6213 = sst [smem:[#allocation39_spill]] %s6186_s8 }
   0x6   :  { %6214 = sst [smem:[#allocation40_spill]] %s6188_s10 }
   0x7   :  { %15 = vsyncpa [#allocation5], 0 }
   0x8   :  { %17 = vsyncpa [#allocation5 + $0x1], 0 }
   0x9   :  { %18 = vsyncpa [#allocation8], 0 }
   0xa   :  { %20 = vsyncpa [#allocation8 + $0x1], 0 }
   0xb   :  { %21 = vsyncpa [#allocation11], 0 }
   0xc   :  { %23 = vsyncpa [#allocation11 + $0x1], 0 }
   0xd   :  { %24 = vsyncpa [#allocation14], 0 }
   0xe   :  { %25 = vsyncpa [#allocation6], 0 }
   0xf   :  { %27 = vsyncpa [#allocation6 + $0x1], 0  ;;  %s5294_s13 = smov 0   ;;  %s5296_s14 = smov 0  }
  0x10   :  { %s5298_s15 = smov 0   ;;  %s5300_s16 = smov 0  }
  0x11 LB: > { %6215 = sst [smem:[#allocation23_spill]] %s5212_s13  ;;  %s5315_s17 = sadd.s32 4294967295, %s5224_s16   ;;  %s5224_s16 = sphi %s5300_s16, %s6270_s16   ;;  %s5220_s15 = sphi %s5298_s15, %s6274_s15   ;;  %s5216_s14 = sphi %s5296_s14, %s6273_s14   ;;  %s5212_s13 = sphi %s5294_s13, %s6272_s13  }
  0x12   : > { %s3483_s18 = sadd.s32 4294967294, %s5224_s16   ;;  %s5319_s19 = sadd.s32 1, %s5224_s16  }
  0x13   : > { %6216 = sst [smem:[#allocation24_spill]] %s5319_s19  ;;  %s40_s20 = sadd.s32 1, %s5220_s15 }
  0x14   : > { %s37_s21 = ssub.s32 %s5224_s16, %s5319_s19  ;;  %p47_p0 = scmp.ne.s32.totalorder %s5220_s15, %s5216_s14 }
  0x15   : > { %p38_p1 = scmp.eq.s32.totalorder %s37_s21, 0  ;;  %p48_p2 = scmp.eq.s32.totalorder %s5224_s16, 0 }
  0x16   : > { %p53_p3 = scmp.ne.s32.totalorder %s5216_s14, %s5212_s13  ;;  %p6190_p4 = scmp.eq.s32.totalorder %s5315_s17, 0 }
  0x17   : > { %s5331_s22 = scalar_select %p38_p1, %s5220_s15, %s40_s20  }
  0x18   : > { %p5333_p5 = por %p48_p2, %p47_p0  ;;  %p5339_p6 = por %p6190_p4, %p53_p3 }
  0x19   : > { %6217 = sst [smem:[#allocation25_spill]] %s5331_s22  ;;  %p281_p7 = scmp.eq.s32.totalorder %s5315_s17, 1 }
  0x1a   : > { %s6219_s24 = scalar_select %p5339_p6, 1, 0 }
  0x1b   : > { %p287_p8 = scmp.eq.s32.totalorder %s3483_s18, 1  ;;  %p3484_p9 = scmp.ge.s32.totalorder %s5224_s16, 1 }
  0x1c   : > { %p294_p10 = scmp.lt.s32.totalorder %s5224_s16, 3  ;;  %p5346_p11 = por %p281_p7, %p47_p0 }
  0x1d   : > { %p5350_p12 = por %p287_p8, %p53_p3  ;;  %s5226_s28 = smov [#allocation12]  }
  0x1e   : > { %s6220_s25 = scalar_select %p5346_p11, 1, 0 }
  0x1f   : > { %s6221_s26 = scalar_select %p5350_p12, 1, 0 }
  0x20   : > { %p5354_p13 = pnand %p3484_p9, %p294_p10  ;;  %s306_s29 = sshll.u32 %s5226_s28, 4  ;;  %s307_s29 = int_to_ptr.vmem [resolvable:$true] %s306_s29 }
  0x21   : > { %6222 = sst [smem:[#allocation26_spill]] %s6221_s26  ;;  %p4899_p3 = scmp.lt.s32.totalorder %s5224_s16, 2 }
  0x22   : > { %s6223_s27 = scalar_select %p5354_p13, 1, 0 }
  0x23   : > { %p4869_p1 = pneg %p5354_p13  ;;  %s5227_s11 = smov [#allocation13]  }
  0x24   : > { %s322_s12 = sshll.u32 %s5227_s11, 4  ;;  %s4965_s18 = scalar_lea.vmem %s307_s29, 18432  ;;  %s323_s12 = int_to_ptr.vmem [resolvable:$true] %s322_s12 }
  0x25   : > { %p5362_p2 = pnand %p4869_p1, %p6190_p4  ;;  %p4966_p8 = scmp.ne.s32.totalorder %s307_s29, %s4965_s18 }
  0x26   : > { %p4973_p12 = scmp.lt.s32.totalorder %s307_s29, %s307_s29  ;;  %p4974_p11 = scmp.lt.s32.totalorder %s4965_s18, %s4965_s18 }
  0x27   : > { %s6224_s30 = scalar_select %p5362_p2, 1, 0 }
  0x28   : > { %p6202_p7 = pneg %p5362_p2  ;;  %p4975_p1 = por %p4974_p11, %p4973_p12 }
  0x2a   : > { %p4968_p9 = pnand %p4966_p8, %p6202_p7 }
  0x2c   : > { %p4969_p10 = pneg %p4968_p9 }
  0x2e   : > { %p4976_p4 = pnand %p4975_p1, %p4969_p10 }
  0x30   : > { %4979 = shalt.err (!%p4976_p4)
}
  0x31   : > { %s6195_s20 = smov 128   ;;  %s6197_s21 = smov 8  }
  0x32   : > { %s6225_s4 = sld [smem:[#allocation37_spill]]  ;;  %s6194_s22 = sand.u32 1, %s5220_s15  }
  0x33   : > { %s4991_s19 = scalar_lea.vmem %s323_s12, 18432  ;;  %p4999_p12 = scmp.lt.s32.totalorder %s323_s12, %s323_s12 }
  0x34   : > { %p4992_p8 = scmp.ne.s32.totalorder %s323_s12, %s4991_s19  ;;  %p5000_p9 = scmp.lt.s32.totalorder %s4991_s19, %s4991_s19 }
  0x36   : > { %p4994_p4 = pnand %p4992_p8, %p6202_p7  ;;  %p5001_p10 = por %p5000_p9, %p4999_p12 }
  0x38   : > { %4872 = dma.hbm_to_vmem [thread:$0]  (!%p5362_p2), %s6225_s4, 18432, %s307_s29, [#allocation11], %s6195_s20, %s6195_s20, %s6197_s21  }
  0x39   : > { %p4995_p11 = pneg %p4994_p4 }
  0x3b   : > { %p5002_p1 = pnand %p5001_p10, %p4995_p11 }
  0x3d   : > { %5005 = shalt.err (!%p5002_p1)
}
  0x3e   : > { %s6226_s6 = sld [smem:[#allocation38_spill]]  ;;  %s5395_s19 = sshll.u32 %s6194_s22, 6 }
  0x3f   : > { %s5398_s28 = sshll.u32 %s5224_s16, 10  ;;  %p5404_p8 = pnand %p4899_p3, %p5333_p5 }
  0x40   : > { %s6200_s18 = sand.u32 1, %s5224_s16   ;;  %s6228_s1 = sld [smem:[#allocation36_spill]] }
  0x41   : > { %s5420_s23 = scalar_lea.sflag [#allocation8], %s6200_s18  ;;  %p5426_p3 = pneg %p5404_p8 }
  0x44   : > { %4875 = dma.hbm_to_vmem [thread:$0]  (!%p5362_p2), %s6226_s6, 18432, %s323_s12, [#allocation14], %s6195_s20, %s6195_s20, %s6197_s21  }
  0x45   : > { %s380_s12 = scalar_lea.vmem [#allocation7], %s5395_s19 }
  0x46   : > { %s5413_s26 = scalar_lea.hbm %s6228_s1, %s5398_s28  ;;  %s387_s22 = sshll.u32 %s380_s12, 4  ;;  %s5416_s22 = int_to_ptr.vmem [resolvable:$true] %s387_s22 }
  0x47   : > { %s5006_s20 = scalar_lea.hbm %s5413_s26, 1024  ;;  %s5011_s12 = scalar_lea.hbm %s6228_s1, 2048 }
  0x48   : > { %p5007_p5 = scmp.ne.s32.totalorder %s5413_s26, %s5006_s20  ;;  %p5012_p12 = scmp.lt.s32.totalorder %s5413_s26, %s6228_s1 }
  0x49   : > { %p5013_p9 = scmp.lt.s32.totalorder %s5011_s12, %s5006_s20 }
  0x4a   : > { %p5009_p4 = pnand %p5426_p3, %p5007_p5 }
  0x4b   : > { %p5014_p10 = por %p5013_p9, %p5012_p12 }
  0x4c   : > { %p5010_p11 = pneg %p5009_p4 }
  0x4e   : > { %p5015_p1 = pnand %p5014_p10, %p5010_p11 }
  0x50   : > { %5018 = shalt.err (!%p5015_p1)
}
  0x51   : > { %s5019_s18 = scalar_lea.vmem %s5416_s22, 1024  ;;  %s5230_s10 = smov [#allocation7]  }
  0x52   : > { %p5020_p0 = scmp.ne.s32.totalorder %s5416_s22, %s5019_s18  ;;  %s5024_s4 = sshll.u32 %s5230_s10, 4  ;;  %s5025_s4 = int_to_ptr.vmem [resolvable:$false] %s5024_s4 }
  0x53   : > { %s5026_s29 = scalar_lea.vmem %s5025_s4, 2048  ;;  %p5027_p7 = scmp.lt.s32.totalorder %s5416_s22, %s5025_s4 }
  0x54   : > { %p5022_p5 = pnand %p5020_p0, %p5426_p3  ;;  %p5028_p6 = scmp.lt.s32.totalorder %s5026_s29, %s5019_s18 }
  0x56   : > { %p5023_p4 = pneg %p5022_p5  ;;  %p5029_p13 = por %p5028_p6, %p5027_p7 }
  0x58   : > { %p5030_p2 = pnand %p5029_p13, %p5023_p4 }
  0x5a   : > { %5033 = shalt.err (!%p5030_p2)
}
  0x5b   : > { %s6230_s6 = smov 8   ;;  %s6231_s13 = smov 128  }
  0x5c   : > { %4885 = dma.hbm_to_vmem [thread:$0]  (!%p5404_p8), %s5413_s26, 1024, %s5416_s22, %s5420_s23, %s6231_s13, %s6231_s13, %s6230_s6  }
  0x5d   : > { %s5231_s20 = smov [#allocation15]   ;;  %p6232_p11 = scmp.ne.s32.totalorder %s6224_s30, 0 }
  0x5e   : > { %s338_s12 = sshll.u32 %s5231_s20, 4  ;;  %s339_s12 = int_to_ptr.vmem [resolvable:$true] %s338_s12 }
  0x5f   : > { %s5045_s10 = scalar_lea.vmem %s339_s12, 2048  ;;  %p6233_p12 = pneg %p6232_p11 }
  0x60   : > { %p5046_p0 = scmp.ne.s32.totalorder %s339_s12, %s5045_s10  ;;  %p5053_p2 = scmp.lt.s32.totalorder %s339_s12, %s339_s12 }
  0x61   : > { %p5054_p7 = scmp.lt.s32.totalorder %s5045_s10, %s5045_s10 }
  0x62   : > { %p5048_p6 = pnand %p5046_p0, %p6233_p12 }
  0x63   : > { %p5055_p9 = por %p5054_p7, %p5053_p2 }
  0x64   : > { %p5049_p13 = pneg %p5048_p6 }
  0x66   : > { %p5056_p10 = pnand %p5055_p9, %p5049_p13 }
  0x68   : > { %5059 = shalt.err (!%p5056_p10)
}
  0x69   : > { %s6234_s8 = sld [smem:[#allocation39_spill]]  ;;  %s359_s30 = scalar_lea.vmem [#allocation4], %s5395_s19 }
  0x6a   : > { %s6235_s0 = sld [smem:[#allocation35_spill]]  ;;  %s366_s20 = sshll.u32 %s359_s30, 4  ;;  %s5470_s20 = int_to_ptr.vmem [resolvable:$true] %s366_s20 }
  0x6b   : > { %s6236_s10 = sand.u32 1, %s5220_s15  }
  0x6c   : > { %s356_s1 = scalar_lea.sflag [#allocation5], %s6236_s10 }
  0x6f   : > { %4878 = dma.hbm_to_vmem [thread:$0]  (!%p6232_p11), %s6234_s8, 2048, %s339_s12, [#allocation14], %s6231_s13, %s6231_s13, %s6230_s6  }
  0x70   : > { %s5467_s29 = scalar_lea.hbm %s6235_s0, %s5398_s28  ;;  %s5065_s18 = scalar_lea.hbm %s6235_s0, 2048 }
  0x71   : > { %s5060_s22 = scalar_lea.hbm %s5467_s29, 1024  ;;  %p5066_p0 = scmp.lt.s32.totalorder %s5467_s29, %s6235_s0 }
  0x72   : > { %p5061_p1 = scmp.ne.s32.totalorder %s5467_s29, %s5060_s22  ;;  %p5067_p11 = scmp.lt.s32.totalorder %s5065_s18, %s5060_s22 }
  0x74   : > { %p5063_p5 = pnand %p5061_p1, %p5426_p3  ;;  %p5068_p12 = por %p5067_p11, %p5066_p0 }
  0x76   : > { %p5064_p4 = pneg %p5063_p5 }
  0x78   : > { %p5069_p6 = pnand %p5068_p12, %p5064_p4 }
  0x7a   : > { %5072 = shalt.err (!%p5069_p6)
}
  0x7b   : > { %s5073_s30 = scalar_lea.vmem %s5470_s20, 1024  ;;  %s5232_s10 = smov [#allocation4]  }
  0x7c   : > { %p5074_p13 = scmp.ne.s32.totalorder %s5470_s20, %s5073_s30  ;;  %s5078_s12 = sshll.u32 %s5232_s10, 4  ;;  %s5079_s12 = int_to_ptr.vmem [resolvable:$false] %s5078_s12 }
  0x7d   : > { %s5080_s26 = scalar_lea.vmem %s5079_s12, 2048  ;;  %p5081_p9 = scmp.lt.s32.totalorder %s5470_s20, %s5079_s12 }
  0x7e   : > { %p5076_p2 = pnand %p5074_p13, %p5426_p3  ;;  %p5082_p10 = scmp.lt.s32.totalorder %s5080_s26, %s5073_s30 }
  0x80   : > { %p5077_p7 = pneg %p5076_p2  ;;  %p5083_p1 = por %p5082_p10, %p5081_p9 }
  0x82   : > { %p5084_p5 = pnand %p5083_p1, %p5077_p7 }
  0x84   : > { %5087 = shalt.err (!%p5084_p5)
}
  0x85   : > { %4882 = dma.hbm_to_vmem [thread:$0]  (!%p5404_p8), %s5467_s29, 1024, %s5470_s20, %s356_s1, %s6231_s13, %s6231_s13, %s6230_s6  }
  0x86   : > { %s5501_s18 = scalar_lea.hbm %s6180_s2, %s5398_s28  ;;  %s401_s4 = scalar_lea.vmem [#allocation9], %s5395_s19 }
  0x87   : > { %s408_s30 = sshll.u32 %s401_s4, 4  ;;  %s5088_s10 = scalar_lea.hbm %s5501_s18, 1024  ;;  %s409_s30 = int_to_ptr.vmem [resolvable:$true] %s408_s30 }
  0x88   : > { %p5089_p4 = scmp.ne.s32.totalorder %s5501_s18, %s5088_s10  ;;  %s5093_s1 = scalar_lea.hbm %s6180_s2, 2048 }
  0x89   : > { %p5094_p12 = scmp.lt.s32.totalorder %s5501_s18, %s6180_s2  ;;  %p5095_p6 = scmp.lt.s32.totalorder %s5093_s1, %s5088_s10 }
  0x8a   : > { %p5091_p0 = pnand %p5089_p4, %p5426_p3 }
  0x8b   : > { %p5096_p13 = por %p5095_p6, %p5094_p12 }
  0x8c   : > { %p5092_p11 = pneg %p5091_p0 }
  0x8e   : > { %p5097_p2 = pnand %p5096_p13, %p5092_p11 }
  0x90   : > { %5100 = shalt.err (!%p5097_p2)
}
  0x91   : > { %s5101_s8 = scalar_lea.vmem %s409_s30, 1024  ;;  %s5233_s22 = smov [#allocation9]  }
  0x92   : > { %p5102_p7 = scmp.ne.s32.totalorder %s409_s30, %s5101_s8  ;;  %s5106_s4 = sshll.u32 %s5233_s22, 4  ;;  %s5107_s4 = int_to_ptr.vmem [resolvable:$false] %s5106_s4 }
  0x93   : > { %s5108_s0 = scalar_lea.vmem %s5107_s4, 2048  ;;  %p5109_p1 = scmp.lt.s32.totalorder %s409_s30, %s5107_s4 }
  0x94   : > { %p5104_p9 = pnand %p5102_p7, %p5426_p3  ;;  %p5110_p5 = scmp.lt.s32.totalorder %s5108_s0, %s5101_s8 }
  0x96   : > { %p5105_p10 = pneg %p5104_p9  ;;  %p5111_p4 = por %p5110_p5, %p5109_p1 }
  0x98   : > { %p5112_p0 = pnand %p5111_p4, %p5105_p10 }
  0x9a   : > { %5115 = shalt.err (!%p5112_p0)
}
  0x9b   : > { %4888 = dma.hbm_to_vmem [thread:$0]  (!%p5404_p8), %s5501_s18, 1024, %s409_s30, %s5420_s23, %s6231_s13, %s6231_s13, %s6230_s6  }
  0x9c   : > { %s5528_s26 = scalar_lea.hbm %s6181_s3, %s5398_s28  ;;  %s422_s0 = scalar_lea.vmem [#allocation10], %s5395_s19 }
  0x9d   : > { %s429_s1 = sshll.u32 %s422_s0, 4  ;;  %s6237_s29 = sand.u32 1, %s5224_s16   ;;  %s5531_s1 = int_to_ptr.vmem [resolvable:$true] %s429_s1 }
  0x9e   : > { %s419_s20 = scalar_lea.sflag [#allocation11], %s6237_s29  ;;  %s5116_s8 = scalar_lea.hbm %s5528_s26, 1024 }
  0x9f   : > { %p5117_p11 = scmp.ne.s32.totalorder %s5528_s26, %s5116_s8  ;;  %s5121_s30 = scalar_lea.hbm %s6181_s3, 2048 }
  0xa0   : > { %p5122_p13 = scmp.lt.s32.totalorder %s5528_s26, %s6181_s3  ;;  %p5123_p2 = scmp.lt.s32.totalorder %s5121_s30, %s5116_s8 }
  0xa1   : > { %p5119_p12 = pnand %p5117_p11, %p5426_p3 }
  0xa2   : > { %p5124_p7 = por %p5123_p2, %p5122_p13 }
  0xa3   : > { %p5120_p6 = pneg %p5119_p12 }
  0xa5   : > { %p5125_p9 = pnand %p5124_p7, %p5120_p6 }
  0xa7   : > { %5128 = shalt.err (!%p5125_p9)
}
  0xa8   : > { %s5129_s19 = scalar_lea.vmem %s5531_s1, 1024  ;;  %s5234_s4 = smov [#allocation10]  }
  0xa9   : > { %p5130_p10 = scmp.ne.s32.totalorder %s5531_s1, %s5129_s19  ;;  %s5134_s10 = sshll.u32 %s5234_s4, 4  ;;  %s5135_s10 = int_to_ptr.vmem [resolvable:$false] %s5134_s10 }
  0xaa   : > { %s5136_s12 = scalar_lea.vmem %s5135_s10, 2048  ;;  %p5137_p4 = scmp.lt.s32.totalorder %s5531_s1, %s5135_s10 }
  0xab   : > { %p5132_p1 = pnand %p5130_p10, %p5426_p3  ;;  %p5138_p0 = scmp.lt.s32.totalorder %s5136_s12, %s5129_s19 }
  0xad   : > { %p5133_p5 = pneg %p5132_p1  ;;  %p5139_p11 = por %p5138_p0, %p5137_p4 }
  0xaf   : > { %p5140_p12 = pnand %p5139_p11, %p5133_p5 }
  0xb1   : > { %5143 = shalt.err (!%p5140_p12)
}
  0xb2   : > { %4891 = dma.hbm_to_vmem [thread:$0]  (!%p5404_p8), %s5528_s26, 1024, %s5531_s1, %s419_s20, %s6231_s13, %s6231_s13, %s6230_s6  }
  0xb3   : > { %p6238_p3 = scmp.ne.s32.totalorder %s6223_s27, 0 }
  0xb5   : > { %441 = sbr.rel (%p6238_p3) target bundleno = 1002 (0x3ea), region = 60 }
  0xba   : > { %s5561_s21 = sand.u32 1, %s5216_s14   ;;  %p6239_p6 = scmp.ne.s32.totalorder %s6219_s24, 0 }
  0xbb   : > { %s5564_s0 = sshll.u32 %s5561_s21, 6  ;;  %s444_s29 = scalar_lea.sflag [#allocation5], %s5561_s21 }
  0xbc   : > { %s5568_s11 = scalar_lea.vmem [#allocation4], %s5564_s0 }
  0xbd   : > { %5187 = dma.done.wait (%p6239_p6), %s444_s29, 1024  }
  0xbe   : > { %5189 = vsyncadd (%p6239_p6), %s444_s29, 4294966272  ;;  %s452_s27 = sand.u32 1, %s5315_s17   ;;  %s5576_s13 = scalar_lea.vmem [#allocation7], %s5564_s0 }
  0xbf   : > { %s453_s6 = scalar_lea.sflag [#allocation8], %s452_s27 }
  0xc0   : > { %5191 = dma.done.wait (%p6239_p6), %s453_s6, 2048  }
  0xc1   : > { %5193 = vsyncadd (%p6239_p6), %s453_s6, 4294965248  ;;  %s5583_s26 = scalar_lea.vmem [#allocation9], %s5564_s0  ;;  %s471_s1 = scalar_lea.sflag [#allocation11], %s452_s27 }
  0xc2   : > { %s5586_s20 = scalar_lea.vmem [#allocation10], %s5564_s0 }
  0xc3   : > { %5195 = dma.done.wait (%p6239_p6), %s471_s1, 1024  }
  0xc4   : > { %5197 = vsyncadd (%p6239_p6), %s471_s1, 4294966272  ;;  %p6240_p8 = scmp.eq.s32.totalorder %s5315_s17, 0 }
  0xc6   : > { %5199 = dma.done.wait (%p6240_p8), [#allocation11], 18432   ;;  %p6241_p13 = pmov %p6240_p8 }
  0xc7   : > { %p6242_p2 = pmov %p6240_p8 }
  0xc8   : > { %5201 = vsyncadd (%p6241_p13), [#allocation11], 4294948864 }
  0xc9   : > { %5203 = dma.done.wait (%p6242_p2), [#allocation14], 20480   ;;  %p6243_p7 = pmov %p6242_p2 }
  0xca   : > { %v5235_v0 = vmov 0.0   ;;  %v671_v1 = vld [vmem:[#allocation12 + $0xf8] sm:$0xff]  ;;  %v670_v3 = vld [vmem:[#allocation12 + $0xf0] sm:$0xff]  ;;  %v669_v5 = vld [vmem:[#allocation12 + $0xe8] sm:$0xff]  ;;  %s6081_s22 = scalar_lea.vmem [#allocation16], %s5564_s0  ;;  %s3522_s4 = sshll.u32 %s5315_s17, 10 }
  0xcb   : > { %5205 = vsyncadd (%p6243_p7), [#allocation14], 4294946816  ;;  %594 = vst [vmem:[#allocation2] sm:$0xff] %v5235_v0  ;;  %4055 = vmatprep.mubr.f32.mxu1 %v5235_v0  ;;  %v646_v2 = vld [vmem:[#allocation12 + $0x78] sm:$0xff]  ;;  %3979 = vmatprep.subr.mxu0 %v671_v1  ;;  %v645_v4 = vld [vmem:[#allocation12 + $0x70] sm:$0xff]  ;;  %s3316_s19 = sshll.u32 %s6081_s22, 4  ;;  %s6127_s19 = int_to_ptr.vmem [resolvable:$true] %s3316_s19 }
  0xcc   : > { %595 = vst [vmem:[#allocation2 + $0x8] sm:$0x3] %v5235_v0  ;;  %596 = vst [vmem:[#allocation2 + $0x10] sm:$0xff] %v5235_v0  ;;  %4023 = vmatprep.subr.mxu1 %v646_v2  ;;  %3980 = vmatpush3.msra.mxu0 %v671_v1  ;;  %v644_v6 = vld [vmem:[#allocation12 + $0x68] sm:$0xff]  ;;  %v668_v7 = vld [vmem:[#allocation12 + $0xe0] sm:$0xff]  ;;  %s6264_s0 = sld [smem:[#allocation40_spill]] }
  0xcd   : > { %597 = vst [vmem:[#allocation2 + $0x18] sm:$0x3] %v5235_v0  ;;  %598 = vst [vmem:[#allocation2 + $0x20] sm:$0xff] %v5235_v0  ;;  %4024 = vmatpush3.msra.mxu1 %v646_v2  ;;  %3981 = vmatprep.subr.mxu0 %v670_v3  ;;  %v643_v8 = vld [vmem:[#allocation12 + $0x60] sm:$0xff]  ;;  %v667_v9 = vld [vmem:[#allocation12 + $0xd8] sm:$0xff]  ;;  %s5144_s27 = scalar_lea.vmem %s6127_s19, 1024 }
  0xce   : > { %599 = vst [vmem:[#allocation2 + $0x28] sm:$0x3] %v5235_v0  ;;  %600 = vst [vmem:[#allocation2 + $0x30] sm:$0xff] %v5235_v0  ;;  %4025 = vmatprep.subr.mxu1 %v645_v4  ;;  %3982 = vmatpush3.msra.mxu0 %v670_v3  ;;  %v642_v10 = vld [vmem:[#allocation12 + $0x58] sm:$0xff]  ;;  %v666_v11 = vld [vmem:[#allocation12 + $0xd0] sm:$0xff]  ;;  %p5145_p9 = scmp.ne.s32.totalorder %s6127_s19, %s5144_s27  ;;  %p6265_p10 = scmp.ne.s32.totalorder %s6220_s25, 0 }
  0xcf   : > { %601 = vst [vmem:[#allocation2 + $0x38] sm:$0x3] %v5235_v0  ;;  %602 = vst [vmem:[#allocation2 + $0x40] sm:$0xff] %v5235_v0  ;;  %4026 = vmatpush3.msra.mxu1 %v645_v4  ;;  %3983 = vmatprep.subr.mxu0 %v669_v5  ;;  %v641_v12 = vld [vmem:[#allocation12 + $0x50] sm:$0xff]  ;;  %v665_v13 = vld [vmem:[#allocation12 + $0xc8] sm:$0xff]  ;;  %s5236_s17 = smov [#allocation16]  }
  0xd0   : > { %603 = vst [vmem:[#allocation2 + $0x48] sm:$0x3] %v5235_v0  ;;  %604 = vst [vmem:[#allocation2 + $0x50] sm:$0xff] %v5235_v0  ;;  %4027 = vmatprep.subr.mxu1 %v644_v6  ;;  %3984 = vmatpush3.msra.mxu0 %v669_v5  ;;  %v640_v14 = vld [vmem:[#allocation12 + $0x48] sm:$0xff]  ;;  %v538_v15 = vld [vmem:[%s5568_s11] sm:$0xff]  ;;  %p5146_p1 = pnand %p5145_p9, %p6265_p10  ;;  %s5148_s6 = sshll.u32 %s5236_s17, 4  ;;  %s5149_s6 = int_to_ptr.vmem [resolvable:$false] %s5148_s6 }
  0xd1   : > { %605 = vst [vmem:[#allocation2 + $0x58] sm:$0x3] %v5235_v0  ;;  %606 = vst [vmem:[#allocation2 + $0x60] sm:$0xff] %v5235_v0  ;;  %4028 = vmatpush3.msra.mxu1 %v644_v6  ;;  %3985 = vmatprep.subr.mxu0 %v668_v7  ;;  %v546_v16 = vld [vmem:[%s5576_s13] sm:$0xff]  ;;  %v663_v23 = vld [vmem:[#allocation12 + $0xb8] sm:$0xff]  ;;  %p5151_p4 = scmp.lt.s32.totalorder %s6127_s19, %s5149_s6 }
  0xd2   : > { %607 = vst [vmem:[#allocation2 + $0x68] sm:$0x3] %v5235_v0  ;;  %608 = vst [vmem:[#allocation2 + $0x70] sm:$0xff] %v5235_v0  ;;  %4029 = vmatprep.subr.mxu1 %v643_v8  ;;  %3986 = vmatpush3.msra.mxu0 %v668_v7  ;;  %v562_v17 = vld [vmem:[%s5583_s26] sm:$0xff]  ;;  %v554_v20 = vmax.f32 %v538_v15, %v546_v16  ;;  %v638_v24 = vld [vmem:[#allocation12 + $0x38] sm:$0xff]  ;;  %s6133_s29 = scalar_lea.hbm %s6264_s0, %s3522_s4  ;;  %p5147_p5 = pneg %p5146_p1 }
  0xd3   : > { %609 = vst [vmem:[#allocation2 + $0x78] sm:$0x3] %v5235_v0  ;;  %610 = vst [vmem:[#allocation2 + $0x80] sm:$0xff] %v5235_v0  ;;  %4030 = vmatpush3.msra.mxu1 %v643_v8  ;;  %3987 = vmatprep.subr.mxu0 %v667_v9  ;;  %v664_v18 = vld [vmem:[#allocation12 + $0xc0] sm:$0xff]  ;;  %v662_v26 = vld [vmem:[#allocation12 + $0xb0] sm:$0xff] }
  0xd4   : > { %611 = vst [vmem:[#allocation2 + $0x88] sm:$0x3] %v5235_v0  ;;  %612 = vst [vmem:[#allocation2 + $0x90] sm:$0xff] %v5235_v0  ;;  %4031 = vmatprep.subr.mxu1 %v642_v10  ;;  %3988 = vmatpush3.msra.mxu0 %v667_v9  ;;  %v639_v19 = vld [vmem:[#allocation12 + $0x40] sm:$0xff]  ;;  %v637_v27 = vld [vmem:[#allocation12 + $0x30] sm:$0xff] }
  0xd5   : > { %613 = vst [vmem:[#allocation2 + $0x98] sm:$0x3] %v5235_v0  ;;  %1872 = vst [vmem:[#allocation3] sm:$0xff] %v5235_v0  ;;  %4032 = vmatpush3.msra.mxu1 %v642_v10  ;;  %3989 = vmatprep.subr.mxu0 %v666_v11  ;;  %v570_v21 = vld [vmem:[%s5586_s20] sm:$0xff]  ;;  %v661_v28 = vld [vmem:[#allocation12 + $0xa8] sm:$0xff] }
  0xd6   : > { %1873 = vst [vmem:[#allocation3 + $0x8] sm:$0x3] %v5235_v0  ;;  %1874 = vst [vmem:[#allocation3 + $0x10] sm:$0xff] %v5235_v0  ;;  %4033 = vmatprep.subr.mxu1 %v641_v12  ;;  %3990 = vmatpush3.msra.mxu0 %v666_v11  ;;  %v578_v22 = vmax.f32 %v562_v17, %v570_v21  ;;  %v636_v29 = vld [vmem:[#allocation12 + $0x28] sm:$0xff]  ;;  %v660_v33 = vld [vmem:[#allocation12 + $0xa0] sm:$0xff] }
  0xd7   : > { %1875 = vst [vmem:[#allocation3 + $0x18] sm:$0x3] %v5235_v0  ;;  %1876 = vst [vmem:[#allocation3 + $0x20] sm:$0xff] %v5235_v0  ;;  %4034 = vmatpush3.msra.mxu1 %v641_v12  ;;  %3991 = vmatprep.subr.mxu0 %v665_v13  ;;  %v539_v30 = vld [vmem:[%s5568_s11 + $0x8] sm:$0xff]  ;;  %v635_v34 = vld [vmem:[#allocation12 + $0x20] sm:$0xff] }
  0xd8   : > { %1877 = vst [vmem:[#allocation3 + $0x28] sm:$0x3] %v5235_v0  ;;  %1878 = vst [vmem:[#allocation3 + $0x30] sm:$0xff] %v5235_v0  ;;  %4035 = vmatprep.subr.mxu1 %v640_v14  ;;  %3992 = vmatpush3.msra.mxu0 %v665_v13  ;;  %v5604_v25 = vmax.f32 %v554_v20, %v578_v22  ;;  %v547_v31 = vld [vmem:[%s5576_s13 + $0x8] sm:$0xff]  ;;  %v540_v38 = vld [vmem:[%s5568_s11 + $0x10] sm:$0xff] }
  0xd9   : > { %1879 = vst [vmem:[#allocation3 + $0x38] sm:$0x3] %v5235_v0  ;;  %1880 = vst [vmem:[#allocation3 + $0x40] sm:$0xff] %v5235_v0  ;;  %4036 = vmatpush3.msra.mxu1 %v640_v14  ;;  %3993 = vmatprep.subr.mxu0 %v664_v18  ;;  %v563_v32 = vld [vmem:[%s5583_s26 + $0x8] sm:$0xff]  ;;  %v555_v35 = vmax.f32 %v539_v30, %v547_v31  ;;  %v548_v39 = vld [vmem:[%s5576_s13 + $0x10] sm:$0xff] }
  0xda   : > { %1881 = vst [vmem:[#allocation3 + $0x48] sm:$0x3] %v5235_v0  ;;  %1882 = vst [vmem:[#allocation3 + $0x50] sm:$0xff] %v5235_v0  ;;  %4037 = vmatprep.subr.mxu1 %v639_v19  ;;  %3994 = vmatpush3.msra.mxu0 %v664_v18  ;;  %v571_v36 = vld [vmem:[%s5586_s20 + $0x8] sm:$0xff]  ;;  %v564_v40 = vld [vmem:[%s5583_s26 + $0x10] sm:$0xff]  ;;  %v556_v43 = vmax.f32 %v540_v38, %v548_v39 }
  0xdb   : > { %1883 = vst [vmem:[#allocation3 + $0x58] sm:$0x3] %v5235_v0  ;;  %1884 = vst [vmem:[#allocation3 + $0x60] sm:$0xff] %v5235_v0  ;;  %4038 = vmatpush3.msra.mxu1 %v639_v19  ;;  %3995 = vmatprep.subr.mxu0 %v663_v23  ;;  %v579_v37 = vmax.f32 %v563_v32, %v571_v36  ;;  %v659_v41 = vld [vmem:[#allocation12 + $0x98] sm:$0xff]  ;;  %v572_v44 = vld [vmem:[%s5586_s20 + $0x10] sm:$0xff] }
  0xdc   : > { %1885 = vst [vmem:[#allocation3 + $0x68] sm:$0x3] %v5235_v0  ;;  %1886 = vst [vmem:[#allocation3 + $0x70] sm:$0xff] %v5235_v0  ;;  %4039 = vmatprep.subr.mxu1 %v638_v24  ;;  %3996 = vmatpush3.msra.mxu0 %v663_v23  ;;  %v634_v42 = vld [vmem:[#allocation12 + $0x18] sm:$0xff]  ;;  %v580_v46 = vmax.f32 %v564_v40, %v572_v44  ;;  %v658_v50 = vld [vmem:[#allocation12 + $0x90] sm:$0xff] }
  0xdd   : > { %1887 = vst [vmem:[#allocation3 + $0x78] sm:$0x3] %v5235_v0  ;;  %1888 = vst [vmem:[#allocation3 + $0x80] sm:$0xff] %v5235_v0  ;;  %4040 = vmatpush3.msra.mxu1 %v638_v24  ;;  %3997 = vmatprep.subr.mxu0 %v662_v26  ;;  %v5615_v45 = vmax.f32 %v555_v35, %v579_v37  ;;  %v541_v47 = vld [vmem:[%s5568_s11 + $0x18] sm:$0xff]  ;;  %v633_v53 = vld [vmem:[#allocation12 + $0x10] sm:$0xff] }
  0xde   : > { %1889 = vst [vmem:[#allocation3 + $0x88] sm:$0x3] %v5235_v0  ;;  %1890 = vst [vmem:[#allocation3 + $0x90] sm:$0xff] %v5235_v0  ;;  %4041 = vmatprep.subr.mxu1 %v637_v27  ;;  %3998 = vmatpush3.msra.mxu0 %v662_v26  ;;  %v549_v48 = vld [vmem:[%s5576_s13 + $0x18] sm:$0xff]  ;;  %v5622_v54 = vmax.f32 %v556_v43, %v580_v46  ;;  %v542_v56 = vld [vmem:[%s5568_s11 + $0x20] sm:$0xff] }
  0xdf   : > { %1891 = vst [vmem:[#allocation3 + $0x98] sm:$0x3] %v5235_v0  ;;  %615 = vst [vmem:[#allocation2 + $0x11] sm:$0xff] %v5604_v25  ;;  %4042 = vmatpush3.msra.mxu1 %v637_v27  ;;  %3999 = vmatprep.subr.mxu0 %v661_v28  ;;  %v565_v49 = vld [vmem:[%s5583_s26 + $0x18] sm:$0xff]  ;;  %v557_v51 = vmax.f32 %v541_v47, %v549_v48  ;;  %v550_v57 = vld [vmem:[%s5576_s13 + $0x20] sm:$0xff] }
  0xe0   : > { %4043 = vmatprep.subr.mxu1 %v636_v29  ;;  %4000 = vmatpush3.msra.mxu0 %v661_v28  ;;  %v573_v52 = vld [vmem:[%s5586_s20 + $0x18] sm:$0xff]  ;;  %616 = vst [vmem:[#allocation2 + $0x21] sm:$0xff] %v5615_v45  ;;  %v657_v58 = vld [vmem:[#allocation12 + $0x88] sm:$0xff]  ;;  %v558_v59 = vmax.f32 %v542_v56, %v550_v57  ;;  %v566_v60 = vld [vmem:[%s5583_s26 + $0x20] sm:$0xff] }
  0xe1   : > { %4044 = vmatpush3.msra.mxu1 %v636_v29  ;;  %4001 = vmatprep.subr.mxu0 %v660_v33  ;;  %v581_v55 = vmax.f32 %v565_v49, %v573_v52  ;;  %v574_v61 = vld [vmem:[%s5586_s20 + $0x20] sm:$0xff]  ;;  %v632_v62 = vld [vmem:[#allocation12 + $0x8] sm:$0xff]  ;;  %617 = vst [vmem:[#allocation2 + $0x31] sm:$0xff] %v5622_v54  ;;  %v544_v10 = vld [vmem:[%s5568_s11 + $0x30] sm:$0xff] }
  0xe2   : > { %4045 = vmatprep.subr.mxu1 %v635_v34  ;;  %4002 = vmatpush3.msra.mxu0 %v660_v33  ;;  %v582_v0 = vmax.f32 %v566_v60, %v574_v61  ;;  %v543_v1 = vld [vmem:[%s5568_s11 + $0x28] sm:$0xff]  ;;  %v656_v3 = vld [vmem:[#allocation12 + $0x80] sm:$0xff]  ;;  %v552_v11 = vld [vmem:[%s5576_s13 + $0x30] sm:$0xff] }
  0xe3   : > { %4046 = vmatpush3.msra.mxu1 %v635_v34  ;;  %4003 = vmatprep.subr.mxu0 %v659_v41  ;;  %v5629_v63 = vmax.f32 %v557_v51, %v581_v55  ;;  %v551_v2 = vld [vmem:[%s5576_s13 + $0x28] sm:$0xff]  ;;  %v631_v7 = vld [vmem:[#allocation12] sm:$0xff]  ;;  %v560_v13 = vmax.f32 %v544_v10, %v552_v11  ;;  %v568_v14 = vld [vmem:[%s5583_s26 + $0x30] sm:$0xff] }
  0xe4   : > { %4047 = vmatprep.subr.mxu1 %v634_v42  ;;  %4004 = vmatpush3.msra.mxu0 %v659_v41  ;;  %v559_v4 = vmax.f32 %v543_v1, %v551_v2  ;;  %v567_v5 = vld [vmem:[%s5583_s26 + $0x28] sm:$0xff]  ;;  %v5636_v8 = vmax.f32 %v558_v59, %v582_v0  ;;  %v576_v15 = vld [vmem:[%s5586_s20 + $0x30] sm:$0xff]  ;;  %v906_v19 = vld [vmem:[#allocation12 + $0x178] sm:$0xff] }
  0xe5   : > { %4048 = vmatpush3.msra.mxu1 %v634_v42  ;;  %4005 = vmatprep.subr.mxu0 %v658_v50  ;;  %v575_v6 = vld [vmem:[%s5586_s20 + $0x28] sm:$0xff]  ;;  %618 = vst [vmem:[#allocation2 + $0x41] sm:$0xff] %v5629_v63  ;;  %v584_v17 = vmax.f32 %v568_v14, %v576_v15  ;;  %v1044_v20 = vld [vmem:[#allocation12 + $0x1f8] sm:$0xff]  ;;  %v905_v22 = vld [vmem:[#allocation12 + $0x170] sm:$0xff] }
  0xe6   : > { %4049 = vmatprep.subr.mxu1 %v633_v53  ;;  %4006 = vmatpush3.msra.mxu0 %v658_v50  ;;  %v583_v9 = vmax.f32 %v567_v5, %v575_v6  ;;  %v647_v12 = vld [vmem:[#allocation2 + $0x1] sm:$0xff]  ;;  %619 = vst [vmem:[#allocation2 + $0x51] sm:$0xff] %v5636_v8  ;;  %v5645_v18 = vld [vmem:[#allocation2 + $0x10] sm:$0xff]  ;;  %v902_v29 = vld [vmem:[#allocation12 + $0x158] sm:$0xff] }
  0xe7   : > { %4050 = vmatpush3.msra.mxu1 %v633_v53  ;;  %4007 = vmatprep.subr.mxu0 %v657_v58  ;;  %v5648_v21 = vmax.f32 %v560_v13, %v584_v17  ;;  %v1043_v23 = vld [vmem:[#allocation12 + $0x1f0] sm:$0xff]  ;;  %v904_v24 = vld [vmem:[#allocation12 + $0x168] sm:$0xff]  ;;  %v903_v27 = vld [vmem:[#allocation12 + $0x160] sm:$0xff] }
  0xe8   : > { %4051 = vmatprep.subr.mxu1 %v632_v62  ;;  %4008 = vmatpush3.msra.mxu0 %v657_v58  ;;  %v5643_v16 = vmax.f32 %v559_v4, %v583_v9  ;;  %v1042_v26 = vld [vmem:[#allocation12 + $0x1e8] sm:$0xff]  ;;  %v1041_v28 = vld [vmem:[#allocation12 + $0x1e0] sm:$0xff]  ;;  %v1040_v30 = vld [vmem:[#allocation12 + $0x1d8] sm:$0xff] }
  0xe9   : > { %4052 = vmatpush3.msra.mxu1 %v632_v62  ;;  %4009 = vmatprep.subr.mxu0 %v656_v3  ;;  %621 = vst [vmem:[#allocation2 + $0x71] sm:$0xff] %v5648_v21  ;;  %v545_v31 = vld [vmem:[%s5568_s11 + $0x38] sm:$0xff]  ;;  %v901_v35 = vld [vmem:[#allocation12 + $0x150] sm:$0xff]  ;;  %v900_v39 = vld [vmem:[#allocation12 + $0x148] sm:$0xff]  ;;  %s3303_s11 = scalar_lea.sflag [#allocation6], %s5561_s21 }
  0xea   : > { %4053 = vmatprep.subr.mxu1 %v631_v7  ;;  %4010 = vmatpush3.msra.mxu0 %v656_v3  ;;  %620 = vst [vmem:[#allocation2 + $0x61] sm:$0xff] %v5643_v16  ;;  %v553_v32 = vld [vmem:[%s5576_s13 + $0x38] sm:$0xff]  ;;  %v1039_v38 = vld [vmem:[#allocation12 + $0x1d0] sm:$0xff]  ;;  %v1038_v41 = vld [vmem:[#allocation12 + $0x1c8] sm:$0xff]  ;;  %s5150_s13 = scalar_lea.vmem %s5149_s6, 2048 }
  0xeb   : > { %4011 = vmatprep.mubr.f32.mxu0 %v647_v12  ;;  %4054 = vmatpush3.msra.mxu1 %v631_v7  ;;  %v569_v33 = vld [vmem:[%s5583_s26 + $0x38] sm:$0xff]  ;;  %v561_v36 = vmax.f32 %v545_v31, %v553_v32  ;;  %v899_v42 = vld [vmem:[#allocation12 + $0x140] sm:$0xff]  ;;  %v897_v47 = vld [vmem:[#allocation12 + $0x130] sm:$0xff]  ;;  %p5152_p0 = scmp.lt.s32.totalorder %s5150_s13, %s5144_s27 }
  0xec   : > { %4012 = vmatmul.mubr.f32.vlgmr.msra.gmra.mxu0 %v5604_v25  ;;  %4056 = vmatmul.mubr.f32.vlgmr.msra.gmra.mxu1 %v5645_v18  ;;  %v577_v34 = vld [vmem:[%s5586_s20 + $0x38] sm:$0xff]  ;;  %v1037_v43 = vld [vmem:[#allocation12 + $0x1c0] sm:$0xff]  ;;  %v5663_v49 = vld [vmem:[#allocation2 + $0x30] sm:$0xff] }
  0xed   : > { %4067 = vmatprep.subr.mxu0 %v906_v19  ;;  %4111 = vmatprep.subr.mxu1 %v1044_v20  ;;  %v585_v37 = vmax.f32 %v569_v33, %v577_v34  ;;  %v898_v44 = vld [vmem:[#allocation12 + $0x138] sm:$0xff]  ;;  %v5660_v46 = vld [vmem:[#allocation2 + $0x20] sm:$0xff]  ;;  %v896_v50 = vld [vmem:[#allocation12 + $0x128] sm:$0xff]  ;;  %p5153_p11 = por %p5152_p0, %p5151_p4 }
  0xee   : > { %4068 = vmatpush3.msra.mxu0 %v906_v19  ;;  %4112 = vmatpush3.msra.mxu1 %v1044_v20  ;;  %v1036_v48 = vld [vmem:[#allocation12 + $0x1b8] sm:$0xff]  ;;  %v1035_v51 = vld [vmem:[#allocation12 + $0x1b0] sm:$0xff]  ;;  %v5668_v52 = vld [vmem:[#allocation2 + $0x40] sm:$0xff] }
  0xef   : > { %4069 = vmatprep.subr.mxu0 %v905_v22  ;;  %4113 = vmatprep.subr.mxu1 %v1043_v23  ;;  %v5657_v40 = vmax.f32 %v561_v36, %v585_v37  ;;  %v895_v53 = vld [vmem:[#allocation12 + $0x120] sm:$0xff]  ;;  %v1034_v55 = vld [vmem:[#allocation12 + $0x1a8] sm:$0xff]  ;;  %v5671_v56 = vld [vmem:[#allocation2 + $0x50] sm:$0xff]  ;;  %p5154_p12 = pnand %p5153_p11, %p5147_p5 }
  0xf0   : > { %4070 = vmatpush3.msra.mxu0 %v905_v22  ;;  %4114 = vmatpush3.msra.mxu1 %v1043_v23  ;;  %v894_v57 = vld [vmem:[#allocation12 + $0x118] sm:$0xff]  ;;  %v1033_v58 = vld [vmem:[#allocation12 + $0x1a0] sm:$0xff]  ;;  %v893_v60 = vld [vmem:[#allocation12 + $0x110] sm:$0xff] }
  0xf1   : > { %4071 = vmatprep.subr.mxu0 %v904_v24  ;;  %4115 = vmatprep.subr.mxu1 %v1042_v26  ;;  %622 = vst [vmem:[#allocation2 + $0x81] sm:$0xff] %v5657_v40  ;;  %v5676_v59 = vld [vmem:[#allocation2 + $0x60] sm:$0xff]  ;;  %v1032_v61 = vld [vmem:[#allocation12 + $0x198] sm:$0xff]  ;;  %v5679_v62 = vld [vmem:[#allocation2 + $0x70] sm:$0xff] }
  0xf2   : > { %4072 = vmatpush3.msra.mxu0 %v904_v24  ;;  %4116 = vmatpush3.msra.mxu1 %v1042_v26  ;;  %v892_v0 = vld [vmem:[#allocation12 + $0x108] sm:$0xff]  ;;  %v1031_v1 = vld [vmem:[#allocation12 + $0x190] sm:$0xff]  ;;  %v891_v2 = vld [vmem:[#allocation12 + $0x100] sm:$0xff] }
  0xf3   : > { %4073 = vmatprep.subr.mxu0 %v903_v27  ;;  %4117 = vmatprep.subr.mxu1 %v1041_v28  ;;  %v1030_v3 = vld [vmem:[#allocation12 + $0x188] sm:$0xff]  ;;  %v5684_v5 = vld [vmem:[#allocation2 + $0x12] sm:$0xff]  ;;  %v1029_v6 = vld [vmem:[#allocation12 + $0x180] sm:$0xff] }
  0xf4   : > { %4074 = vmatpush3.msra.mxu0 %v903_v27  ;;  %4118 = vmatpush3.msra.mxu1 %v1041_v28  ;;  %v882_v4 = vld [vmem:[#allocation2 + $0x2] sm:$0xff]  ;;  %v1182_v7 = vld [vmem:[#allocation12 + $0x278] sm:$0xff]  ;;  %v1181_v9 = vld [vmem:[#allocation12 + $0x270] sm:$0xff] }
  0xf5   : > { %4075 = vmatprep.subr.mxu0 %v902_v29  ;;  %4119 = vmatprep.subr.mxu1 %v1040_v30  ;;  %v1320_v10 = vld [vmem:[#allocation12 + $0x2f8] sm:$0xff]  ;;  %v5687_v11 = vld [vmem:[#allocation2 + $0x22] sm:$0xff]  ;;  %v1319_v14 = vld [vmem:[#allocation12 + $0x2f0] sm:$0xff] }
  0xf6   : > { %4076 = vmatpush3.msra.mxu0 %v902_v29  ;;  %4120 = vmatpush3.msra.mxu1 %v1040_v30  ;;  %v5691_v12 = vld [vmem:[#allocation2 + $0x32] sm:$0xff]  ;;  %v1180_v13 = vld [vmem:[#allocation12 + $0x268] sm:$0xff]  ;;  %v1179_v15 = vld [vmem:[#allocation12 + $0x260] sm:$0xff] }
  0xf7   : > { %4077 = vmatprep.subr.mxu0 %v901_v35  ;;  %4121 = vmatprep.subr.mxu1 %v1039_v38  ;;  %v1318_v17 = vld [vmem:[#allocation12 + $0x2e8] sm:$0xff]  ;;  %v5699_v19 = vld [vmem:[#allocation2 + $0x52] sm:$0xff]  ;;  %v1317_v22 = vld [vmem:[#allocation12 + $0x2e0] sm:$0xff] }
  0xf8   : > { %4078 = vmatpush3.msra.mxu0 %v901_v35  ;;  %4122 = vmatpush3.msra.mxu1 %v1039_v38  ;;  %v1178_v20 = vld [vmem:[#allocation12 + $0x258] sm:$0xff]  ;;  %v1177_v23 = vld [vmem:[#allocation12 + $0x250] sm:$0xff]  ;;  %v5704_v26 = vld [vmem:[#allocation2 + $0x62] sm:$0xff] }
  0xf9   : > { %4079 = vmatprep.subr.mxu0 %v900_v39  ;;  %4123 = vmatprep.subr.mxu1 %v1038_v41  ;;  %v1316_v24 = vld [vmem:[#allocation12 + $0x2d8] sm:$0xff]  ;;  %v1176_v28 = vld [vmem:[#allocation12 + $0x248] sm:$0xff]  ;;  %v1315_v29 = vld [vmem:[#allocation12 + $0x2d0] sm:$0xff] }
  0xfa   : > { %4080 = vmatpush3.msra.mxu0 %v900_v39  ;;  %4124 = vmatpush3.msra.mxu1 %v1038_v41  ;;  %v5707_v27 = vld [vmem:[#allocation2 + $0x72] sm:$0xff]  ;;  %v5711_v30 = vld [vmem:[#allocation2 + $0x80] sm:$0xff]  ;;  %v1314_v32 = vld [vmem:[#allocation12 + $0x2c8] sm:$0xff] }
  0xfb   : > { %4081 = vmatprep.subr.mxu0 %v899_v42  ;;  %4125 = vmatprep.subr.mxu1 %v1037_v43  ;;  %v1175_v31 = vld [vmem:[#allocation12 + $0x240] sm:$0xff]  ;;  %v1174_v33 = vld [vmem:[#allocation12 + $0x238] sm:$0xff]  ;;  %v1173_v35 = vld [vmem:[#allocation12 + $0x230] sm:$0xff] }
  0xfc   : > { %4082 = vmatpush3.msra.mxu0 %v899_v42  ;;  %4126 = vmatpush3.msra.mxu1 %v1037_v43  ;;  %v1313_v34 = vld [vmem:[#allocation12 + $0x2c0] sm:$0xff]  ;;  %v1312_v36 = vld [vmem:[#allocation12 + $0x2b8] sm:$0xff]  ;;  %v1172_v37 = vld [vmem:[#allocation12 + $0x228] sm:$0xff] }
  0xfd   : > { %4083 = vmatprep.subr.mxu0 %v898_v44  ;;  %4014 = vmatprep.mubr.f32.mxu0 %v5615_v45  ;;  %v1311_v38 = vld [vmem:[#allocation12 + $0x2b0] sm:$0xff]  ;;  %v1171_v39 = vld [vmem:[#allocation12 + $0x220] sm:$0xff]  ;;  %v1310_v41 = vld [vmem:[#allocation12 + $0x2a8] sm:$0xff] }
  0xfe   : > { %4084 = vmatpush3.msra.mxu0 %v898_v44  ;;  %4058 = vmatprep.mubr.f32.mxu1 %v5660_v46  ;;  %v1170_v42 = vld [vmem:[#allocation12 + $0x218] sm:$0xff]  ;;  %v1309_v43 = vld [vmem:[#allocation12 + $0x2a0] sm:$0xff]  ;;  %v1169_v44 = vld [vmem:[#allocation12 + $0x210] sm:$0xff] }
  0xff   : > { %4085 = vmatprep.subr.mxu0 %v897_v47  ;;  %4127 = vmatprep.subr.mxu1 %v1036_v48 }
 0x100   : > { %4015 = vmatmul.mubr.f32.gmra.mxu0 %v5622_v54  ;;  %4059 = vmatmul.mubr.f32.gmra.mxu1 %v5663_v49 }
 0x101   : > { %4086 = vmatpush3.msra.mxu0 %v897_v47  ;;  %4128 = vmatpush3.msra.mxu1 %v1036_v48  ;;  %v1308_v47 = vld [vmem:[#allocation12 + $0x298] sm:$0xff]  ;;  %v1168_v48 = vld [vmem:[#allocation12 + $0x208] sm:$0xff] }
 0x102   : > { %4087 = vmatprep.subr.mxu0 %v896_v50  ;;  %4129 = vmatprep.subr.mxu1 %v1035_v51 }
 0x103   : > { %4088 = vmatpush3.msra.mxu0 %v896_v50  ;;  %4130 = vmatpush3.msra.mxu1 %v1035_v51  ;;  %v1307_v50 = vld [vmem:[#allocation12 + $0x290] sm:$0xff]  ;;  %v1167_v51 = vld [vmem:[#allocation12 + $0x200] sm:$0xff] }
 0x104   : > { %4017 = vmatprep.mubr.f32.mxu0 %v5629_v63  ;;  %4061 = vmatprep.mubr.f32.mxu1 %v5668_v52 }
 0x105   : > { %4089 = vmatprep.subr.mxu0 %v895_v53  ;;  %4131 = vmatprep.subr.mxu1 %v1034_v55 }
 0x106   : > { %4018 = vmatmul.mubr.f32.gmra.mxu0 %v5636_v8  ;;  %4062 = vmatmul.mubr.f32.gmra.mxu1 %v5671_v56 }
 0x107   : > { %4090 = vmatpush3.msra.mxu0 %v895_v53  ;;  %4132 = vmatpush3.msra.mxu1 %v1034_v55  ;;  %v1306_v53 = vld [vmem:[#allocation12 + $0x288] sm:$0xff]  ;;  %v1305_v55 = vld [vmem:[#allocation12 + $0x280] sm:$0xff] }
 0x108   : > { %4091 = vmatprep.subr.mxu0 %v894_v57  ;;  %4133 = vmatprep.subr.mxu1 %v1033_v58 }
 0x109   : > { %4092 = vmatpush3.msra.mxu0 %v894_v57  ;;  %4134 = vmatpush3.msra.mxu1 %v1033_v58  ;;  %v1459_v57 = vld [vmem:[#allocation12 + $0x378] sm:$0xff]  ;;  %v1458_v58 = vld [vmem:[#allocation12 + $0x370] sm:$0xff] }
 0x10a   : > { %4020 = vmatprep.mubr.f32.mxu0 %v5643_v16  ;;  %4064 = vmatprep.mubr.f32.mxu1 %v5676_v59 }
 0x10b   : > { %4093 = vmatprep.subr.mxu0 %v893_v60  ;;  %4135 = vmatprep.subr.mxu1 %v1032_v61 }
 0x10c   : > { %4021 = vmatmul.mubr.f32.gmra.mxu0 %v5648_v21  ;;  %4065 = vmatmul.mubr.f32.gmra.mxu1 %v5679_v62 }
 0x10d   : > { %4094 = vmatpush3.msra.mxu0 %v893_v60  ;;  %4136 = vmatpush3.msra.mxu1 %v1032_v61  ;;  %v1597_v60 = vld [vmem:[#allocation12 + $0x3f8] sm:$0xff]  ;;  %v1457_v61 = vld [vmem:[#allocation12 + $0x368] sm:$0xff] }
 0x10e   : > { %4095 = vmatprep.subr.mxu0 %v892_v0  ;;  %4137 = vmatprep.subr.mxu1 %v1031_v1 }
 0x10f   : > { %4096 = vmatpush3.msra.mxu0 %v892_v0  ;;  %4138 = vmatpush3.msra.mxu1 %v1031_v1  ;;  %v1596_v0 = vld [vmem:[#allocation12 + $0x3f0] sm:$0xff]  ;;  %v1595_v1 = vld [vmem:[#allocation12 + $0x3e8] sm:$0xff] }
 0x110   : > { %4097 = vmatprep.subr.mxu0 %v891_v2  ;;  %4139 = vmatprep.subr.mxu1 %v1030_v3 }
 0x111   : > { %4098 = vmatpush3.msra.mxu0 %v891_v2  ;;  %4099 = vmatprep.mubr.f32.mxu0 %v882_v4  ;;  %v1455_v2 = vld [vmem:[#allocation12 + $0x358] sm:$0xff]  ;;  %v1454_v4 = vld [vmem:[#allocation12 + $0x350] sm:$0xff] }
 0x112   : > { %4140 = vmatpush3.msra.mxu1 %v1030_v3  ;;  %4100 = vmatmul.mubr.f32.vlgmr.msra.gmra.mxu0 %v5684_v5  ;;  %v1594_v3 = vld [vmem:[#allocation12 + $0x3e0] sm:$0xff] }
 0x113   : > { %4141 = vmatprep.subr.mxu1 %v1029_v6  ;;  %4155 = vmatprep.subr.mxu0 %v1182_v7 }
 0x114   : > { %4142 = vmatpush3.msra.mxu1 %v1029_v6  ;;  %4143 = vmatprep.mubr.f32.mxu1 %v5645_v18  ;;  %v5696_v18 = vld [vmem:[#allocation2 + $0x42] sm:$0xff] }
 0x115   : > { %4156 = vmatpush3.msra.mxu0 %v1182_v7  ;;  %4144 = vmatmul.mubr.f32.vlgmr.msra.gmra.mxu1 %v5660_v46  ;;  %v1453_v6 = vld [vmem:[#allocation12 + $0x348] sm:$0xff]  ;;  %v1592_v7 = vld [vmem:[#allocation12 + $0x3d0] sm:$0xff] }
 0x116   : > { %4157 = vmatprep.subr.mxu0 %v1181_v9  ;;  %4199 = vmatprep.subr.mxu1 %v1320_v10 }
 0x117   : > { %4102 = vmatprep.mubr.f32.mxu0 %v5687_v11  ;;  %4158 = vmatpush3.msra.mxu0 %v1181_v9  ;;  %v5729_v9 = vld [vmem:[#allocation2 + $0x82] sm:$0xff] }
 0x118   : > { %4200 = vmatpush3.msra.mxu1 %v1320_v10  ;;  %4103 = vmatmul.mubr.f32.gmra.mxu0 %v5691_v12  ;;  %v1452_v10 = vld [vmem:[#allocation12 + $0x340] sm:$0xff] }
 0x119   : > { %4159 = vmatprep.subr.mxu0 %v1180_v13  ;;  %4201 = vmatprep.subr.mxu1 %v1319_v14 }
 0x11a   : > { %4146 = vmatprep.mubr.f32.mxu1 %v5663_v49  ;;  %4160 = vmatpush3.msra.mxu0 %v1180_v13  ;;  %v1591_v13 = vld [vmem:[#allocation12 + $0x3c8] sm:$0xff] }
 0x11b   : > { %4202 = vmatpush3.msra.mxu1 %v1319_v14  ;;  %4161 = vmatprep.subr.mxu0 %v1179_v15  ;;  %v1451_v14 = vld [vmem:[#allocation12 + $0x338] sm:$0xff] }
 0x11c   : > { %4147 = vmatmul.mubr.f32.gmra.mxu1 %v5668_v52  ;;  %4203 = vmatprep.subr.mxu1 %v1318_v17 }
 0x11d   : > { %4105 = vmatprep.mubr.f32.mxu0 %v5696_v18  ;;  %4162 = vmatpush3.msra.mxu0 %v1179_v15  ;;  %v1590_v15 = vld [vmem:[#allocation12 + $0x3c0] sm:$0xff] }
 0x11e   : > { %4204 = vmatpush3.msra.mxu1 %v1318_v17  ;;  %4106 = vmatmul.mubr.f32.gmra.mxu0 %v5699_v19  ;;  %v1450_v17 = vld [vmem:[#allocation12 + $0x330] sm:$0xff] }
 0x11f   : > { %4163 = vmatprep.subr.mxu0 %v1178_v20  ;;  %4205 = vmatprep.subr.mxu1 %v1317_v22 }
 0x120   : > { %4149 = vmatprep.mubr.f32.mxu1 %v5671_v56  ;;  %4164 = vmatpush3.msra.mxu0 %v1178_v20  ;;  %v1589_v20 = vld [vmem:[#allocation12 + $0x3b8] sm:$0xff] }
 0x121   : > { %4206 = vmatpush3.msra.mxu1 %v1317_v22  ;;  %4165 = vmatprep.subr.mxu0 %v1177_v23  ;;  %v1449_v22 = vld [vmem:[#allocation12 + $0x328] sm:$0xff] }
 0x122   : > { %4150 = vmatmul.mubr.f32.gmra.mxu1 %v5676_v59  ;;  %4207 = vmatprep.subr.mxu1 %v1316_v24 }
 0x123   : > { %4108 = vmatprep.mubr.f32.mxu0 %v5704_v26  ;;  %4166 = vmatpush3.msra.mxu0 %v1177_v23  ;;  %v1588_v23 = vld [vmem:[#allocation12 + $0x3b0] sm:$0xff] }
 0x124   : > { %4208 = vmatpush3.msra.mxu1 %v1316_v24  ;;  %4109 = vmatmul.mubr.f32.gmra.mxu0 %v5707_v27  ;;  %v1448_v24 = vld [vmem:[#allocation12 + $0x320] sm:$0xff] }
 0x125   : > { %4167 = vmatprep.subr.mxu0 %v1176_v28  ;;  %4209 = vmatprep.subr.mxu1 %v1315_v29 }
 0x126   : > { %4152 = vmatprep.mubr.f32.mxu1 %v5679_v62  ;;  %4168 = vmatpush3.msra.mxu0 %v1176_v28  ;;  %v1587_v28 = vld [vmem:[#allocation12 + $0x3a8] sm:$0xff] }
 0x127   : > { %4210 = vmatpush3.msra.mxu1 %v1315_v29  ;;  %4169 = vmatprep.subr.mxu0 %v1175_v31  ;;  %v1447_v29 = vld [vmem:[#allocation12 + $0x318] sm:$0xff] }
 0x128   : > { %4153 = vmatmul.mubr.f32.gmra.mxu1 %v5711_v30  ;;  %4211 = vmatprep.subr.mxu1 %v1314_v32 }
 0x129   : > { %4170 = vmatpush3.msra.mxu0 %v1175_v31  ;;  %4212 = vmatpush3.msra.mxu1 %v1314_v32  ;;  %v1586_v31 = vld [vmem:[#allocation12 + $0x3a0] sm:$0xff]  ;;  %v1446_v32 = vld [vmem:[#allocation12 + $0x310] sm:$0xff] }
 0x12a   : > { %4171 = vmatprep.subr.mxu0 %v1174_v33  ;;  %4213 = vmatprep.subr.mxu1 %v1313_v34 }
 0x12b   : > { %4172 = vmatpush3.msra.mxu0 %v1174_v33  ;;  %4214 = vmatpush3.msra.mxu1 %v1313_v34  ;;  %v1585_v33 = vld [vmem:[#allocation12 + $0x398] sm:$0xff]  ;;  %v1445_v34 = vld [vmem:[#allocation12 + $0x308] sm:$0xff] }
 0x12c   : > { %4173 = vmatprep.subr.mxu0 %v1173_v35  ;;  %4215 = vmatprep.subr.mxu1 %v1312_v36 }
 0x12d   : > { %4174 = vmatpush3.msra.mxu0 %v1173_v35  ;;  %4216 = vmatpush3.msra.mxu1 %v1312_v36  ;;  %v1584_v35 = vld [vmem:[#allocation12 + $0x390] sm:$0xff]  ;;  %v1444_v36 = vld [vmem:[#allocation12 + $0x300] sm:$0xff] }
 0x12e   : > { %4175 = vmatprep.subr.mxu0 %v1172_v37  ;;  %4217 = vmatprep.subr.mxu1 %v1311_v38 }
 0x12f   : > { %4176 = vmatpush3.msra.mxu0 %v1172_v37  ;;  %4218 = vmatpush3.msra.mxu1 %v1311_v38  ;;  %v1583_v37 = vld [vmem:[#allocation12 + $0x388] sm:$0xff]  ;;  %v1582_v38 = vld [vmem:[#allocation12 + $0x380] sm:$0xff] }
 0x130   : > { %4177 = vmatprep.subr.mxu0 %v1171_v39  ;;  %4219 = vmatprep.subr.mxu1 %v1310_v41 }
 0x131   : > { %4178 = vmatpush3.msra.mxu0 %v1171_v39  ;;  %4220 = vmatpush3.msra.mxu1 %v1310_v41  ;;  %v1735_v39 = vld [vmem:[#allocation12 + $0x478] sm:$0xff]  ;;  %v1734_v41 = vld [vmem:[#allocation12 + $0x470] sm:$0xff] }
 0x132   : > { %4179 = vmatprep.subr.mxu0 %v1170_v42  ;;  %4221 = vmatprep.subr.mxu1 %v1309_v43 }
 0x133   : > { %4180 = vmatpush3.msra.mxu0 %v1170_v42  ;;  %4222 = vmatpush3.msra.mxu1 %v1309_v43  ;;  %v1733_v42 = vld [vmem:[#allocation12 + $0x468] sm:$0xff]  ;;  %v1732_v43 = vld [vmem:[#allocation12 + $0x460] sm:$0xff] }
 0x134   : > { %4181 = vmatprep.subr.mxu0 %v1169_v44  ;;  %4223 = vmatprep.subr.mxu1 %v1308_v47 }
 0x135   : > { %4182 = vmatpush3.msra.mxu0 %v1169_v44  ;;  %4224 = vmatpush3.msra.mxu1 %v1308_v47  ;;  %v1949_v44 = vld [vmem:[#allocation13 + $0xf8] sm:$0xff]  ;;  %v1948_v47 = vld [vmem:[#allocation13 + $0xf0] sm:$0xff] }
 0x136   : > { %4183 = vmatprep.subr.mxu0 %v1168_v48  ;;  %4225 = vmatprep.subr.mxu1 %v1307_v50 }
 0x137   : > { %4184 = vmatpush3.msra.mxu0 %v1168_v48  ;;  %4226 = vmatpush3.msra.mxu1 %v1307_v50  ;;  %v1922_v48 = vld [vmem:[#allocation13 + $0x68] sm:$0xff]  ;;  %v1944_v50 = vld [vmem:[#allocation13 + $0xd0] sm:$0xff] }
 0x138   : > { %4185 = vmatprep.subr.mxu0 %v1167_v51  ;;  %4227 = vmatprep.subr.mxu1 %v1306_v53 }
 0x139   : > { %4186 = vmatpush3.msra.mxu0 %v1167_v51  ;;  %4187 = vmatprep.mubr.f32.mxu0 %v5604_v25  ;;  %v1456_v25 = vld [vmem:[#allocation12 + $0x360] sm:$0xff] }
 0x13a   : > { %4228 = vmatpush3.msra.mxu1 %v1306_v53  ;;  %4188 = vmatmul.mubr.f32.vlgmr.msra.gmra.mxu0 %v5615_v45  ;;  %v1921_v51 = vld [vmem:[#allocation13 + $0x60] sm:$0xff]  ;;  %v1943_v53 = vld [vmem:[#allocation13 + $0xc8] sm:$0xff] }
 0x13b   : > { %4229 = vmatprep.subr.mxu1 %v1305_v55  ;;  %4243 = vmatprep.subr.mxu0 %v1459_v57 }
 0x13c   : > { %4230 = vmatpush3.msra.mxu1 %v1305_v55  ;;  %4231 = vmatprep.mubr.f32.mxu1 %v5684_v5  ;;  %v1593_v5 = vld [vmem:[#allocation12 + $0x3d8] sm:$0xff]  ;;  %v1942_v55 = vld [vmem:[#allocation13 + $0xc0] sm:$0xff] }
 0x13d   : > { %4244 = vmatpush3.msra.mxu0 %v1459_v57  ;;  %4232 = vmatmul.mubr.f32.vlgmr.msra.gmra.mxu1 %v5687_v11  ;;  %v1920_v57 = vld [vmem:[#allocation13 + $0x58] sm:$0xff] }
 0x13e   : > { %4245 = vmatprep.subr.mxu0 %v1458_v58  ;;  %4287 = vmatprep.subr.mxu1 %v1597_v60 }
 0x13f   : > { %4190 = vmatprep.mubr.f32.mxu0 %v5622_v54  ;;  %4246 = vmatpush3.msra.mxu0 %v1458_v58  ;;  %v1919_v58 = vld [vmem:[#allocation13 + $0x50] sm:$0xff] }
 0x140   : > { %4288 = vmatpush3.msra.mxu1 %v1597_v60  ;;  %4191 = vmatmul.mubr.f32.gmra.mxu0 %v5629_v63  ;;  %v1941_v60 = vld [vmem:[#allocation13 + $0xb8] sm:$0xff] }
 0x141   : > { %4247 = vmatprep.subr.mxu0 %v1457_v61  ;;  %4289 = vmatprep.subr.mxu1 %v1596_v0 }
 0x142   : > { %4234 = vmatprep.mubr.f32.mxu1 %v5691_v12  ;;  %4248 = vmatpush3.msra.mxu0 %v1457_v61  ;;  %v1918_v61 = vld [vmem:[#allocation13 + $0x48] sm:$0xff] }
 0x143   : > { %4290 = vmatpush3.msra.mxu1 %v1596_v0  ;;  %4249 = vmatprep.subr.mxu0 %v1456_v25  ;;  %v1940_v0 = vld [vmem:[#allocation13 + $0xb0] sm:$0xff] }
 0x144   : > { %4235 = vmatmul.mubr.f32.gmra.mxu1 %v5696_v18  ;;  %4291 = vmatprep.subr.mxu1 %v1595_v1 }
 0x145   : > { %4193 = vmatprep.mubr.f32.mxu0 %v5636_v8  ;;  %4250 = vmatpush3.msra.mxu0 %v1456_v25  ;;  %v1917_v25 = vld [vmem:[#allocation13 + $0x40] sm:$0xff] }
 0x146   : > { %4292 = vmatpush3.msra.mxu1 %v1595_v1  ;;  %4194 = vmatmul.mubr.f32.gmra.mxu0 %v5643_v16  ;;  %v1939_v1 = vld [vmem:[#allocation13 + $0xa8] sm:$0xff] }
 0x147   : > { %4251 = vmatprep.subr.mxu0 %v1455_v2  ;;  %4293 = vmatprep.subr.mxu1 %v1594_v3 }
 0x148   : > { %4237 = vmatprep.mubr.f32.mxu1 %v5699_v19  ;;  %4252 = vmatpush3.msra.mxu0 %v1455_v2  ;;  %v1938_v2 = vld [vmem:[#allocation13 + $0xa0] sm:$0xff] }
 0x149   : > { %4294 = vmatpush3.msra.mxu1 %v1594_v3  ;;  %4253 = vmatprep.subr.mxu0 %v1454_v4  ;;  %v1916_v3 = vld [vmem:[#allocation13 + $0x38] sm:$0xff] }
 0x14a   : > { %4238 = vmatmul.mubr.f32.gmra.mxu1 %v5704_v26  ;;  %4295 = vmatprep.subr.mxu1 %v1593_v5 }
 0x14b   : > { %4196 = vmatprep.mubr.f32.mxu0 %v5648_v21  ;;  %4254 = vmatpush3.msra.mxu0 %v1454_v4  ;;  %v1937_v4 = vld [vmem:[#allocation13 + $0x98] sm:$0xff] }
 0x14c   : > { %4296 = vmatpush3.msra.mxu1 %v1593_v5  ;;  %4197 = vmatmul.mubr.f32.gmra.mxu0 %v5657_v40  ;;  %v1915_v5 = vld [vmem:[#allocation13 + $0x30] sm:$0xff] }
 0x14d   : > { %4255 = vmatprep.subr.mxu0 %v1453_v6  ;;  %4297 = vmatprep.subr.mxu1 %v1592_v7 }
 0x14e   : > { %4240 = vmatprep.mubr.f32.mxu1 %v5707_v27  ;;  %4256 = vmatpush3.msra.mxu0 %v1453_v6  ;;  %v1936_v6 = vld [vmem:[#allocation13 + $0x90] sm:$0xff] }
 0x14f   : > { %4298 = vmatpush3.msra.mxu1 %v1592_v7  ;;  %4257 = vmatprep.subr.mxu0 %v1452_v10  ;;  %v1914_v7 = vld [vmem:[#allocation13 + $0x28] sm:$0xff] }
 0x150   : > { %4241 = vmatmul.mubr.f32.gmra.mxu1 %v5729_v9  ;;  %4299 = vmatprep.subr.mxu1 %v1591_v13 }
 0x151   : > { %4258 = vmatpush3.msra.mxu0 %v1452_v10  ;;  %4300 = vmatpush3.msra.mxu1 %v1591_v13  ;;  %v1913_v10 = vld [vmem:[#allocation13 + $0x20] sm:$0xff] }
 0x152   : > { %4259 = vmatprep.subr.mxu0 %v1451_v14  ;;  %4301 = vmatprep.subr.mxu1 %v1590_v15  ;;  %v1934_v13 = vld [vmem:[#allocation13 + $0x80] sm:$0xff] }
 0x153   : > { %4260 = vmatpush3.msra.mxu0 %v1451_v14  ;;  %4302 = vmatpush3.msra.mxu1 %v1590_v15  ;;  %v1912_v14 = vld [vmem:[#allocation13 + $0x18] sm:$0xff]  ;;  %v1925_v15 = vld [vmem:[#allocation3 + $0x1] sm:$0xff] }
 0x154   : > { %4261 = vmatprep.subr.mxu0 %v1450_v17  ;;  %4303 = vmatprep.subr.mxu1 %v1589_v20 }
 0x155   : > { %4262 = vmatpush3.msra.mxu0 %v1450_v17  ;;  %4304 = vmatpush3.msra.mxu1 %v1589_v20  ;;  %v5754_v17 = vld [vmem:[#allocation13 + $0x178] sm:$0xff] }
 0x156   : > { %4263 = vmatprep.subr.mxu0 %v1449_v22  ;;  %4305 = vmatprep.subr.mxu1 %v1588_v23  ;;  %6244 = vst [vmem:[#allocation27_spill] sm:$0xff] %v5754_v17 }
 0x157   : > { %4264 = vmatpush3.msra.mxu0 %v1449_v22  ;;  %4306 = vmatpush3.msra.mxu1 %v1588_v23  ;;  %v1911_v22 = vld [vmem:[#allocation13 + $0x10] sm:$0xff]  ;;  %v1910_v23 = vld [vmem:[#allocation13 + $0x8] sm:$0xff] }
 0x158   : > { %4265 = vmatprep.subr.mxu0 %v1448_v24  ;;  %4307 = vmatprep.subr.mxu1 %v1587_v28 }
 0x159   : > { %4266 = vmatpush3.msra.mxu0 %v1448_v24  ;;  %4308 = vmatpush3.msra.mxu1 %v1587_v28  ;;  %v1909_v28 = vld [vmem:[#allocation13] sm:$0xff] }
 0x15a   : > { %4267 = vmatprep.subr.mxu0 %v1447_v29  ;;  %4309 = vmatprep.subr.mxu1 %v1586_v31 }
 0x15b   : > { %4268 = vmatpush3.msra.mxu0 %v1447_v29  ;;  %4310 = vmatpush3.msra.mxu1 %v1586_v31  ;;  %v5759_v31 = vld [vmem:[#allocation13 + $0x1f8] sm:$0xff] }
 0x15c   : > { %4269 = vmatprep.subr.mxu0 %v1446_v32  ;;  %4311 = vmatprep.subr.mxu1 %v1585_v33  ;;  %6245 = vst [vmem:[#allocation28_spill] sm:$0xff] %v5759_v31 }
 0x15d   : > { %4270 = vmatpush3.msra.mxu0 %v1446_v32  ;;  %4312 = vmatpush3.msra.mxu1 %v1585_v33 }
 0x15e   : > { %4271 = vmatprep.subr.mxu0 %v1445_v34  ;;  %4313 = vmatprep.subr.mxu1 %v1584_v35 }
 0x15f   : > { %4272 = vmatpush3.msra.mxu0 %v1445_v34  ;;  %4314 = vmatpush3.msra.mxu1 %v1584_v35 }
 0x160   : > { %4273 = vmatprep.subr.mxu0 %v1444_v36  ;;  %4315 = vmatprep.subr.mxu1 %v1583_v37 }
 0x161   : > { %4274 = vmatpush3.msra.mxu0 %v1444_v36  ;;  %4275 = vmatprep.mubr.f32.mxu0 %v5660_v46  ;;  %v1731_v46 = vld [vmem:[#allocation12 + $0x458] sm:$0xff] }
 0x162   : > { %4316 = vmatpush3.msra.mxu1 %v1583_v37  ;;  %4276 = vmatmul.mubr.f32.vlgmr.msra.gmra.mxu0 %v5663_v49  ;;  %v4944_v49 = vld [vmem:[#allocation2] sm:$0xff] }
 0x163   : > { %4317 = vmatprep.subr.mxu1 %v1582_v38  ;;  %4331 = vmatprep.subr.mxu0 %v1735_v39 }
 0x164   : > { %4318 = vmatpush3.msra.mxu1 %v1582_v38  ;;  %4319 = vmatprep.mubr.f32.mxu1 %v5615_v45  ;;  %v1730_v45 = vld [vmem:[#allocation12 + $0x450] sm:$0xff] }
 0x165   : > { %4332 = vmatpush3.msra.mxu0 %v1735_v39  ;;  %4320 = vmatmul.mubr.f32.vlgmr.msra.gmra.mxu1 %v5622_v54  ;;  %v1729_v54 = vld [vmem:[#allocation12 + $0x448] sm:$0xff] }
 0x166   : > { %4333 = vmatprep.subr.mxu0 %v1734_v41  ;;  %4278 = vmatprep.mubr.f32.mxu0 %v5668_v52  ;;  %v1727_v52 = vld [vmem:[#allocation12 + $0x438] sm:$0xff] }
 0x167   : > { %4334 = vmatpush3.msra.mxu0 %v1734_v41  ;;  %4322 = vmatprep.mubr.f32.mxu1 %v5629_v63  ;;  %v1580_v63 = vld [vmem:[#allocation2 + $0x91] sm:$0xff] }
 0x168   : > { %4279 = vmatmul.mubr.f32.gmra.mxu0 %v5671_v56  ;;  %4335 = vmatprep.subr.mxu0 %v1733_v42  ;;  %v1724_v56 = vld [vmem:[#allocation12 + $0x420] sm:$0xff] }
 0x169   : > { %4336 = vmatpush3.msra.mxu0 %v1733_v42  ;;  %4323 = vmatmul.mubr.f32.gmra.mxu1 %v5636_v8  ;;  %v1728_v8 = vld [vmem:[#allocation12 + $0x440] sm:$0xff] }
 0x16a   : > { %4337 = vmatprep.subr.mxu0 %v1732_v43  ;;  %4281 = vmatprep.mubr.f32.mxu0 %v5676_v59  ;;  %v1723_v59 = vld [vmem:[#allocation12 + $0x418] sm:$0xff] }
 0x16b   : > { %4338 = vmatpush3.msra.mxu0 %v1732_v43  ;;  %4325 = vmatprep.mubr.f32.mxu1 %v5643_v16  ;;  %v1726_v16 = vld [vmem:[#allocation12 + $0x430] sm:$0xff] }
 0x16c   : > { %4282 = vmatmul.mubr.f32.gmra.mxu0 %v5679_v62  ;;  %4339 = vmatprep.subr.mxu0 %v1731_v46  ;;  %v1721_v62 = vld [vmem:[#allocation12 + $0x408] sm:$0xff] }
 0x16d   : > { %4340 = vmatpush3.msra.mxu0 %v1731_v46  ;;  %4326 = vmatmul.mubr.f32.gmra.mxu1 %v5648_v21  ;;  %v1725_v21 = vld [vmem:[#allocation12 + $0x428] sm:$0xff] }
 0x16e   : > { %4341 = vmatprep.subr.mxu0 %v1730_v45  ;;  %4284 = vmatprep.mubr.f32.mxu0 %v5711_v30  ;;  %v1720_v30 = vld [vmem:[#allocation12 + $0x400] sm:$0xff] }
 0x16f   : > { %4342 = vmatpush3.msra.mxu0 %v1730_v45  ;;  %4328 = vmatprep.mubr.f32.mxu1 %v5657_v40  ;;  %v1722_v40 = vld [vmem:[#allocation12 + $0x410] sm:$0xff] }
 0x170   : > { %4285 = vmatmul.mubr.f32.gmra.mxu0 %v4944_v49  ;;  %4343 = vmatprep.subr.mxu0 %v1729_v54 }
 0x171   : > { %4344 = vmatpush3.msra.mxu0 %v1729_v54  ;;  %4329 = vmatmul.mubr.f32.gmra.mxu1 %v1580_v63 }
 0x172   : > { %4345 = vmatprep.subr.mxu0 %v1728_v8  ;;  %4363 = vmatprep.mubr.f32.mxu0 %v5687_v11  ;;  %v1718_v11 = vld [vmem:[#allocation2 + $0x92] sm:$0xff] }
 0x173   : > { %4346 = vmatpush3.msra.mxu0 %v1728_v8  ;;  %4375 = vmatprep.subr.mxu1 %v1949_v44 }
 0x174   : > { %4347 = vmatprep.subr.mxu0 %v1727_v52  ;;  %4376 = vmatpush3.msra.mxu1 %v1949_v44 }
 0x175   : > { %4348 = vmatpush3.msra.mxu0 %v1727_v52  ;;  %4377 = vmatprep.subr.mxu1 %v1948_v47 }
 0x176   : > { %4349 = vmatprep.subr.mxu0 %v1726_v16  ;;  %4378 = vmatpush3.msra.mxu1 %v1948_v47 }
 0x177   : > { %4350 = vmatpush3.msra.mxu0 %v1726_v16  ;;  %4407 = vmatprep.mubr.f32.mxu1 %v1925_v15 }
 0x178   : > { %4351 = vmatprep.subr.mxu0 %v1725_v21 }
 0x179   : > { %4352 = vmatpush3.msra.mxu0 %v1725_v21 }
 0x17a   : > { %4353 = vmatprep.subr.mxu0 %v1724_v56 }
 0x17b   : > { %4354 = vmatpush3.msra.mxu0 %v1724_v56 }
 0x17c   : > { %4355 = vmatprep.subr.mxu0 %v1723_v59 }
 0x17d   : > { %4356 = vmatpush3.msra.mxu0 %v1723_v59 }
 0x17e   : > { %4357 = vmatprep.subr.mxu0 %v1722_v40 }
 0x17f   : > { %4358 = vmatpush3.msra.mxu0 %v1722_v40 }
 0x180   : > { %4359 = vmatprep.subr.mxu0 %v1721_v62 }
 0x181   : > { %4360 = vmatpush3.msra.mxu0 %v1721_v62 }
 0x182   : > { %4361 = vmatprep.subr.mxu0 %v1720_v30 }
 0x183   : > { %4362 = vmatpush3.msra.mxu0 %v1720_v30 }
 0x184   : > { %4364 = vmatmul.mubr.f32.vlgmr.msra.gmra.mxu0 %v5691_v12  ;;  %v1947_v12 = vld [vmem:[#allocation13 + $0xe8] sm:$0xff] }
 0x185   : > { %4366 = vmatprep.mubr.f32.mxu0 %v5696_v18  ;;  %4379 = vmatprep.subr.mxu1 %v1947_v12  ;;  %v1946_v18 = vld [vmem:[#allocation13 + $0xe0] sm:$0xff] }
 0x186   : > { %4380 = vmatpush3.msra.mxu1 %v1947_v12 }
 0x187   : > { %4381 = vmatprep.subr.mxu1 %v1946_v18 }
 0x188   : > { %4367 = vmatmul.mubr.f32.gmra.mxu0 %v5699_v19  ;;  %v1924_v19 = vld [vmem:[#allocation13 + $0x78] sm:$0xff]  ;;  %4382 = vmatpush3.msra.mxu1 %v1946_v18 }
 0x189   : > { %4369 = vmatprep.mubr.f32.mxu0 %v5704_v26  ;;  %v1945_v26 = vld [vmem:[#allocation13 + $0xd8] sm:$0xff]  ;;  %4419 = vmatprep.subr.mxu0 %v1924_v19 }
 0x18a   : > { %4383 = vmatprep.subr.mxu1 %v1945_v26  ;;  %4420 = vmatpush3.msra.mxu0 %v1924_v19 }
 0x18b   : > { %4384 = vmatpush3.msra.mxu1 %v1945_v26 }
 0x18c   : > { %4370 = vmatmul.mubr.f32.gmra.mxu0 %v5707_v27  ;;  %v1923_v27 = vld [vmem:[#allocation13 + $0x70] sm:$0xff]  ;;  %4385 = vmatprep.subr.mxu1 %v1944_v50 }
 0x18d   : > { %4372 = vmatprep.mubr.f32.mxu0 %v5729_v9  ;;  %4421 = vmatprep.subr.mxu0 %v1923_v27  ;;  %v1935_v9 = vld [vmem:[#allocation13 + $0x88] sm:$0xff] }
 0x18e   : > { %4422 = vmatpush3.msra.mxu0 %v1923_v27  ;;  %4386 = vmatpush3.msra.mxu1 %v1944_v50 }
 0x18f   : > { %4423 = vmatprep.subr.mxu0 %v1922_v48  ;;  %4387 = vmatprep.subr.mxu1 %v1943_v53 }
 0x190   : > { %4373 = vmatmul.mubr.f32.gmra.mxu0 %v1718_v11  ;;  %4388 = vmatpush3.msra.mxu1 %v1943_v53 }
 0x191   : > { %4451 = vmatprep.mubr.f32.mxu0 %v4944_v49  ;;  %4424 = vmatpush3.msra.mxu0 %v1922_v48 }
 0x192   : > { %4425 = vmatprep.subr.mxu0 %v1921_v51  ;;  %4389 = vmatprep.subr.mxu1 %v1942_v55 }
 0x193   : > { %4426 = vmatpush3.msra.mxu0 %v1921_v51  ;;  %4390 = vmatpush3.msra.mxu1 %v1942_v55 }
 0x194   : > { %4427 = vmatprep.subr.mxu0 %v1920_v57  ;;  %4391 = vmatprep.subr.mxu1 %v1941_v60 }
 0x195   : > { %4428 = vmatpush3.msra.mxu0 %v1920_v57  ;;  %4392 = vmatpush3.msra.mxu1 %v1941_v60 }
 0x196   : > { %4429 = vmatprep.subr.mxu0 %v1919_v58  ;;  %4393 = vmatprep.subr.mxu1 %v1940_v0 }
 0x197   : > { %4430 = vmatpush3.msra.mxu0 %v1919_v58  ;;  %4394 = vmatpush3.msra.mxu1 %v1940_v0 }
 0x198   : > { %4431 = vmatprep.subr.mxu0 %v1918_v61  ;;  %4395 = vmatprep.subr.mxu1 %v1939_v1 }
 0x199   : > { %4432 = vmatpush3.msra.mxu0 %v1918_v61  ;;  %4396 = vmatpush3.msra.mxu1 %v1939_v1 }
 0x19a   : > { %4433 = vmatprep.subr.mxu0 %v1917_v25  ;;  %4397 = vmatprep.subr.mxu1 %v1938_v2 }
 0x19b   : > { %4434 = vmatpush3.msra.mxu0 %v1917_v25  ;;  %4398 = vmatpush3.msra.mxu1 %v1938_v2 }
 0x19c   : > { %4435 = vmatprep.subr.mxu0 %v1916_v3  ;;  %4399 = vmatprep.subr.mxu1 %v1937_v4 }
 0x19d   : > { %4436 = vmatpush3.msra.mxu0 %v1916_v3  ;;  %4400 = vmatpush3.msra.mxu1 %v1937_v4 }
 0x19e   : > { %4437 = vmatprep.subr.mxu0 %v1915_v5  ;;  %4401 = vmatprep.subr.mxu1 %v1936_v6 }
 0x19f   : > { %4438 = vmatpush3.msra.mxu0 %v1915_v5  ;;  %4402 = vmatpush3.msra.mxu1 %v1936_v6 }
 0x1a0   : > { %4439 = vmatprep.subr.mxu0 %v1914_v7  ;;  %4403 = vmatprep.subr.mxu1 %v1935_v9 }
 0x1a1   : > { %4440 = vmatpush3.msra.mxu0 %v1914_v7  ;;  %4404 = vmatpush3.msra.mxu1 %v1935_v9 }
 0x1a2   : > { %4441 = vmatprep.subr.mxu0 %v1913_v10  ;;  %4405 = vmatprep.subr.mxu1 %v1934_v13 }
 0x1a3   : > { %4442 = vmatpush3.msra.mxu0 %v1913_v10  ;;  %4406 = vmatpush3.msra.mxu1 %v1934_v13 }
 0x1a4   : > { %4443 = vmatprep.subr.mxu0 %v1912_v14  ;;  %4463 = vmatprep.subr.mxu1 %v5754_v17 }
 0x1a5   : > { %4444 = vmatpush3.msra.mxu0 %v1912_v14 }
 0x1a6   : > { %4445 = vmatprep.subr.mxu0 %v1911_v22 }
 0x1a7   : > { %4446 = vmatpush3.msra.mxu0 %v1911_v22 }
 0x1a8   : > { %4447 = vmatprep.subr.mxu0 %v1910_v23 }
 0x1a9   : > { %4448 = vmatpush3.msra.mxu0 %v1910_v23 }
 0x1aa   : > { %4449 = vmatprep.subr.mxu0 %v1909_v28 }
 0x1ab   : > { %4450 = vmatpush3.msra.mxu0 %v1909_v28 }
 0x1ac   : > { %v5756_v20 = vpop.f32.mrf.mxu0  ;;  %4507 = vmatprep.subr.mxu0 %v5759_v31  ;;  %v4057_v33 = vpop.f32.mrf.mxu1 }
 0x1ad   : > { %v849_v5 = vadd.f32 %v4057_v33, %v5756_v20 }
 0x1ae   : > { %v738_v24 = vpop.f32.mrf.mxu0  ;;  %v843_v35 = vpop.f32.mrf.mxu1 }
 0x1af   : > { %v844_v9 = vadd.f32 %v843_v35, %v738_v24 }
 0x1c0   : > { %v4016_v29 = vpop.f32.mrf.mxu0  ;;  %v4060_v37 = vpop.f32.mrf.mxu1 }
 0x1c1   : > { %v859_v13 = vadd.f32 %v4060_v37, %v4016_v29 }
 0x1c2   : > { %v748_v32 = vpop.f32.mrf.mxu0  ;;  %v853_v39 = vpop.f32.mrf.mxu1 }
 0x1c3   : > { %v854_v23 = vadd.f32 %v853_v39, %v748_v32 }
 0x1c6   : > { %v4019_v34 = vpop.f32.mrf.mxu0  ;;  %v4063_v42 = vpop.f32.mrf.mxu1 }
 0x1c7   : > { %v869_v17 = vadd.f32 %v4063_v42, %v4019_v34 }
 0x1c8   : > { %v758_v36 = vpop.f32.mrf.mxu0  ;;  %v863_v46 = vpop.f32.mrf.mxu1 }
 0x1cc   : > { %v5762_v38 = vpop.f32.mrf.mxu0  ;;  %v4066_v54 = vpop.f32.mrf.mxu1 }
 0x1cd   : > { %6246 = vst [vmem:[#allocation29_spill] sm:$0xff] %v5762_v38 }
 0x1ce   : > { %v5764_v41 = vpop.f32.mrf.mxu0  ;;  %v873_v8 = vpop.f32.mrf.mxu1 }
 0x1cf   : > { %6247 = vst [vmem:[#allocation30_spill] sm:$0xff] %v5764_v41  ;;  %v864_v41 = vadd.f32 %v863_v46, %v758_v36 }
 0x1d2   : > { %v4101_v43 = vpop.f32.mrf.mxu0 }
 0x1d3   : > { %v1013_v10 = vadd.f32 %v4101_v43, %v849_v5 }
 0x1d4   : > { %v973_v45 = vpop.f32.mrf.mxu0  ;;  %v6252_v35 = vld [vmem:[#allocation29_spill] sm:$0xff] }
 0x1d5   : > { %v4145_v49 = vpop.f32.mrf.mxu1  ;;  %v1012_v14 = vadd.f32 %v973_v45, %v844_v9  ;;  %v879_v5 = vadd.f32 %v4066_v54, %v6252_v35  ;;  %v2183_v35 = vld [vmem:[#allocation13 + $0x170] sm:$0xff] }
 0x1d6   : > { %v1151_v28 = vadd.f32 %v4145_v49, %v1013_v10  ;;  %v6253_v9 = vld [vmem:[#allocation30_spill] sm:$0xff] }
 0x1d7   : > { %v1111_v16 = vpop.f32.mrf.mxu1  ;;  %v874_v32 = vadd.f32 %v873_v8, %v6253_v9 }
 0x1d8   : > { %v4104_v63 = vpop.f32.mrf.mxu0 }
 0x1d9   : > { %v1015_v31 = vadd.f32 %v4104_v63, %v859_v13 }
 0x1da   : > { %v983_v52 = vpop.f32.mrf.mxu0 }
 0x1dc   : > { %v4148_v56 = vpop.f32.mrf.mxu1 }
 0x1dd   : > { %v1153_v33 = vadd.f32 %v4148_v56, %v1015_v31 }
 0x1de   : > { %v4107_v21 = vpop.f32.mrf.mxu0  ;;  %v1121_v40 = vpop.f32.mrf.mxu1 }
 0x1df   : > { %v1017_v38 = vadd.f32 %v4107_v21, %v869_v17 }
 0x1e0   : > { %v993_v59 = vpop.f32.mrf.mxu0 }
 0x1e1   : > { %v1016_v43 = vadd.f32 %v993_v59, %v864_v41 }
 0x1e2   : > { %v4151_v30 = vpop.f32.mrf.mxu1 }
 0x1e3   : > { %v1155_v39 = vadd.f32 %v4151_v30, %v1017_v38 }
 0x1e4   : > { %v4110_v62 = vpop.f32.mrf.mxu0  ;;  %v1131_v47 = vpop.f32.mrf.mxu1 }
 0x1e5   : > { %v1019_v63 = vadd.f32 %v4110_v62, %v879_v5  ;;  %v1154_v17 = vadd.f32 %v1131_v47, %v1016_v43  ;;  %v5781_v47 = vld [vmem:[%s6183_s5] ss:$0 sm:$0xff] }
 0x1e6   : > { %v1003_v11 = vpop.f32.mrf.mxu0 }
 0x1e7   : > { %v1018_v46 = vadd.f32 %v1003_v11, %v874_v32  ;;  %v6258_v32 = vld [vmem:[#allocation27_spill] sm:$0xff] }
 0x1e8   : > { %v4154_v18 = vpop.f32.mrf.mxu1 }
 0x1e9   : > { %v1157_v56 = vadd.f32 %v4154_v18, %v1019_v63 }
 0x1ea   : > { %v5766_v26 = vpop.f32.mrf.mxu1 }
 0x1eb   : > { %6248 = vst [vmem:[#allocation31_spill] sm:$0xff] %v5766_v26  ;;  %v1014_v26 = vadd.f32 %v983_v52, %v854_v23 }
 0x1ed   : > { %v1152_v29 = vadd.f32 %v1121_v40, %v1014_v26 }
 0x1f2   : > { %v6254_v8 = vld [vmem:[#allocation31_spill] sm:$0xff] }
 0x1f3   : > { %v1156_v38 = vadd.f32 %v6254_v8, %v1018_v46 }
 0x1fa   : > { %v4189_v44 = vpop.f32.mrf.mxu0 }
 0x1fc   : > { %v1249_v12 = vpop.f32.mrf.mxu0 }
 0x1fd   : > { %v4233_v27 = vpop.f32.mrf.mxu1 }
 0x1ff   : > { %v1387_v50 = vpop.f32.mrf.mxu1 }
 0x200   : > { %v4192_v19 = vpop.f32.mrf.mxu0 }
 0x201   : > { %v1291_v45 = vadd.f32 %v4192_v19, %v1153_v33 }
 0x202   : > { %v1259_v48 = vpop.f32.mrf.mxu0 }
 0x203   : > { %v1290_v52 = vadd.f32 %v1259_v48, %v1152_v29 }
 0x204   : > { %v4236_v53 = vpop.f32.mrf.mxu1 }
 0x205   : > { %v1429_v31 = vadd.f32 %v4236_v53, %v1291_v45 }
 0x206   : > { %v4195_v51 = vpop.f32.mrf.mxu0  ;;  %v1397_v57 = vpop.f32.mrf.mxu1 }
 0x207   : > { %v1428_v40 = vadd.f32 %v1397_v57, %v1290_v52 }
 0x208   : > { %v1269_v55 = vpop.f32.mrf.mxu0 }
 0x209   : > { %v1292_v54 = vadd.f32 %v1269_v55, %v1154_v17 }
 0x20a   : > { %v4239_v60 = vpop.f32.mrf.mxu1 }
 0x20c   : > { %v4198_v58 = vpop.f32.mrf.mxu0  ;;  %v1407_v25 = vpop.f32.mrf.mxu1 }
 0x20d   : > { %v1295_v30 = vadd.f32 %v4198_v58, %v1157_v56  ;;  %v1430_v18 = vadd.f32 %v1407_v25, %v1292_v54  ;;  %v2180_v56 = vld [vmem:[#allocation13 + $0x158] sm:$0xff] }
 0x20e   : > { %v5768_v61 = vpop.f32.mrf.mxu0 }
 0x20f   : > { %6249 = vst [vmem:[#allocation32_spill] sm:$0xff] %v5768_v61  ;;  %v1150_v61 = vadd.f32 %v1111_v16, %v1012_v14  ;;  %v1293_v16 = vadd.f32 %v4195_v51, %v1155_v39  ;;  %v2182_v39 = vld [vmem:[#allocation13 + $0x168] sm:$0xff] }
 0x210   : > { %v5770_v2 = vpop.f32.mrf.mxu1 }
 0x211   : > { %6250 = vst [vmem:[#allocation33_spill] sm:$0xff] %v5770_v2  ;;  %v1289_v2 = vadd.f32 %v4189_v44, %v1151_v28  ;;  %v1288_v24 = vadd.f32 %v1249_v12, %v1150_v61  ;;  %v1431_v62 = vadd.f32 %v4239_v60, %v1293_v16 }
 0x212   : > { %v5772_v4 = vpop.f32.mrf.mxu1 }
 0x213   : > { %6251 = vst [vmem:[#allocation34_spill] sm:$0xff] %v5772_v4  ;;  %v1427_v37 = vadd.f32 %v4233_v27, %v1289_v2  ;;  %v1426_v49 = vadd.f32 %v1387_v50, %v1288_v24 }
 0x216   : > { %v6255_v48 = vld [vmem:[#allocation32_spill] sm:$0xff] }
 0x217   : > { %v1294_v50 = vadd.f32 %v6255_v48, %v1156_v38 }
 0x218   : > { %v6256_v58 = vld [vmem:[#allocation33_spill] sm:$0xff] }
 0x21a   : > { %v6257_v25 = vld [vmem:[#allocation34_spill] sm:$0xff] }
 0x21b   : > { %v1432_v13 = vadd.f32 %v6257_v25, %v1294_v50  ;;  %v2317_v50 = vld [vmem:[#allocation13 + $0x1d0] sm:$0xff]  ;;  %v2311_v25 = vld [vmem:[#allocation13 + $0x1a0] sm:$0xff] }
 0x222   : > { %v4277_v0 = vpop.f32.mrf.mxu0 }
 0x223   : > { %v1566_v36 = vadd.f32 %v4277_v0, %v1427_v37  ;;  %v1433_v0 = vadd.f32 %v6256_v58, %v1295_v30  ;;  %v2320_v30 = vld [vmem:[#allocation13 + $0x1e8] sm:$0xff]  ;;  %v2176_v58 = vld [vmem:[#allocation13 + $0x138] sm:$0xff] }
 0x224   : > { %v1526_v1 = vpop.f32.mrf.mxu0 }
 0x225   : > { %v4321_v6 = vpop.f32.mrf.mxu1  ;;  %v1565_v21 = vadd.f32 %v1526_v1, %v1426_v49 }
 0x226   : > { %v1704_v44 = vadd.f32 %v4321_v6, %v1566_v36  ;;  %v2181_v36 = vld [vmem:[#allocation13 + $0x160] sm:$0xff] }
 0x227   : > { %v1664_v15 = vpop.f32.mrf.mxu1 }
 0x228   : > { %v4280_v3 = vpop.f32.mrf.mxu0  ;;  %v1703_v11 = vadd.f32 %v1664_v15, %v1565_v21 }
 0x229   : > { %v4324_v4 = vpop.f32.mrf.mxu1  ;;  %v1568_v12 = vadd.f32 %v4280_v3, %v1429_v31 }
 0x22a   : > { %v1536_v7 = vpop.f32.mrf.mxu0 }
 0x22b   : > { %v1674_v34 = vpop.f32.mrf.mxu1  ;;  %v1567_v26 = vadd.f32 %v1536_v7, %v1428_v40  ;;  %v1706_v57 = vadd.f32 %v4324_v4, %v1568_v12 }
 0x22c   : > { %v4283_v22 = vpop.f32.mrf.mxu0 }
 0x22d   : > { %v4327_v41 = vpop.f32.mrf.mxu1  ;;  %v1570_v51 = vadd.f32 %v4283_v22, %v1431_v62  ;;  %v1705_v3 = vadd.f32 %v1674_v34, %v1567_v26  ;;  %v6259_v62 = vld [vmem:[#allocation28_spill] sm:$0xff] }
 0x22e   : > { %v1546_v20 = vpop.f32.mrf.mxu0 }
 0x22f   : > { %v1684_v53 = vpop.f32.mrf.mxu1  ;;  %v1569_v1 = vadd.f32 %v1546_v20, %v1430_v18  ;;  %v1708_v14 = vadd.f32 %v4327_v41, %v1570_v51  ;;  %v2318_v18 = vld [vmem:[#allocation13 + $0x1d8] sm:$0xff] }
 0x230   : > { %v4286_v42 = vpop.f32.mrf.mxu0 }
 0x231   : > { %v4330_v15 = vpop.f32.mrf.mxu1  ;;  %v1572_v23 = vadd.f32 %v4286_v42, %v1433_v0  ;;  %v1707_v33 = vadd.f32 %v1684_v53, %v1569_v1  ;;  %v2178_v53 = vld [vmem:[#allocation13 + $0x148] sm:$0xff]  ;;  %v2314_v0 = vld [vmem:[#allocation13 + $0x1b8] sm:$0xff]  ;;  %v2175_v1 = vld [vmem:[#allocation13 + $0x130] sm:$0xff] }
 0x232   : > { %v1556_v59 = vpop.f32.mrf.mxu0 }
 0x233   : > { %v1571_v5 = vadd.f32 %v1556_v59, %v1432_v13  ;;  %v1694_v45 = vpop.f32.mrf.mxu1  ;;  %v1710_v63 = vadd.f32 %v4330_v15, %v1572_v23  ;;  %v2172_v13 = vld [vmem:[#allocation13 + $0x118] sm:$0xff]  ;;  %v2171_v15 = vld [vmem:[#allocation13 + $0x110] sm:$0xff]  ;;  %v2170_v23 = vld [vmem:[#allocation13 + $0x108] sm:$0xff] }
 0x235   : > { %v1709_v17 = vadd.f32 %v1694_v45, %v1571_v5  ;;  %v2459_v45 = vld [vmem:[#allocation13 + $0x270] sm:$0xff] }
 0x244   : > { %v4365_v19 = vpop.f32.mrf.mxu0 }
 0x245   : > { %v1842_v27 = vadd.f32 %v4365_v19, %v1704_v44  ;;  %v2321_v44 = vld [vmem:[#allocation13 + $0x1f0] sm:$0xff] }
 0x246   : > { %v1802_v55 = vpop.f32.mrf.mxu0 }
 0x247   : > { %v1857_v61 = vadd.f32 %v5781_v47, %v1842_v27  ;;  %v1841_v60 = vadd.f32 %v1802_v55, %v1703_v11  ;;  %v2179_v27 = vld [vmem:[#allocation13 + $0x150] sm:$0xff]  ;;  %v2316_v55 = vld [vmem:[#allocation13 + $0x1c8] sm:$0xff] }
 0x248   : > { %v4368_v2 = vpop.f32.mrf.mxu0 }
 0x249   : > { %v5786_v6 = vmax.f32 %v1857_v61, 0.0  ;;  %v1856_v7 = vadd.f32 %v5781_v47, %v1841_v60  ;;  %v1844_v10 = vadd.f32 %v4368_v2, %v1706_v57  ;;  %v2177_v61 = vld [vmem:[#allocation13 + $0x140] sm:$0xff]  ;;  %v2313_v2 = vld [vmem:[#allocation13 + $0x1b0] sm:$0xff] }
 0x24a   : > { %v1812_v22 = vpop.f32.mrf.mxu0  ;;  %v2315_v60 = vld [vmem:[#allocation13 + $0x1c0] sm:$0xff] }
 0x24b   : > { %1894 = vst [vmem:[#allocation3 + $0x21] sm:$0xff] %v5786_v6  ;;  %v5791_v4 = vmax.f32 %v1856_v7, 0.0  ;;  %v1859_v28 = vadd.f32 %v5781_v47, %v1844_v10  ;;  %v1843_v20 = vadd.f32 %v1812_v22, %v1705_v3  ;;  %v2174_v3 = vld [vmem:[#allocation13 + $0x128] sm:$0xff]  ;;  %v2173_v10 = vld [vmem:[#allocation13 + $0x120] sm:$0xff]  ;;  %v2309_v22 = vld [vmem:[#allocation13 + $0x190] sm:$0xff] }
 0x24c   : > { %v4371_v24 = vpop.f32.mrf.mxu0  ;;  %v2312_v7 = vld [vmem:[#allocation13 + $0x1a8] sm:$0xff] }
 0x24d   : > { %1893 = vst [vmem:[#allocation3 + $0x11] sm:$0xff] %v5791_v4  ;;  %v5795_v43 = vmax.f32 %v1859_v28, 0.0  ;;  %v1858_v29 = vadd.f32 %v5781_v47, %v1843_v20  ;;  %v1846_v37 = vadd.f32 %v4371_v24, %v1708_v14  ;;  %4408 = vmatmul.mubr.f32.vlgmr.msra.gmra.mxu1 %v5791_v4  ;;  %v2310_v14 = vld [vmem:[#allocation13 + $0x198] sm:$0xff]  ;;  %v2308_v28 = vld [vmem:[#allocation13 + $0x188] sm:$0xff]  ;;  %v2169_v20 = vld [vmem:[#allocation13 + $0x100] sm:$0xff] }
 0x24e   : > { %v1822_v9 = vpop.f32.mrf.mxu0  ;;  %4464 = vmatpush3.msra.mxu1 %v6258_v32  ;;  %4410 = vmatprep.mubr.f32.mxu1 %v5786_v6  ;;  %v2160_v24 = vld [vmem:[#allocation3 + $0x2] sm:$0xff] }
 0x24f   : > { %1896 = vst [vmem:[#allocation3 + $0x41] sm:$0xff] %v5795_v43  ;;  %v5802_v34 = vmax.f32 %v1858_v29, 0.0  ;;  %v1861_v42 = vadd.f32 %v5781_v47, %v1846_v37  ;;  %v1845_v49 = vadd.f32 %v1822_v9, %v1707_v33  ;;  %4465 = vmatprep.subr.mxu1 %v2183_v35  ;;  %v2307_v33 = vld [vmem:[#allocation13 + $0x180] sm:$0xff]  ;;  %v2598_v29 = vld [vmem:[#allocation13 + $0x2f8] sm:$0xff]  ;;  %v2597_v9 = vld [vmem:[#allocation13 + $0x2f0] sm:$0xff] }
 0x250   : > { %v4374_v52 = vpop.f32.mrf.mxu0  ;;  %4466 = vmatpush3.msra.mxu1 %v2183_v35  ;;  %v2460_v35 = vld [vmem:[#allocation13 + $0x278] sm:$0xff]  ;;  %v2458_v32 = vld [vmem:[#allocation13 + $0x268] sm:$0xff] }
 0x251   : > { %1895 = vst [vmem:[#allocation3 + $0x31] sm:$0xff] %v5802_v34  ;;  %v5806_v46 = vmax.f32 %v1861_v42, 0.0  ;;  %v1860_v16 = vadd.f32 %v5781_v47, %v1845_v49  ;;  %v1848_v31 = vadd.f32 %v4374_v52, %v1710_v63  ;;  %4467 = vmatprep.subr.mxu1 %v2182_v39  ;;  %4411 = vmatmul.mubr.f32.gmra.mxu1 %v5802_v34  ;;  %v2596_v63 = vld [vmem:[#allocation13 + $0x2e8] sm:$0xff]  ;;  %v2457_v49 = vld [vmem:[#allocation13 + $0x260] sm:$0xff] }
 0x252   : > { %v1832_v21 = vpop.f32.mrf.mxu0  ;;  %4468 = vmatpush3.msra.mxu1 %v2182_v39  ;;  %4413 = vmatprep.mubr.f32.mxu1 %v5795_v43  ;;  %v5819_v38 = vld [vmem:[#allocation3 + $0x20] sm:$0xff] }
 0x253   : > { %1898 = vst [vmem:[#allocation3 + $0x61] sm:$0xff] %v5806_v46  ;;  %v5812_v54 = vmax.f32 %v1860_v16, 0.0  ;;  %v1863_v41 = vadd.f32 %v5781_v47, %v1848_v31  ;;  %v1847_v59 = vadd.f32 %v1832_v21, %v1709_v17  ;;  %4469 = vmatprep.subr.mxu1 %v2181_v36  ;;  %v5849_v37 = vld [vmem:[#allocation3 + $0x22] sm:$0xff]  ;;  %v2594_v16 = vld [vmem:[#allocation13 + $0x2d8] sm:$0xff]  ;;  %v2455_v21 = vld [vmem:[#allocation13 + $0x250] sm:$0xff] }
 0x254   : > { %v1902_v40 = vld [vmem:[#allocation3 + $0x10] sm:$0xff]  ;;  %4470 = vmatpush3.msra.mxu1 %v2181_v36  ;;  %v2595_v52 = vld [vmem:[#allocation13 + $0x2e0] sm:$0xff]  ;;  %v2456_v36 = vld [vmem:[#allocation13 + $0x258] sm:$0xff] }
 0x255   : > { %1897 = vst [vmem:[#allocation3 + $0x51] sm:$0xff] %v5812_v54  ;;  %v5816_v12 = vmax.f32 %v1863_v41, 0.0  ;;  %v1862_v8 = vadd.f32 %v5781_v47, %v1847_v59  ;;  %4452 = vmatmul.mubr.f32.vlgmr.msra.gmra.mxu0 %v1902_v40  ;;  %4471 = vmatprep.subr.mxu1 %v2180_v56  ;;  %v2319_v47 = vld [vmem:[#allocation13 + $0x1e0] sm:$0xff]  ;;  %v5845_v5 = vld [vmem:[#allocation3 + $0x12] sm:$0xff]  ;;  %v2454_v41 = vld [vmem:[#allocation13 + $0x248] sm:$0xff] }
 0x256   : > { %4508 = vmatpush3.msra.mxu0 %v6259_v62  ;;  %4454 = vmatprep.mubr.f32.mxu0 %v5819_v38  ;;  %v5831_v26 = vld [vmem:[#allocation3 + $0x40] sm:$0xff] }
 0x257   : > { %1900 = vst [vmem:[#allocation3 + $0x81] sm:$0xff] %v5816_v12  ;;  %v5824_v19 = vmax.f32 %v1862_v8, 0.0  ;;  %4509 = vmatprep.subr.mxu0 %v2321_v44  ;;  %4414 = vmatmul.mubr.f32.gmra.mxu1 %v5812_v54  ;;  %v5857_v42 = vld [vmem:[#allocation3 + $0x42] sm:$0xff] }
 0x258   : > { %4510 = vmatpush3.msra.mxu0 %v2321_v44  ;;  %v5827_v11 = vld [vmem:[#allocation3 + $0x30] sm:$0xff]  ;;  %4472 = vmatpush3.msra.mxu1 %v2180_v56  ;;  %v2453_v8 = vld [vmem:[#allocation13 + $0x240] sm:$0xff] }
 0x259   : > { %1899 = vst [vmem:[#allocation3 + $0x71] sm:$0xff] %v5824_v19  ;;  %4511 = vmatprep.subr.mxu0 %v2320_v30  ;;  %4455 = vmatmul.mubr.f32.gmra.mxu0 %v5827_v11  ;;  %v5853_v39 = vld [vmem:[#allocation3 + $0x32] sm:$0xff]  ;;  %v2591_v62 = vld [vmem:[#allocation13 + $0x2c0] sm:$0xff] }
 0x25a   : > { %4512 = vmatpush3.msra.mxu0 %v2320_v30  ;;  %4457 = vmatprep.mubr.f32.mxu0 %v5831_v26  ;;  %v5838_v51 = vld [vmem:[#allocation3 + $0x60] sm:$0xff]  ;;  %v2593_v56 = vld [vmem:[#allocation13 + $0x2d0] sm:$0xff]  ;;  %v2452_v30 = vld [vmem:[#allocation13 + $0x238] sm:$0xff] }
 0x25b   : > { %4513 = vmatprep.subr.mxu0 %v2319_v47  ;;  %4416 = vmatprep.mubr.f32.mxu1 %v5806_v46  ;;  %v5865_v31 = vld [vmem:[#allocation3 + $0x62] sm:$0xff] }
 0x25c   : > { %4514 = vmatpush3.msra.mxu0 %v2319_v47  ;;  %v5835_v48 = vld [vmem:[#allocation3 + $0x50] sm:$0xff]  ;;  %4473 = vmatprep.subr.mxu1 %v2179_v27  ;;  %v2590_v47 = vld [vmem:[#allocation13 + $0x2b8] sm:$0xff] }
 0x25d   : > { %4515 = vmatprep.subr.mxu0 %v2318_v18  ;;  %4458 = vmatmul.mubr.f32.gmra.mxu0 %v5835_v48  ;;  %v5861_v17 = vld [vmem:[#allocation3 + $0x52] sm:$0xff] }
 0x25e   : > { %4516 = vmatpush3.msra.mxu0 %v2318_v18  ;;  %4460 = vmatprep.mubr.f32.mxu0 %v5838_v51  ;;  %v5872_v44 = vld [vmem:[#allocation3 + $0x80] sm:$0xff]  ;;  %v2589_v18 = vld [vmem:[#allocation13 + $0x2b0] sm:$0xff] }
 0x25f   : > { %4517 = vmatprep.subr.mxu0 %v2317_v50  ;;  %4474 = vmatpush3.msra.mxu1 %v2179_v27  ;;  %v2451_v27 = vld [vmem:[#allocation13 + $0x230] sm:$0xff] }
 0x260   : > { %4518 = vmatpush3.msra.mxu0 %v2317_v50  ;;  %4475 = vmatprep.subr.mxu1 %v2178_v53  ;;  %v5841_v57 = vld [vmem:[#allocation3 + $0x70] sm:$0xff]  ;;  %v2450_v50 = vld [vmem:[#allocation13 + $0x228] sm:$0xff] }
 0x261   : > { %4519 = vmatprep.subr.mxu0 %v2316_v55  ;;  %4417 = vmatmul.mubr.f32.gmra.mxu1 %v5824_v19  ;;  %v5869_v59 = vld [vmem:[#allocation3 + $0x72] sm:$0xff] }
 0x262   : > { %4461 = vmatmul.mubr.f32.gmra.mxu0 %v5841_v57  ;;  %4476 = vmatpush3.msra.mxu1 %v2178_v53  ;;  %v2588_v53 = vld [vmem:[#allocation13 + $0x2a8] sm:$0xff] }
 0x263   : > { %4520 = vmatpush3.msra.mxu0 %v2316_v55  ;;  %4477 = vmatprep.subr.mxu1 %v2177_v61  ;;  %v2587_v55 = vld [vmem:[#allocation13 + $0x2a0] sm:$0xff] }
 0x264   : > { %4521 = vmatprep.subr.mxu0 %v2315_v60  ;;  %4539 = vmatprep.mubr.f32.mxu0 %v1902_v40  ;;  %v2592_v40 = vld [vmem:[#allocation13 + $0x2c8] sm:$0xff] }
 0x265   : > { %4478 = vmatpush3.msra.mxu1 %v2177_v61  ;;  %4522 = vmatpush3.msra.mxu0 %v2315_v60  ;;  %v2448_v61 = vld [vmem:[#allocation13 + $0x218] sm:$0xff] }
 0x266   : > { %4479 = vmatprep.subr.mxu1 %v2176_v58  ;;  %4523 = vmatprep.subr.mxu0 %v2314_v0  ;;  %v2586_v60 = vld [vmem:[#allocation13 + $0x298] sm:$0xff] }
 0x267   : > { %4480 = vmatpush3.msra.mxu1 %v2176_v58  ;;  %4524 = vmatpush3.msra.mxu0 %v2314_v0  ;;  %v2447_v58 = vld [vmem:[#allocation13 + $0x210] sm:$0xff] }
 0x268   : > { %4481 = vmatprep.subr.mxu1 %v2175_v1  ;;  %4525 = vmatprep.subr.mxu0 %v2313_v2  ;;  %v2585_v0 = vld [vmem:[#allocation13 + $0x290] sm:$0xff] }
 0x269   : > { %4482 = vmatpush3.msra.mxu1 %v2175_v1  ;;  %4526 = vmatpush3.msra.mxu0 %v2313_v2  ;;  %v2446_v1 = vld [vmem:[#allocation13 + $0x208] sm:$0xff] }
 0x26a   : > { %4483 = vmatprep.subr.mxu1 %v2174_v3  ;;  %4527 = vmatprep.subr.mxu0 %v2312_v7  ;;  %v2584_v2 = vld [vmem:[#allocation13 + $0x288] sm:$0xff] }
 0x26b   : > { %4484 = vmatpush3.msra.mxu1 %v2174_v3  ;;  %4528 = vmatpush3.msra.mxu0 %v2312_v7  ;;  %v2445_v3 = vld [vmem:[#allocation13 + $0x200] sm:$0xff] }
 0x26c   : > { %4485 = vmatprep.subr.mxu1 %v2173_v10  ;;  %4529 = vmatprep.subr.mxu0 %v2311_v25  ;;  %v2583_v7 = vld [vmem:[#allocation13 + $0x280] sm:$0xff] }
 0x26d   : > { %4486 = vmatpush3.msra.mxu1 %v2173_v10  ;;  %4530 = vmatpush3.msra.mxu0 %v2311_v25  ;;  %v2737_v10 = vld [vmem:[#allocation13 + $0x378] sm:$0xff] }
 0x26e   : > { %4487 = vmatprep.subr.mxu1 %v2172_v13  ;;  %4531 = vmatprep.subr.mxu0 %v2310_v14  ;;  %v2875_v25 = vld [vmem:[#allocation13 + $0x3f8] sm:$0xff] }
 0x26f   : > { %4488 = vmatpush3.msra.mxu1 %v2172_v13  ;;  %4532 = vmatpush3.msra.mxu0 %v2310_v14  ;;  %v2736_v13 = vld [vmem:[#allocation13 + $0x370] sm:$0xff] }
 0x270   : > { %4489 = vmatprep.subr.mxu1 %v2171_v15  ;;  %4533 = vmatprep.subr.mxu0 %v2309_v22  ;;  %v2874_v14 = vld [vmem:[#allocation13 + $0x3f0] sm:$0xff] }
 0x271   : > { %4490 = vmatpush3.msra.mxu1 %v2171_v15  ;;  %4534 = vmatpush3.msra.mxu0 %v2309_v22  ;;  %v2735_v15 = vld [vmem:[#allocation13 + $0x368] sm:$0xff] }
 0x272   : > { %4491 = vmatprep.subr.mxu1 %v2170_v23  ;;  %4535 = vmatprep.subr.mxu0 %v2308_v28  ;;  %v2873_v22 = vld [vmem:[#allocation13 + $0x3e8] sm:$0xff] }
 0x273   : > { %4492 = vmatpush3.msra.mxu1 %v2170_v23  ;;  %4536 = vmatpush3.msra.mxu0 %v2308_v28  ;;  %v2734_v23 = vld [vmem:[#allocation13 + $0x360] sm:$0xff] }
 0x274   : > { %4493 = vmatprep.subr.mxu1 %v2169_v20  ;;  %4537 = vmatprep.subr.mxu0 %v2307_v33  ;;  %v2872_v28 = vld [vmem:[#allocation13 + $0x3e0] sm:$0xff] }
 0x275   : > { %4494 = vmatpush3.msra.mxu1 %v2169_v20  ;;  %4495 = vmatprep.mubr.f32.mxu1 %v2160_v24  ;;  %v2733_v20 = vld [vmem:[#allocation13 + $0x358] sm:$0xff]  ;;  %v2732_v24 = vld [vmem:[#allocation13 + $0x350] sm:$0xff] }
 0x276   : > { %4538 = vmatpush3.msra.mxu0 %v2307_v33  ;;  %4496 = vmatmul.mubr.f32.vlgmr.msra.gmra.mxu1 %v5845_v5  ;;  %v2871_v33 = vld [vmem:[#allocation13 + $0x3d8] sm:$0xff] }
 0x277   : > { %4540 = vmatmul.mubr.f32.vlgmr.msra.gmra.mxu0 %v5819_v38  ;;  %4551 = vmatprep.subr.mxu1 %v2460_v35 }
 0x278   : > { %4595 = vmatprep.subr.mxu0 %v2598_v29  ;;  %4498 = vmatprep.mubr.f32.mxu1 %v5849_v37 }
 0x279   : > { %4542 = vmatprep.mubr.f32.mxu0 %v5827_v11  ;;  %4552 = vmatpush3.msra.mxu1 %v2460_v35  ;;  %v2870_v35 = vld [vmem:[#allocation13 + $0x3d0] sm:$0xff] }
 0x27a   : > { %4596 = vmatpush3.msra.mxu0 %v2598_v29  ;;  %4553 = vmatprep.subr.mxu1 %v2459_v45  ;;  %v2869_v29 = vld [vmem:[#allocation13 + $0x3c8] sm:$0xff] }
 0x27b   : > { %4597 = vmatprep.subr.mxu0 %v2597_v9  ;;  %4554 = vmatpush3.msra.mxu1 %v2459_v45  ;;  %v5890_v45 = vld [vmem:[#allocation3 + $0x82] sm:$0xff] }
 0x27c   : > { %4598 = vmatpush3.msra.mxu0 %v2597_v9  ;;  %4499 = vmatmul.mubr.f32.gmra.mxu1 %v5853_v39  ;;  %v2730_v9 = vld [vmem:[#allocation13 + $0x340] sm:$0xff] }
 0x27d   : > { %4543 = vmatmul.mubr.f32.gmra.mxu0 %v5831_v26  ;;  %4555 = vmatprep.subr.mxu1 %v2458_v32 }
 0x27e   : > { %4599 = vmatprep.subr.mxu0 %v2596_v63  ;;  %4501 = vmatprep.mubr.f32.mxu1 %v5857_v42 }
 0x27f   : > { %4545 = vmatprep.mubr.f32.mxu0 %v5835_v48  ;;  %4556 = vmatpush3.msra.mxu1 %v2458_v32  ;;  %v2868_v32 = vld [vmem:[#allocation13 + $0x3c0] sm:$0xff] }
 0x280   : > { %4600 = vmatpush3.msra.mxu0 %v2596_v63  ;;  %4557 = vmatprep.subr.mxu1 %v2457_v49  ;;  %v2729_v63 = vld [vmem:[#allocation13 + $0x338] sm:$0xff] }
 0x281   : > { %4601 = vmatprep.subr.mxu0 %v2595_v52  ;;  %4558 = vmatpush3.msra.mxu1 %v2457_v49  ;;  %v2867_v49 = vld [vmem:[#allocation13 + $0x3b8] sm:$0xff] }
 0x282   : > { %4602 = vmatpush3.msra.mxu0 %v2595_v52  ;;  %4502 = vmatmul.mubr.f32.gmra.mxu1 %v5861_v17  ;;  %v2728_v52 = vld [vmem:[#allocation13 + $0x330] sm:$0xff] }
 0x283   : > { %4546 = vmatmul.mubr.f32.gmra.mxu0 %v5838_v51  ;;  %4559 = vmatprep.subr.mxu1 %v2456_v36 }
 0x284   : > { %4603 = vmatprep.subr.mxu0 %v2594_v16  ;;  %4504 = vmatprep.mubr.f32.mxu1 %v5865_v31 }
 0x285   : > { %4548 = vmatprep.mubr.f32.mxu0 %v5841_v57  ;;  %4560 = vmatpush3.msra.mxu1 %v2456_v36  ;;  %v2866_v36 = vld [vmem:[#allocation13 + $0x3b0] sm:$0xff] }
 0x286   : > { %4604 = vmatpush3.msra.mxu0 %v2594_v16  ;;  %4561 = vmatprep.subr.mxu1 %v2455_v21  ;;  %v2727_v16 = vld [vmem:[#allocation13 + $0x328] sm:$0xff] }
 0x287   : > { %4605 = vmatprep.subr.mxu0 %v2593_v56  ;;  %4562 = vmatpush3.msra.mxu1 %v2455_v21  ;;  %v2865_v21 = vld [vmem:[#allocation13 + $0x3a8] sm:$0xff] }
 0x288   : > { %4606 = vmatpush3.msra.mxu0 %v2593_v56  ;;  %4505 = vmatmul.mubr.f32.gmra.mxu1 %v5869_v59  ;;  %v2725_v56 = vld [vmem:[#allocation13 + $0x318] sm:$0xff] }
 0x289   : > { %4549 = vmatmul.mubr.f32.gmra.mxu0 %v5872_v44  ;;  %4563 = vmatprep.subr.mxu1 %v2454_v41 }
 0x28a   : > { %4607 = vmatprep.subr.mxu0 %v2592_v40  ;;  %4564 = vmatpush3.msra.mxu1 %v2454_v41  ;;  %v2863_v41 = vld [vmem:[#allocation13 + $0x398] sm:$0xff] }
 0x28b   : > { %4583 = vmatprep.mubr.f32.mxu1 %v5791_v4  ;;  %4608 = vmatpush3.msra.mxu0 %v2592_v40  ;;  %v2449_v4 = vld [vmem:[#allocation13 + $0x220] sm:$0xff]  ;;  %v2724_v40 = vld [vmem:[#allocation13 + $0x310] sm:$0xff] }
 0x28c   : > { %4627 = vmatprep.mubr.f32.mxu0 %v5845_v5  ;;  %4565 = vmatprep.subr.mxu1 %v2453_v8  ;;  %v2731_v5 = vld [vmem:[#allocation13 + $0x348] sm:$0xff] }
 0x28d   : > { %4609 = vmatprep.subr.mxu0 %v2591_v62  ;;  %4566 = vmatpush3.msra.mxu1 %v2453_v8  ;;  %v2862_v8 = vld [vmem:[#allocation13 + $0x390] sm:$0xff] }
 0x28e   : > { %4610 = vmatpush3.msra.mxu0 %v2591_v62  ;;  %4567 = vmatprep.subr.mxu1 %v2452_v30  ;;  %v2723_v62 = vld [vmem:[#allocation13 + $0x308] sm:$0xff] }
 0x28f   : > { %4611 = vmatprep.subr.mxu0 %v2590_v47  ;;  %4568 = vmatpush3.msra.mxu1 %v2452_v30  ;;  %v2861_v30 = vld [vmem:[#allocation13 + $0x388] sm:$0xff] }
 0x290   : > { %4612 = vmatpush3.msra.mxu0 %v2590_v47  ;;  %4569 = vmatprep.subr.mxu1 %v2451_v27  ;;  %v2722_v47 = vld [vmem:[#allocation13 + $0x300] sm:$0xff] }
 0x291   : > { %4613 = vmatprep.subr.mxu0 %v2589_v18  ;;  %4570 = vmatpush3.msra.mxu1 %v2451_v27  ;;  %v2860_v27 = vld [vmem:[#allocation13 + $0x380] sm:$0xff] }
 0x292   : > { %4614 = vmatpush3.msra.mxu0 %v2589_v18  ;;  %4571 = vmatprep.subr.mxu1 %v2450_v50  ;;  %v3013_v18 = vld [vmem:[#allocation13 + $0x478] sm:$0xff] }
 0x293   : > { %4615 = vmatprep.subr.mxu0 %v2588_v53  ;;  %4572 = vmatpush3.msra.mxu1 %v2450_v50  ;;  %v5896_v50 = vld [vmem:[#allocation15 + $0x78] sm:$0xff] }
 0x294   : > { %4616 = vmatpush3.msra.mxu0 %v2588_v53  ;;  %4573 = vmatprep.subr.mxu1 %v2449_v4  ;;  %v3012_v53 = vld [vmem:[#allocation13 + $0x470] sm:$0xff] }
 0x295   : > { %4617 = vmatprep.subr.mxu0 %v2587_v55  ;;  %4574 = vmatpush3.msra.mxu1 %v2449_v4  ;;  %v3011_v4 = vld [vmem:[#allocation13 + $0x468] sm:$0xff] }
 0x296   : > { %4618 = vmatpush3.msra.mxu0 %v2587_v55  ;;  %4575 = vmatprep.subr.mxu1 %v2448_v61  ;;  %v3005_v55 = vld [vmem:[#allocation13 + $0x438] sm:$0xff] }
 0x297   : > { %4619 = vmatprep.subr.mxu0 %v2586_v60  ;;  %4576 = vmatpush3.msra.mxu1 %v2448_v61  ;;  %v5930_v61 = vld [vmem:[#allocation15 + $0x48] sm:$0xff] }
 0x298   : > { %4620 = vmatpush3.msra.mxu0 %v2586_v60  ;;  %4577 = vmatprep.subr.mxu1 %v2447_v58  ;;  %v3004_v60 = vld [vmem:[#allocation13 + $0x430] sm:$0xff] }
 0x299   : > { %4621 = vmatprep.subr.mxu0 %v2585_v0  ;;  %4578 = vmatpush3.msra.mxu1 %v2447_v58  ;;  %v5934_v58 = vld [vmem:[#allocation15 + $0x40] sm:$0xff] }
 0x29a   : > { %4622 = vmatpush3.msra.mxu0 %v2585_v0  ;;  %4579 = vmatprep.subr.mxu1 %v2446_v1  ;;  %v5938_v0 = vld [vmem:[#allocation15 + $0x38] sm:$0xff] }
 0x29b   : > { %4623 = vmatprep.subr.mxu0 %v2584_v2  ;;  %4580 = vmatpush3.msra.mxu1 %v2446_v1  ;;  %v3002_v1 = vld [vmem:[#allocation13 + $0x420] sm:$0xff] }
 0x29c   : > { %4624 = vmatpush3.msra.mxu0 %v2584_v2  ;;  %4581 = vmatprep.subr.mxu1 %v2445_v3  ;;  %v5942_v2 = vld [vmem:[#allocation15 + $0x30] sm:$0xff] }
 0x29d   : > { %4625 = vmatprep.subr.mxu0 %v2583_v7  ;;  %4582 = vmatpush3.msra.mxu1 %v2445_v3  ;;  %v3001_v3 = vld [vmem:[#allocation13 + $0x418] sm:$0xff] }
 0x29e   : > { %4626 = vmatpush3.msra.mxu0 %v2583_v7  ;;  %4584 = vmatmul.mubr.f32.vlgmr.msra.gmra.mxu1 %v5786_v6  ;;  %v5946_v7 = vld [vmem:[#allocation15 + $0x28] sm:$0xff] }
 0x29f   : > { %4628 = vmatmul.mubr.f32.vlgmr.msra.gmra.mxu0 %v5849_v37  ;;  %4639 = vmatprep.subr.mxu1 %v2737_v10 }
 0x2a0   : > { %4683 = vmatprep.subr.mxu0 %v2875_v25  ;;  %4586 = vmatprep.mubr.f32.mxu1 %v5802_v34 }
 0x2a1   : > { %4630 = vmatprep.mubr.f32.mxu0 %v5853_v39  ;;  %4640 = vmatpush3.msra.mxu1 %v2737_v10  ;;  %v3000_v10 = vld [vmem:[#allocation13 + $0x410] sm:$0xff] }
 0x2a2   : > { %4684 = vmatpush3.msra.mxu0 %v2875_v25  ;;  %4641 = vmatprep.subr.mxu1 %v2736_v13  ;;  %v5950_v25 = vld [vmem:[#allocation15 + $0x20] sm:$0xff] }
 0x2a3   : > { %4685 = vmatprep.subr.mxu0 %v2874_v14  ;;  %4642 = vmatpush3.msra.mxu1 %v2736_v13  ;;  %v2999_v13 = vld [vmem:[#allocation13 + $0x408] sm:$0xff] }
 0x2a4   : > { %4686 = vmatpush3.msra.mxu0 %v2874_v14  ;;  %4587 = vmatmul.mubr.f32.gmra.mxu1 %v5795_v43  ;;  %v5954_v14 = vld [vmem:[#allocation15 + $0x18] sm:$0xff] }
 0x2a5   : > { %4631 = vmatmul.mubr.f32.gmra.mxu0 %v5857_v42  ;;  %4643 = vmatprep.subr.mxu1 %v2735_v15 }
 0x2a6   : > { %4687 = vmatprep.subr.mxu0 %v2873_v22  ;;  %4589 = vmatprep.mubr.f32.mxu1 %v5812_v54 }
 0x2a7   : > { %4633 = vmatprep.mubr.f32.mxu0 %v5861_v17  ;;  %4644 = vmatpush3.msra.mxu1 %v2735_v15  ;;  %v2998_v15 = vld [vmem:[#allocation13 + $0x400] sm:$0xff] }
 0x2a8   : > { %4688 = vmatpush3.msra.mxu0 %v2873_v22  ;;  %4645 = vmatprep.subr.mxu1 %v2734_v23  ;;  %v3152_v22 = vld [vmem:[#allocation15 + $0x10] sm:$0xff] }
 0x2a9   : > { %4689 = vmatprep.subr.mxu0 %v2872_v28  ;;  %4646 = vmatpush3.msra.mxu1 %v2734_v23  ;;  %v3151_v23 = vld [vmem:[#allocation15 + $0x8] sm:$0xff] }
 0x2aa   : > { %4690 = vmatpush3.msra.mxu0 %v2872_v28  ;;  %4590 = vmatmul.mubr.f32.gmra.mxu1 %v5806_v46  ;;  %v3150_v28 = vld [vmem:[#allocation15] sm:$0xff] }
 0x2ab   : > { %4634 = vmatmul.mubr.f32.gmra.mxu0 %v5865_v31  ;;  %4647 = vmatprep.subr.mxu1 %v2733_v20 }
 0x2ac   : > { %4691 = vmatprep.subr.mxu0 %v2871_v33  ;;  %4592 = vmatprep.mubr.f32.mxu1 %v5824_v19 }
 0x2ad   : > { %4636 = vmatprep.mubr.f32.mxu0 %v5869_v59  ;;  %4648 = vmatpush3.msra.mxu1 %v2733_v20  ;;  %v4946_v20 = vld [vmem:[#allocation2 + $0x11] sm:$0xff] }
 0x2ae   : > { %4692 = vmatpush3.msra.mxu0 %v2871_v33  ;;  %4649 = vmatprep.subr.mxu1 %v2732_v24  ;;  %v4949_v33 = vld [vmem:[#allocation2 + $0x41] sm:$0xff] }
 0x2af   : > { %4693 = vmatprep.subr.mxu0 %v2870_v35  ;;  %4650 = vmatpush3.msra.mxu1 %v2732_v24  ;;  %v4951_v24 = vld [vmem:[#allocation2 + $0x61] sm:$0xff] }
 0x2b0   : > { %4694 = vmatpush3.msra.mxu0 %v2870_v35  ;;  %4593 = vmatmul.mubr.f32.gmra.mxu1 %v5816_v12 }
 0x2b1   : > { %4637 = vmatmul.mubr.f32.gmra.mxu0 %v5890_v45  ;;  %4651 = vmatprep.subr.mxu1 %v2731_v5 }
 0x2b2   : > { %4695 = vmatprep.subr.mxu0 %v2869_v29  ;;  %4652 = vmatpush3.msra.mxu1 %v2731_v5  ;;  %v4952_v5 = vld [vmem:[#allocation2 + $0x71] sm:$0xff] }
 0x2b3   : > { %4671 = vmatprep.mubr.f32.mxu1 %v5819_v38  ;;  %4696 = vmatpush3.msra.mxu0 %v2869_v29  ;;  %v2726_v38 = vld [vmem:[#allocation13 + $0x320] sm:$0xff] }
 0x2b4   : > { %4715 = vmatprep.mubr.f32.mxu0 %v5786_v6  ;;  %4653 = vmatprep.subr.mxu1 %v2730_v9  ;;  %v2864_v6 = vld [vmem:[#allocation13 + $0x3a0] sm:$0xff] }
 0x2b5   : > { %4697 = vmatprep.subr.mxu0 %v2868_v32  ;;  %4654 = vmatpush3.msra.mxu1 %v2730_v9 }
 0x2b6   : > { %4698 = vmatpush3.msra.mxu0 %v2868_v32  ;;  %4655 = vmatprep.subr.mxu1 %v2729_v63 }
 0x2b7   : > { %4699 = vmatprep.subr.mxu0 %v2867_v49  ;;  %4656 = vmatpush3.msra.mxu1 %v2729_v63 }
 0x2b8   : > { %4700 = vmatpush3.msra.mxu0 %v2867_v49  ;;  %4657 = vmatprep.subr.mxu1 %v2728_v52 }
 0x2b9   : > { %4701 = vmatprep.subr.mxu0 %v2866_v36  ;;  %4658 = vmatpush3.msra.mxu1 %v2728_v52 }
 0x2ba   : > { %4702 = vmatpush3.msra.mxu0 %v2866_v36  ;;  %4659 = vmatprep.subr.mxu1 %v2727_v16 }
 0x2bb   : > { %4703 = vmatprep.subr.mxu0 %v2865_v21  ;;  %4660 = vmatpush3.msra.mxu1 %v2727_v16 }
 0x2bc   : > { %4704 = vmatpush3.msra.mxu0 %v2865_v21  ;;  %4661 = vmatprep.subr.mxu1 %v2726_v38 }
 0x2bd   : > { %4705 = vmatprep.subr.mxu0 %v2864_v6  ;;  %4662 = vmatpush3.msra.mxu1 %v2726_v38 }
 0x2be   : > { %4706 = vmatpush3.msra.mxu0 %v2864_v6  ;;  %4663 = vmatprep.subr.mxu1 %v2725_v56 }
 0x2bf   : > { %4707 = vmatprep.subr.mxu0 %v2863_v41  ;;  %4664 = vmatpush3.msra.mxu1 %v2725_v56 }
 0x2c0   : > { %4708 = vmatpush3.msra.mxu0 %v2863_v41  ;;  %4665 = vmatprep.subr.mxu1 %v2724_v40 }
 0x2c1   : > { %4709 = vmatprep.subr.mxu0 %v2862_v8  ;;  %4666 = vmatpush3.msra.mxu1 %v2724_v40 }
 0x2c2   : > { %4710 = vmatpush3.msra.mxu0 %v2862_v8  ;;  %4667 = vmatprep.subr.mxu1 %v2723_v62 }
 0x2c3   : > { %4711 = vmatprep.subr.mxu0 %v2861_v30  ;;  %4668 = vmatpush3.msra.mxu1 %v2723_v62 }
 0x2c4   : > { %4712 = vmatpush3.msra.mxu0 %v2861_v30  ;;  %4669 = vmatprep.subr.mxu1 %v2722_v47 }
 0x2c5   : > { %4713 = vmatprep.subr.mxu0 %v2860_v27  ;;  %4670 = vmatpush3.msra.mxu1 %v2722_v47 }
 0x2c6   : > { %4714 = vmatpush3.msra.mxu0 %v2860_v27  ;;  %4672 = vmatmul.mubr.f32.vlgmr.msra.gmra.mxu1 %v5827_v11  ;;  %v3010_v11 = vld [vmem:[#allocation13 + $0x460] sm:$0xff] }
 0x2c7   : > { %4716 = vmatmul.mubr.f32.vlgmr.msra.gmra.mxu0 %v5802_v34  ;;  %4727 = vmatprep.subr.mxu1 %v3013_v18  ;;  %v5905_v34 = vld [vmem:[#allocation15 + $0x70] sm:$0xff] }
 0x2c8   : > { %4674 = vmatprep.mubr.f32.mxu1 %v5831_v26  ;;  %4718 = vmatprep.mubr.f32.mxu0 %v5795_v43  ;;  %v3009_v43 = vld [vmem:[#allocation13 + $0x458] sm:$0xff]  ;;  %v5910_v26 = vld [vmem:[#allocation15 + $0x68] sm:$0xff] }
 0x2c9   : > { %4728 = vmatpush3.msra.mxu1 %v3013_v18  ;;  %4771 = vmatprep.subr.mxu0 %v5896_v50 }
 0x2ca   : > { %4729 = vmatprep.subr.mxu1 %v3012_v53  ;;  %4675 = vmatmul.mubr.f32.gmra.mxu1 %v5835_v48  ;;  %v3007_v48 = vld [vmem:[#allocation13 + $0x448] sm:$0xff] }
 0x2cb   : > { %4730 = vmatpush3.msra.mxu1 %v3012_v53  ;;  %4719 = vmatmul.mubr.f32.gmra.mxu0 %v5812_v54  ;;  %v3008_v54 = vld [vmem:[#allocation13 + $0x450] sm:$0xff] }
 0x2cc   : > { %4731 = vmatprep.subr.mxu1 %v3011_v4  ;;  %4677 = vmatprep.mubr.f32.mxu1 %v5838_v51  ;;  %v5921_v51 = vld [vmem:[#allocation15 + $0x58] sm:$0xff] }
 0x2cd   : > { %4721 = vmatprep.mubr.f32.mxu0 %v5806_v46  ;;  %4732 = vmatpush3.msra.mxu1 %v3011_v4  ;;  %v5917_v46 = vld [vmem:[#allocation15 + $0x60] sm:$0xff] }
 0x2ce   : > { %4772 = vmatpush3.msra.mxu0 %v5896_v50  ;;  %4733 = vmatprep.subr.mxu1 %v3010_v11 }
 0x2cf   : > { %4773 = vmatprep.subr.mxu0 %v5905_v34  ;;  %4734 = vmatpush3.msra.mxu1 %v3010_v11 }
 0x2d0   : > { %4774 = vmatpush3.msra.mxu0 %v5905_v34  ;;  %4678 = vmatmul.mubr.f32.gmra.mxu1 %v5841_v57  ;;  %v3006_v57 = vld [vmem:[#allocation13 + $0x440] sm:$0xff] }
 0x2d1   : > { %4722 = vmatmul.mubr.f32.gmra.mxu0 %v5824_v19  ;;  %4735 = vmatprep.subr.mxu1 %v3009_v43  ;;  %v4945_v19 = vld [vmem:[#allocation2] sm:$0xff] }
 0x2d2   : > { %4775 = vmatprep.subr.mxu0 %v5910_v26  ;;  %4680 = vmatprep.mubr.f32.mxu1 %v5872_v44  ;;  %v2858_v44 = vld [vmem:[#allocation3 + $0x91] sm:$0xff] }
 0x2d3   : > { %4724 = vmatprep.mubr.f32.mxu0 %v5816_v12  ;;  %4736 = vmatpush3.msra.mxu1 %v3009_v43  ;;  %v5926_v12 = vld [vmem:[#allocation15 + $0x50] sm:$0xff] }
 0x2d4   : > { %4776 = vmatpush3.msra.mxu0 %v5910_v26  ;;  %4737 = vmatprep.subr.mxu1 %v3008_v54 }
 0x2d5   : > { %4777 = vmatprep.subr.mxu0 %v5917_v46  ;;  %4738 = vmatpush3.msra.mxu1 %v3008_v54 }
 0x2d6   : > { %4778 = vmatpush3.msra.mxu0 %v5917_v46  ;;  %4681 = vmatmul.mubr.f32.gmra.mxu1 %v4945_v19 }
 0x2d7   : > { %4739 = vmatprep.subr.mxu1 %v3007_v48  ;;  %4779 = vmatprep.subr.mxu0 %v5921_v51 }
 0x2d8   : > { %4740 = vmatpush3.msra.mxu1 %v3007_v48  ;;  %4759 = vmatprep.mubr.f32.mxu1 %v5849_v37  ;;  %v3003_v37 = vld [vmem:[#allocation13 + $0x428] sm:$0xff] }
 0x2d9   : > { %4780 = vmatpush3.msra.mxu0 %v5921_v51  ;;  %4741 = vmatprep.subr.mxu1 %v3006_v57 }
 0x2da   : > { %4725 = vmatmul.mubr.f32.gmra.mxu0 %v2858_v44  ;;  %4781 = vmatprep.subr.mxu0 %v5926_v12 }
 0x2db   : > { %4742 = vmatpush3.msra.mxu1 %v3006_v57  ;;  %4782 = vmatpush3.msra.mxu0 %v5926_v12 }
 0x2dc   : > { %4743 = vmatprep.subr.mxu1 %v3005_v55  ;;  %4783 = vmatprep.subr.mxu0 %v5930_v61 }
 0x2dd   : > { %4744 = vmatpush3.msra.mxu1 %v3005_v55  ;;  %4784 = vmatpush3.msra.mxu0 %v5930_v61 }
 0x2de   : > { %4745 = vmatprep.subr.mxu1 %v3004_v60  ;;  %4785 = vmatprep.subr.mxu0 %v5934_v58 }
 0x2df   : > { %4746 = vmatpush3.msra.mxu1 %v3004_v60  ;;  %4786 = vmatpush3.msra.mxu0 %v5934_v58 }
 0x2e0   : > { %4747 = vmatprep.subr.mxu1 %v3003_v37  ;;  %4787 = vmatprep.subr.mxu0 %v5938_v0 }
 0x2e1   : > { %4748 = vmatpush3.msra.mxu1 %v3003_v37  ;;  %4788 = vmatpush3.msra.mxu0 %v5938_v0 }
 0x2e2   : > { %4749 = vmatprep.subr.mxu1 %v3002_v1  ;;  %4789 = vmatprep.subr.mxu0 %v5942_v2 }
 0x2e3   : > { %4750 = vmatpush3.msra.mxu1 %v3002_v1  ;;  %4790 = vmatpush3.msra.mxu0 %v5942_v2 }
 0x2e4   : > { %4751 = vmatprep.subr.mxu1 %v3001_v3  ;;  %4791 = vmatprep.subr.mxu0 %v5946_v7 }
 0x2e5   : > { %4752 = vmatpush3.msra.mxu1 %v3001_v3  ;;  %4792 = vmatpush3.msra.mxu0 %v5946_v7 }
 0x2e6   : > { %4753 = vmatprep.subr.mxu1 %v3000_v10  ;;  %4793 = vmatprep.subr.mxu0 %v5950_v25 }
 0x2e7   : > { %4754 = vmatpush3.msra.mxu1 %v3000_v10  ;;  %4794 = vmatpush3.msra.mxu0 %v5950_v25 }
 0x2e8   : > { %4755 = vmatprep.subr.mxu1 %v2999_v13  ;;  %4795 = vmatprep.subr.mxu0 %v5954_v14 }
 0x2e9   : > { %4756 = vmatpush3.msra.mxu1 %v2999_v13  ;;  %4796 = vmatpush3.msra.mxu0 %v5954_v14 }
 0x2ea   : > { %4757 = vmatprep.subr.mxu1 %v2998_v15  ;;  %4797 = vmatprep.subr.mxu0 %v3152_v22 }
 0x2eb   : > { %4758 = vmatpush3.msra.mxu1 %v2998_v15  ;;  %4798 = vmatpush3.msra.mxu0 %v3152_v22 }
 0x2ec   : > { %4760 = vmatmul.mubr.f32.vlgmr.msra.gmra.mxu1 %v5853_v39  ;;  %4815 = vmatprep.subr.mxu1 %v5896_v50  ;;  %v4947_v39 = vld [vmem:[#allocation2 + $0x21] sm:$0xff] }
 0x2ed   : > { %4799 = vmatprep.subr.mxu0 %v3151_v23  ;;  %4762 = vmatprep.mubr.f32.mxu1 %v5857_v42  ;;  %v4948_v42 = vld [vmem:[#allocation2 + $0x31] sm:$0xff] }
 0x2ee   : > { %4831 = vmatpush3.msra.mxu1 %v5896_v50  ;;  %4800 = vmatpush3.msra.mxu0 %v3151_v23 }
 0x2ef   : > { %4816 = vmatprep.subr.mxu1 %v5905_v34  ;;  %4801 = vmatprep.subr.mxu0 %v3150_v28 }
 0x2f0   : > { %4832 = vmatpush3.msra.mxu1 %v5905_v34  ;;  %4802 = vmatpush3.msra.mxu0 %v3150_v28 }
 0x2f1   : > { %4803 = vmatprep.mubr.f32.mxu0 %v4946_v20  ;;  %4763 = vmatmul.mubr.f32.gmra.mxu1 %v5861_v17  ;;  %v2996_v17 = vld [vmem:[#allocation3 + $0x92] sm:$0xff] }
 0x2f2   : > { %4817 = vmatprep.subr.mxu1 %v5910_v26  ;;  %4804 = vmatmul.mubr.f32.vlgmr.msra.gmra.mxu0 %v4947_v39 }
 0x2f3   : > { %4765 = vmatprep.mubr.f32.mxu1 %v5865_v31  ;;  %4833 = vmatpush3.msra.mxu1 %v5910_v26  ;;  %v4950_v31 = vld [vmem:[#allocation2 + $0x51] sm:$0xff] }
 0x2f4   : > { %4818 = vmatprep.subr.mxu1 %v5917_v46  ;;  %4806 = vmatprep.mubr.f32.mxu0 %v4948_v42 }
 0x2f5   : > { %4834 = vmatpush3.msra.mxu1 %v5917_v46 }
 0x2f6   : > { %4766 = vmatmul.mubr.f32.gmra.mxu1 %v5869_v59  ;;  %4819 = vmatprep.subr.mxu1 %v5921_v51 }
 0x2f7   : > { %4807 = vmatmul.mubr.f32.gmra.mxu0 %v4949_v33  ;;  %4768 = vmatprep.mubr.f32.mxu1 %v5890_v45  ;;  %v4953_v45 = vld [vmem:[#allocation2 + $0x81] sm:$0xff] }
 0x2f8   : > { %4835 = vmatpush3.msra.mxu1 %v5921_v51 }
 0x2f9   : > { %4820 = vmatprep.subr.mxu1 %v5926_v12 }
 0x2fa   : > { %4836 = vmatpush3.msra.mxu1 %v5926_v12 }
 0x2fb   : > { %4769 = vmatmul.mubr.f32.gmra.mxu1 %v2996_v17  ;;  %4821 = vmatprep.subr.mxu1 %v5930_v61 }
 0x2fc   : > { %4837 = vmatpush3.msra.mxu1 %v5930_v61  ;;  %4809 = vmatprep.mubr.f32.mxu1 %v4950_v31 }
 0x2fd   : > { %4822 = vmatprep.subr.mxu1 %v5934_v58 }
 0x2fe   : > { %4838 = vmatpush3.msra.mxu1 %v5934_v58 }
 0x2ff   : > { %4823 = vmatprep.subr.mxu1 %v5938_v0 }
 0x300   : > { %4839 = vmatpush3.msra.mxu1 %v5938_v0 }
 0x301   : > { %4824 = vmatprep.subr.mxu1 %v5942_v2 }
 0x302   : > { %4840 = vmatpush3.msra.mxu1 %v5942_v2 }
 0x303   : > { %4825 = vmatprep.subr.mxu1 %v5946_v7 }
 0x304   : > { %4841 = vmatpush3.msra.mxu1 %v5946_v7 }
 0x305   : > { %4826 = vmatprep.subr.mxu1 %v5950_v25 }
 0x306   : > { %4842 = vmatpush3.msra.mxu1 %v5950_v25 }
 0x307   : > { %4827 = vmatprep.subr.mxu1 %v5954_v14 }
 0x308   : > { %4843 = vmatpush3.msra.mxu1 %v5954_v14 }
 0x309   : > { %4828 = vmatprep.subr.mxu1 %v3152_v22 }
 0x30a   : > { %4844 = vmatpush3.msra.mxu1 %v3152_v22 }
 0x30b   : > { %4829 = vmatprep.subr.mxu1 %v3151_v23 }
 0x30c   : > { %4845 = vmatpush3.msra.mxu1 %v3151_v23 }
 0x30d   : > { %4830 = vmatprep.subr.mxu1 %v3150_v28  ;;  %v5992_v59 = vpop.f32.mrf.mxu1 }
 0x30e   : > { %4846 = vmatpush3.msra.mxu1 %v3150_v28 }
 0x30f   : > { %4810 = vmatmul.mubr.f32.vlgmr.msra.gmra.mxu1 %v4951_v24  ;;  %v5994_v35 = vpop.f32.mrf.mxu1 }
 0x310   : > { %4812 = vmatprep.mubr.f32.mxu1 %v4952_v5 }
 0x311   : > { %v5996_v29 = vpop.f32.mrf.mxu1 }
 0x313   : > { %4813 = vmatmul.mubr.f32.gmra.mxu1 %v4953_v45  ;;  %v5998_v32 = vpop.f32.mrf.mxu1 }
 0x315   : > { %v4453_v9 = vpop.f32.mrf.mxu0 }
 0x316   : > { %v2127_v31 = vadd.f32 %v4453_v9, %v5992_v59 }
 0x317   : > { %v2121_v63 = vpop.f32.mrf.mxu0  ;;  %v4415_v52 = vpop.f32.mrf.mxu1 }
 0x318   : > { %v2122_v5 = vadd.f32 %v2121_v63, %v5994_v35 }
 0x319   : > { %v4456_v49 = vpop.f32.mrf.mxu0  ;;  %v2036_v21 = vpop.f32.mrf.mxu1 }
 0x31b   : > { %v6000_v36 = vpop.f32.mrf.mxu0 }
 0x31d   : > { %v4459_v16 = vpop.f32.mrf.mxu0 }
 0x31e   : > { %v6002_v38 = vadd.f32 %v4459_v16, %v4415_v52 }
 0x31f   : > { %v2141_v6 = vpop.f32.mrf.mxu0 }
 0x320   : > { %v6004_v56 = vadd.f32 %v2141_v6, %v2036_v21  ;;  %v2137_v6 = vadd.f32 %v4456_v49, %v5996_v29 }
 0x321   : > { %v4418_v41 = vpop.f32.mrf.mxu1 }
 0x322   : > { %v4462_v40 = vpop.f32.mrf.mxu0 }
 0x323   : > { %v6006_v8 = vadd.f32 %v4462_v40, %v4418_v41  ;;  %v2046_v62 = vpop.f32.mrf.mxu1 }
 0x324   : > { %v2151_v30 = vpop.f32.mrf.mxu0 }
 0x325   : > { %v6008_v47 = vadd.f32 %v2151_v30, %v2046_v62  ;;  %v2132_v30 = vadd.f32 %v6000_v36, %v5998_v32 }
 0x336   : > { %v4497_v27 = vpop.f32.mrf.mxu1 }
 0x337   : > { %v4541_v50 = vpop.f32.mrf.mxu0  ;;  %v2291_v45 = vadd.f32 %v4497_v27, %v2127_v31 }
 0x338   : > { %v2251_v18 = vpop.f32.mrf.mxu1 }
 0x339   : > { %v2389_v4 = vpop.f32.mrf.mxu0  ;;  %v2429_v16 = vadd.f32 %v4541_v50, %v2291_v45  ;;  %v2290_v21 = vadd.f32 %v2251_v18, %v2122_v5 }
 0x33b   : > { %v2428_v40 = vadd.f32 %v2389_v4, %v2290_v21 }
 0x33c   : > { %v4500_v53 = vpop.f32.mrf.mxu1 }
 0x33d   : > { %v4544_v34 = vpop.f32.mrf.mxu0 }
 0x33e   : > { %v2261_v11 = vpop.f32.mrf.mxu1 }
 0x33f   : > { %v2399_v26 = vpop.f32.mrf.mxu0  ;;  %v2292_v63 = vadd.f32 %v2261_v11, %v2132_v30 }
 0x341   : > { %v2430_v31 = vadd.f32 %v2399_v26, %v2292_v63 }
 0x342   : > { %v6010_v43 = vpop.f32.mrf.mxu1 }
 0x343   : > { %v6014_v46 = vpop.f32.mrf.mxu0 }
 0x344   : > { %v6012_v54 = vpop.f32.mrf.mxu1 }
 0x345   : > { %v6018_v51 = vpop.f32.mrf.mxu0 }
 0x348   : > { %v6016_v48 = vpop.f32.mrf.mxu1 }
 0x349   : > { %v6022_v57 = vpop.f32.mrf.mxu0 }
 0x34a   : > { %v6020_v19 = vpop.f32.mrf.mxu1 }
 0x34b   : > { %v6024_v12 = vpop.f32.mrf.mxu0 }
 0x35e   : > { %v4585_v44 = vpop.f32.mrf.mxu1 }
 0x35f   : > { %v4629_v61 = vpop.f32.mrf.mxu0  ;;  %v2567_v62 = vadd.f32 %v4585_v44, %v2429_v16 }
 0x360   : > { %v2527_v55 = vpop.f32.mrf.mxu1 }
 0x361   : > { %v2665_v58 = vpop.f32.mrf.mxu0  ;;  %v2705_v59 = vadd.f32 %v4629_v61, %v2567_v62  ;;  %v2566_v9 = vadd.f32 %v2527_v55, %v2428_v40 }
 0x363   : > { %v2704_v50 = vadd.f32 %v2665_v58, %v2566_v9 }
 0x364   : > { %v4588_v60 = vpop.f32.mrf.mxu1 }
 0x365   : > { %v4632_v0 = vpop.f32.mrf.mxu0 }
 0x366   : > { %v2537_v37 = vpop.f32.mrf.mxu1 }
 0x367   : > { %v2675_v2 = vpop.f32.mrf.mxu0  ;;  %v2568_v45 = vadd.f32 %v2537_v37, %v2430_v31  ;;  %v6072_v37 = vld [vmem:[%s6187_s9] ss:$0 sm:$0xff] }
 0x369   : > { %v2706_v55 = vadd.f32 %v2675_v2, %v2568_v45  ;;  %v2295_v45 = vadd.f32 %v6010_v43, %v6002_v38  ;;  %v2296_v43 = vadd.f32 %v6020_v19, %v6008_v47 }
 0x36a   : > { %v6026_v1 = vpop.f32.mrf.mxu1 }
 0x36b   : > { %v6030_v7 = vpop.f32.mrf.mxu0 }
 0x36c   : > { %v6028_v3 = vpop.f32.mrf.mxu1 }
 0x36d   : > { %v6034_v25 = vpop.f32.mrf.mxu0 }
 0x370   : > { %v6032_v10 = vpop.f32.mrf.mxu1 }
 0x371   : > { %v6038_v14 = vpop.f32.mrf.mxu0 }
 0x372   : > { %v6036_v13 = vpop.f32.mrf.mxu1 }
 0x373   : > { %6260 = vst [vmem:[#allocation29_spill] sm:$0xff] %v6036_v13  ;;  %v6040_v22 = vpop.f32.mrf.mxu0 }
 0x374   : > { %6261 = vst [vmem:[#allocation30_spill] sm:$0xff] %v6040_v22  ;;  %v2293_v22 = vadd.f32 %v4500_v53, %v2137_v6  ;;  %v6064_v53 = vld [vmem:[%s6185_s7] ss:$0 sm:$0xff] }
 0x376   : > { %v2431_v35 = vadd.f32 %v4544_v34, %v2293_v22 }
 0x378   : > { %v2569_v29 = vadd.f32 %v4588_v60, %v2431_v35 }
 0x37a   : > { %v2707_v5 = vadd.f32 %v4632_v0, %v2569_v29 }
 0x386   : > { %v4673_v15 = vpop.f32.mrf.mxu1 }
 0x387   : > { %v4717_v28 = vpop.f32.mrf.mxu0  ;;  %v2844_v18 = vadd.f32 %v4673_v15, %v2705_v59 }
 0x388   : > { %v2804_v23 = vpop.f32.mrf.mxu1 }
 0x389   : > { %v2942_v39 = vpop.f32.mrf.mxu0  ;;  %v2982_v4 = vadd.f32 %v4717_v28, %v2844_v18  ;;  %v2843_v44 = vadd.f32 %v2804_v23, %v2704_v50 }
 0x38a   : > { %v4676_v20 = vpop.f32.mrf.mxu1 }
 0x38b   : > { %v4720_v33 = vpop.f32.mrf.mxu0  ;;  %v2981_v11 = vadd.f32 %v2942_v39, %v2843_v44  ;;  %v2846_v61 = vadd.f32 %v4676_v20, %v2707_v5 }
 0x38c   : > { %v2814_v42 = vpop.f32.mrf.mxu1 }
 0x38d   : > { %v2952_v24 = vpop.f32.mrf.mxu0  ;;  %v2984_v15 = vadd.f32 %v4720_v33, %v2846_v61  ;;  %v2845_v22 = vadd.f32 %v2814_v42, %v2706_v55  ;;  %v2294_v55 = vadd.f32 %v6012_v54, %v6004_v56 }
 0x38f   : > { %v2983_v39 = vadd.f32 %v2952_v24, %v2845_v22  ;;  %v2434_v22 = vadd.f32 %v6024_v12, %v2296_v43 }
 0x390   : > { %v6042_v17 = vpop.f32.mrf.mxu1 }
 0x391   : > { %v6049_v41 = vpop.f32.mrf.mxu0 }
 0x392   : > { %v6046_v52 = vpop.f32.mrf.mxu1 }
 0x393   : > { %v6055_v27 = vpop.f32.mrf.mxu0 }
 0x396   : > { %v6053_v13 = vpop.f32.mrf.mxu1 }
 0x398   : > { %v6057_v49 = vpop.f32.mrf.mxu1 }
 0x39a   : > { %v6059_v32 = vpop.f32.mrf.mxu0 }
 0x39c   : > { %v6067_v0 = vpop.f32.mrf.mxu0 }
 0x3ac   : > { %v4761_v36 = vpop.f32.mrf.mxu1 }
 0x3ad   : > { %v3120_v34 = vadd.f32 %v4761_v36, %v2982_v4 }
 0x3ae   : > { %v3080_v26 = vpop.f32.mrf.mxu1 }
 0x3af   : > { %v3135_v60 = vadd.f32 %v6064_v53, %v3120_v34  ;;  %v3119_v58 = vadd.f32 %v3080_v26, %v2981_v11  ;;  %v2433_v34 = vadd.f32 %v6014_v46, %v2295_v45 }
 0x3b1   : > { %v3134_v23 = vadd.f32 %v6064_v53, %v3119_v58  ;;  %v4764_v28 = vpop.f32.mrf.mxu1  ;;  %v3143_v20 = vmax.f32 %v3135_v60, 0.0  ;;  %v2432_v60 = vadd.f32 %v6018_v51, %v2294_v55  ;;  %v2297_v58 = vadd.f32 %v6016_v48, %v6006_v8 }
 0x3b2   : > { %v3122_v16 = vadd.f32 %v4764_v28, %v2984_v15  ;;  %v4805_v2 = vpop.f32.mrf.mxu0  ;;  %v2571_v15 = vadd.f32 %v6026_v1, %v2433_v34  ;;  %v6262_v1 = vld [vmem:[#allocation29_spill] sm:$0xff] }
 0x3b3   : > { %v3245_v21 = vadd.f32 %v4805_v2, %v6072_v37  ;;  %v3090_v6 = vpop.f32.mrf.mxu1  ;;  %v3142_v62 = vmax.f32 %v3134_v23, 0.0  ;;  %v2435_v38 = vadd.f32 %v6022_v57, %v2297_v58  ;;  %v2570_v56 = vadd.f32 %v6028_v3, %v2432_v60 }
 0x3b4   : > { %v3137_v42 = vadd.f32 %v6064_v53, %v3122_v16  ;;  %v3121_v33 = vadd.f32 %v3090_v6, %v2983_v39  ;;  %v3239_v40 = vpop.f32.mrf.mxu0  ;;  %v2709_v46 = vadd.f32 %v6030_v7, %v2571_v15  ;;  %v2572_v57 = vadd.f32 %v6262_v1, %v2434_v22  ;;  %v6263_v7 = vld [vmem:[#allocation30_spill] sm:$0xff] }
 0x3b5   : > { %v3279_v30 = vadd.f32 %v3245_v21, %v3143_v20  ;;  %v3240_v59 = vadd.f32 %v6072_v37, %v3239_v40  ;;  %v2708_v51 = vadd.f32 %v6034_v25, %v2570_v56  ;;  %v2573_v23 = vadd.f32 %v6032_v10, %v2435_v38 }
 0x3b6   : > { %v3136_v9 = vadd.f32 %v6064_v53, %v3121_v33  ;;  %v3145_v50 = vmax.f32 %v3137_v42, 0.0  ;;  %v4767_v26 = vpop.f32.mrf.mxu1  ;;  %v2848_v8 = vadd.f32 %v6042_v17, %v2709_v46  ;;  %v2710_v3 = vadd.f32 %v6263_v7, %v2572_v57 }
 0x3b7   : > { %v3287_v35 = vmax.f32 %v3279_v30, 0.0  ;;  %v3278_v63 = vadd.f32 %v3240_v59, %v3142_v62  ;;  %v4808_v24 = vpop.f32.mrf.mxu0  ;;  %v2711_v48 = vadd.f32 %v6038_v14, %v2573_v23  ;;  %v2847_v47 = vadd.f32 %v6046_v52, %v2708_v51 }
 0x3b8   : > { %v3255_v18 = vadd.f32 %v4808_v24, %v6072_v37  ;;  %v3144_v4 = vmax.f32 %v3136_v9, 0.0  ;;  %v3100_v54 = vpop.f32.mrf.mxu1  ;;  %v2986_v28 = vadd.f32 %v6049_v41, %v2848_v8  ;;  %v2849_v10 = vadd.f32 %v6057_v49, %v2710_v3 }
 0x3b9   : > { %3295 = vst [vmem:[%s6081_s22 + $0x8] sm:$0xff] %v3287_v35  ;;  %v3286_v31 = vmax.f32 %v3278_v63, 0.0  ;;  %v3249_v29 = vpop.f32.mrf.mxu0  ;;  %v2985_v39 = vadd.f32 %v6055_v27, %v2847_v47  ;;  %v2850_v12 = vadd.f32 %v6053_v13, %v2711_v48 }
 0x3ba   : > { %v3281_v44 = vadd.f32 %v3255_v18, %v3145_v50  ;;  %v3250_v5 = vadd.f32 %v6072_v37, %v3249_v29  ;;  %v3124_v25 = vadd.f32 %v4767_v26, %v2986_v28  ;;  %v2987_v2 = vadd.f32 %v6067_v0, %v2849_v10 }
 0x3bb   : > { %3294 = vst [vmem:[%s6081_s22] sm:$0xff] %v3286_v31  ;;  %v4770_v19 = vpop.f32.mrf.mxu1  ;;  %v2988_v17 = vadd.f32 %v6059_v32, %v2850_v12  ;;  %v3123_v16 = vadd.f32 %v3100_v54, %v2985_v39 }
 0x3bc   : > { %v3289_v36 = vmax.f32 %v3281_v44, 0.0  ;;  %v3280_v11 = vadd.f32 %v3250_v5, %v3144_v4  ;;  %v3139_v41 = vadd.f32 %v6064_v53, %v3124_v25 }
 0x3bd   : > { %v3110_v14 = vpop.f32.mrf.mxu1  ;;  %v3126_v20 = vadd.f32 %v4770_v19, %v2988_v17  ;;  %v3138_v52 = vadd.f32 %v6064_v53, %v3123_v16 }
 0x3be   : > { %3297 = vst [vmem:[%s6081_s22 + $0x18] sm:$0xff] %v3289_v36  ;;  %v3288_v61 = vmax.f32 %v3280_v11, 0.0  ;;  %v3125_v21 = vadd.f32 %v3110_v14, %v2987_v2  ;;  %v3147_v27 = vmax.f32 %v3139_v41, 0.0 }
 0x3bf   : > { %v3141_v13 = vadd.f32 %v6064_v53, %v3126_v20  ;;  %v3146_v32 = vmax.f32 %v3138_v52, 0.0 }
 0x3c0   : > { %3296 = vst [vmem:[%s6081_s22 + $0x10] sm:$0xff] %v3288_v61  ;;  %v3140_v33 = vadd.f32 %v6064_v53, %v3125_v21 }
 0x3c1   : > { %v3149_v30 = vmax.f32 %v3141_v13, 0.0 }
 0x3c2   : > { %v3148_v24 = vmax.f32 %v3140_v33, 0.0 }
 0x3cf   : > { %v4811_v6 = vpop.f32.mrf.mxu1 }
 0x3d0   : > { %v3265_v49 = vadd.f32 %v4811_v6, %v6072_v37 }
 0x3d1   : > { %v3259_v42 = vpop.f32.mrf.mxu1 }
 0x3d2   : > { %v3283_v0 = vadd.f32 %v3265_v49, %v3147_v27  ;;  %v3260_v40 = vadd.f32 %v6072_v37, %v3259_v42 }
 0x3d3   : > { %v4814_v62 = vpop.f32.mrf.mxu1 }
 0x3d4   : > { %v3291_v59 = vmax.f32 %v3283_v0, 0.0  ;;  %v3282_v9 = vadd.f32 %v3260_v40, %v3146_v32  ;;  %v3275_v35 = vadd.f32 %v4814_v62, %v6072_v37 }
 0x3d5   : > { %v3269_v63 = vpop.f32.mrf.mxu1 }
 0x3d6   : > { %3299 = vst [vmem:[%s6081_s22 + $0x28] sm:$0xff] %v3291_v59  ;;  %v3290_v50 = vmax.f32 %v3282_v9, 0.0  ;;  %v3285_v53 = vadd.f32 %v3275_v35, %v3149_v30  ;;  %v3270_v18 = vadd.f32 %v6072_v37, %v3269_v63 }
 0x3d8   : > { %3298 = vst [vmem:[%s6081_s22 + $0x20] sm:$0xff] %v3290_v50  ;;  %v3293_v31 = vmax.f32 %v3285_v53, 0.0  ;;  %v3284_v29 = vadd.f32 %v3270_v18, %v3148_v24 }
 0x3da   : > { %3301 = vst [vmem:[%s6081_s22 + $0x38] sm:$0xff] %v3293_v31  ;;  %v3292_v4 = vmax.f32 %v3284_v29, 0.0 }
 0x3dc   : > { %3300 = vst [vmem:[%s6081_s22 + $0x30] sm:$0xff] %v3292_v4 }
 0x3dd   : > { %5157 = shalt.err (!%p5154_p12)
}
 0x3de   : > { %s5158_s26 = scalar_lea.hbm %s6133_s29, 1024  ;;  %s5162_s24 = scalar_lea.hbm %s6264_s0, 2048 }
 0x3df   : > { %p5159_p3 = scmp.ne.s32.totalorder %s6133_s29, %s5158_s26  ;;  %p5163_p13 = scmp.lt.s32.totalorder %s6133_s29, %s6264_s0 }
 0x3e0   : > { %p5164_p2 = scmp.lt.s32.totalorder %s5162_s24, %s5158_s26 }
 0x3e1   : > { %p5160_p6 = pnand %p5159_p3, %p6265_p10 }
 0x3e2   : > { %p5165_p7 = por %p5164_p2, %p5163_p13 }
 0x3e3   : > { %p5161_p8 = pneg %p5160_p6 }
 0x3e5   : > { %p5166_p9 = pnand %p5165_p7, %p5161_p8 }
 0x3e7   : > { %5169 = shalt.err (!%p5166_p9)
}
 0x3e8   : > { %s5237_s18 = smov 128   ;;  %s5238_s30 = smov 8  }
 0x3e9   : > { %4867 = dma.vmem_to_hbm [thread:$0]  (%p6265_p10), %s6127_s19, 1024, %s6133_s29, %s3303_s11, %s5237_s18, %s5237_s18, %s5238_s30  }
 0x3ea PF: > { %s6266_s28 = sld [smem:[#allocation23_spill]]  ;;  %p6269_p5 = scmp.ge.s32.totalorder %s5224_s16, 2 }
 0x3eb   : > { %s6267_s22 = sld [smem:[#allocation26_spill]] }
 0x3f0   : > { %s3331_s4 = sand.u32 1, %s6266_s28  }
 0x3f1   : > { %p6268_p1 = scmp.ne.s32.totalorder %s6267_s22, 0  ;;  %s3332_s10 = scalar_lea.sflag [#allocation6], %s3331_s4 }
 0x3f3   : > { %p4893_p4 = pnand %p6269_p5, %p6268_p1 }
 0x3f5   : > { %p4894_p0 = pneg %p4893_p4 }
 0x3f7   : > { %5207 = dma.done.wait (%p4894_p0), %s3332_s10, 1024  }
 0x3f8   : > { %5209 = vsyncadd (%p4894_p0), %s3332_s10, 4294966272  ;;  %s6270_s16 = sld [smem:[#allocation24_spill]]  ;;  %s6272_s13 = smov %s5216_s14 }
 0x3f9   : > { %s6271_s12 = sld [smem:[#allocation25_spill]]  ;;  %s6273_s14 = smov %s5220_s15 }
 0x3fe   : > { %p30_p11 = scmp.ge.s32.totalorder %s6270_s16, 4  }
 0x3ff   : > { %s6274_s15 = smov %s6271_s12 }
 0x400   :  { %32 = sbr.rel (!%p30_p11) target bundleno = 17 (0x11), region = 174 }
 0x405   :  { %3337 = vsyncpa [#allocation5], 1 }
 0x406   :  { %3339 = vsyncpa [#allocation5 + $0x1], 1 }
 0x407   :  { %3340 = vsyncpa [#allocation8], 1 }
 0x408   :  { %3342 = vsyncpa [#allocation8 + $0x1], 1 }
 0x409   :  { %3343 = vsyncpa [#allocation11], 1 }
 0x40a   :  { %3345 = vsyncpa [#allocation11 + $0x1], 1 }
 0x40b   :  { %3346 = vsyncpa [#allocation14], 1 }
 0x40c   :  { %3347 = vsyncpa [#allocation6], 1 }
 0x40d   :  { %3349 = vsyncpa [#allocation6 + $0x1], 1 }

</bundles_post_ra>
